<compile_context>
chip_gen: v6e
topology: v6e:2x2x1
jax: 0.10.0
libtpu: 0.0.40
codegen_flags: <defaults>
</compile_context>

<pallas_src>
import jax
import jax.numpy as jnp
from jax.experimental import pallas as pl
from jax.experimental.pallas import tpu as pltpu


# ----------------------------------------------------------------------------- kernel
def make_vae_kernel(G, act_dtype, dec0_use_mxu):
    """Build the kernel with gaussian_dim / activation dtype baked in at trace time."""

    def vae_kernel(x_ref, eps_ref,
                   ew0, eb0, ew1, eb1, ew2, eb2,      # encoder linears
                   hw, hb,                            # fused mean||logvar head (f32, N padded)
                   dw0, db0,                          # decoder L0 (tiny K)
                   dw1, db1, dw2, db2, dw3, db3,      # decoder linears (dw3/db3 pre-scaled by 3)
                   xhat_ref, ml_ref):

        def linear_relu(h, w_ref, b_ref):
            # cast activations to the weight dtype at the dot; accumulate f32 on the MXU;
            # bias-add + ReLU, then round back to the activation dtype for the next layer.
            acc = jnp.dot(h.astype(w_ref.dtype), w_ref[...],
                          preferred_element_type=jnp.float32) + b_ref[...]
            return jnp.maximum(acc, 0.0).astype(act_dtype)

        # ---- encoder: Linear+ReLU, Linear+ReLU, Linear(latent)+ReLU ----
        h = linear_relu(x_ref[...], ew0, eb0)
        h = linear_relu(h, ew1, eb1)
        h = linear_relu(h, ew2, eb2)

        # ---- fused heads: one matmul, f32 weights, lane-dense (padded-N) store ----
        ml = jnp.dot(h.astype(hw.dtype), hw[...],
                     preferred_element_type=jnp.float32) + hb[...]
        ml_ref[...] = ml
        mean = ml[:, :G]
        logvar = ml[:, G:2 * G]

        # ---- reparameterization (matches the module: z = mean + logvar * eps) ----
        z = mean + logvar * eps_ref[...].astype(jnp.float32)

        # ---- decoder L0: K == gaussian_dim ----
        if dec0_use_mxu:
            d = jnp.dot(z, dw0[...], preferred_element_type=jnp.float32) + db0[...]
        else:
            d = db0[...]                       # (1, latent), broadcasts over rows
            for k in range(G):                 # static unroll; G tiny & known at trace time
                d = d + z[:, k:k + 1] * dw0[k:k + 1, :]
        d = jnp.maximum(d, 0.0).astype(act_dtype)

        # ---- remaining decoder: Linear+ReLU x2, Linear (3x already folded in) ----
        d = linear_relu(d, dw1, db1)
        d = linear_relu(d, dw2, db2)
        out = jnp.dot(d.astype(dw3.dtype), dw3[...],
                      preferred_element_type=jnp.float32) + db3[...]
        xhat_ref[...] = out.astype(xhat_ref.dtype)

    return vae_kernel


# ----------------------------------------------------------------------------- params
def make_vae_params(key, data_dim, latent_dim, gaussian_dim, hidden_dim):
    """Deterministic kaiming-normal-style init; weights stored (in, out), biases (1, out)."""
    layer_dims = [
        # encoder (N_layers=2)
        (data_dim, hidden_dim),
        (hidden_dim, hidden_dim),
        (hidden_dim, latent_dim),
        # mean / logvar heads
        (latent_dim, gaussian_dim),
        (latent_dim, gaussian_dim),
        # decoder (N_layers=2)
        (gaussian_dim, latent_dim),
        (latent_dim, hidden_dim),
        (hidden_dim, hidden_dim),
        (hidden_dim, data_dim),
    ]
    params = []
    keys = jax.random.split(key, len(layer_dims))
    for k, (fan_in, fan_out) in zip(keys, layer_dims):
        std = jnp.sqrt(2.0 / fan_in).astype(jnp.float32)
        w = std * jax.random.normal(k, (fan_in, fan_out), jnp.float32)
        b = jnp.zeros((1, fan_out), jnp.float32)
        params.append((w, b))
    return params


# ----------------------------------------------------------------------------- wrapper
def _tpu_generation():
    try:
        kind = jax.devices()[0].device_kind.lower()
        for g in (7, 6, 5, 4):
            if f"v{g}" in kind:
                return g
    except Exception:
        pass
    return 6  # assume a modern part if detection fails


def _weight_spec(arr, single_buffer):
    # whole-array block, constant across grid steps (weights stay resident in VMEM)
    if single_buffer:
        return pl.BlockSpec(arr.shape, lambda i: (0, 0), pipeline_mode=pl.Buffered(1))
    return pl.BlockSpec(arr.shape, lambda i: (0, 0))


def vae_forward(x, eps, params, *, compute_dtype=jnp.float32, block_m=None):
    B, data_dim = x.shape
    G = eps.shape[1]
    gen = _tpu_generation()

    (ew0, eb0), (ew1, eb1), (ew2, eb2), (mw, mb), (lw, lb), \
        (dw0, db0), (dw1, db1), (dw2, db2), (dw3, db3) = params

    # -------- parameter prep --------
    # fuse mean/logvar heads into a single matmul, pad N up to a lane-dense width
    head_n = max(128, -(-2 * G // 128) * 128)
    hw = jnp.concatenate([mw, lw], axis=1)
    hb = jnp.concatenate([mb, lb], axis=1)
    hw = jnp.pad(hw, ((0, 0), (0, head_n - 2 * G)))   # f32 even on the bf16 path
    hb = jnp.pad(hb, ((0, 0), (0, head_n - 2 * G)))
    # fold the final 3x output scale into the last decoder layer
    dw3s, db3s = 3.0 * dw3, 3.0 * db3

    cd = jnp.dtype(compute_dtype)
    bf16_path = cd == jnp.bfloat16
    # bf16 activations end-to-end on v6e/v7x (bf16 VPU); cast-at-the-dot only on v5e
    act_dtype = jnp.bfloat16 if (bf16_path and gen >= 6) else jnp.float32

    # large matmul weights in compute dtype; head + tiny decoder-L0 weight + biases in f32
    ew0c, ew1c, ew2c = ew0.astype(cd), ew1.astype(cd), ew2.astype(cd)
    dw1c, dw2c, dw3c = dw1.astype(cd), dw2.astype(cd), dw3s.astype(cd)
    weights = [ew0c, eb0, ew1c, eb1, ew2c, eb2, hw, hb,
               dw0, db0, dw1c, db1, dw2c, db2, dw3c, db3s]

    # stream x in the compute dtype (largest per-step DMA); eps is tiny, keep f32
    x_c = x.astype(cd) if bf16_path else x

    # -------- generation-dependent batch tiling --------
    if block_m is None:
        num_tiles = 2 if gen >= 7 else 1        # use both TCs on v7x; 1 fat step otherwise
        block_m = -(-B // num_tiles)
        block_m = min(512, block_m)             # keep activation tiles comfortably in VMEM
    block_m = max(8, -(-block_m // 8) * 8)
    B_pad = -(-B // block_m) * block_m
    if B_pad != B:
        # TODO(synk): masked last block instead of jnp.pad for large ragged serving batches
        x_c = jnp.pad(x_c, ((0, B_pad - B), (0, 0)))
        eps = jnp.pad(eps, ((0, B_pad - B), (0, 0)))
    grid = (B_pad // block_m,)

    kernel = make_vae_kernel(G, act_dtype, dec0_use_mxu=(G >= 8))

    out_shape = (jax.ShapeDtypeStruct((B_pad, data_dim), jnp.float32),
                 jax.ShapeDtypeStruct((B_pad, head_n), jnp.float32))
    out_specs = (pl.BlockSpec((block_m, data_dim), lambda i: (i, 0)),
                 pl.BlockSpec((block_m, head_n), lambda i: (i, 0)))

    # -------- VMEM budget + advisory cost --------
    stream_bytes = 2 * block_m * data_dim * x_c.dtype.itemsize      # x   (double-buffered)
    stream_bytes += 2 * block_m * G * eps.dtype.itemsize             # eps
    stream_bytes += 2 * block_m * data_dim * 4                       # x_hat out
    stream_bytes += 2 * block_m * head_n * 4                         # ml out
    weight_bytes = sum(int(w.size) * w.dtype.itemsize for w in weights)
    vmem_limit = int(min(max(2 * (stream_bytes + weight_bytes) + (4 << 20), 32 << 20),
                         48 << 20))

    matmul_dims = [(data_dim, ew0.shape[1]), (ew0.shape[1], ew1.shape[1]),
                   (ew1.shape[1], ew2.shape[1]), (ew2.shape[1], head_n),
                   (G, dw0.shape[1]), (dw0.shape[1], dw1.shape[1]),
                   (dw1.shape[1], dw2.shape[1]), (dw2.shape[1], data_dim)]
    flops = 2 * B_pad * sum(m * n for m, n in matmul_dims)
    bytes_accessed = (int(x_c.size) * x_c.dtype.itemsize + int(eps.size) * eps.dtype.itemsize
                      + weight_bytes + B_pad * (data_dim + head_n) * 4)
    cost = pl.CostEstimate(flops=flops, transcendentals=0, bytes_accessed=bytes_accessed)
    cparams = pltpu.CompilerParams(dimension_semantics=("parallel",),
                                   vmem_limit_bytes=vmem_limit)

    def build(single_buffer_weights):
        in_specs = [pl.BlockSpec((block_m, data_dim), lambda i: (i, 0)),
                    pl.BlockSpec((block_m, G), lambda i: (i, 0))]
        in_specs += [_weight_spec(w, single_buffer_weights) for w in weights]
        return pl.pallas_call(
            kernel,
            out_shape=out_shape,
            grid=grid,
            in_specs=in_specs,
            out_specs=out_specs,
            compiler_params=cparams,
            cost_estimate=cost,
        )

    try:
        x_hat, ml = build(True)(x_c, eps, *weights)
        jax.block_until_ready((x_hat, ml))
    except Exception:
        # fallback if single-buffered (Buffered(1)) specs are rejected by this jax build
        x_hat, ml = build(False)(x_c, eps, *weights)
        jax.block_until_ready((x_hat, ml))

    mean = ml[:B, :G]
    logvar = ml[:B, G:2 * G]
    return x_hat[:B], mean, logvar


# ----------------------------------------------------------------------------- reference
def vae_forward_ref(x, eps, params):
    """Plain-JAX reference for correctness checking (unfused, f32)."""
    def lin(h, p):
        return h @ p[0] + p[1]

    h = x
    h = jnp.maximum(lin(h, params[0]), 0.0)
    h = jnp.maximum(lin(h, params[1]), 0.0)
    h = jnp.maximum(lin(h, params[2]), 0.0)
    mean = lin(h, params[3])
    logvar = lin(h, params[4])
    z = mean + logvar * eps
    d = jnp.maximum(lin(z, params[5]), 0.0)
    d = jnp.maximum(lin(d, params[6]), 0.0)
    d = jnp.maximum(lin(d, params[7]), 0.0)
    d = lin(d, params[8])
    return 3.0 * d, mean, logvar


if __name__ == "__main__":
    # Small shapes consistent with the module (data_dim, latent_dim, gaussian_dim,
    # hidden_dim, N_layers=2), scaled down for a quick self-check.
    B, data_dim, latent_dim, gaussian_dim, hidden_dim = 64, 256, 128, 2, 128

    root = jax.random.PRNGKey(0)
    k_x, k_eps, k_params = jax.random.split(root, 3)
    x = jax.random.normal(k_x, (B, data_dim), jnp.float32)
    eps = jax.random.normal(k_eps, (B, gaussian_dim), jnp.float32)  # torch.randn_like(logvar)
    params = make_vae_params(k_params, data_dim, latent_dim, gaussian_dim, hidden_dim)

    x_hat_r, mean_r, logvar_r = vae_forward_ref(x, eps, params)

    # f32 path: strict correctness check
    x_hat, mean, logvar = vae_forward(x, eps, params, compute_dtype=jnp.float32)
    jax.block_until_ready((x_hat, mean, logvar))
    assert jnp.allclose(x_hat, x_hat_r, atol=1e-3, rtol=1e-3)
    assert jnp.allclose(mean, mean_r, atol=1e-4, rtol=1e-4)
    assert jnp.allclose(logvar, logvar_r, atol=1e-4, rtol=1e-4)

    # bf16 matmul/activation fast path (v6e/v7x; cast-at-dot on v5e): relative-error check
    x_hat_b, mean_b, logvar_b = vae_forward(x, eps, params, compute_dtype=jnp.bfloat16)
    jax.block_until_ready((x_hat_b, mean_b, logvar_b))

    def rel_l2(a, b):
        return float(jnp.linalg.norm(a - b) / (jnp.linalg.norm(b) + 1e-6))

    assert rel_l2(x_hat_b, x_hat_r) < 1e-1
    assert rel_l2(mean_b, mean_r) < 1e-1
    assert rel_l2(logvar_b, logvar_r) < 1e-1

    print("KERNEL_OK")
</pallas_src>

<mosaic_0001>
module attributes {stable_mosaic.version = 11 : i64} {
  func.func @vae_kernel(%arg0: i32, %arg1: memref<64x256xf32, #tpu.memory_space<vmem>>, %arg2: memref<64x2xf32, #tpu.memory_space<vmem>>, %arg3: memref<256x128xf32, #tpu.memory_space<vmem>>, %arg4: memref<1x128xf32, #tpu.memory_space<vmem>>, %arg5: memref<128x128xf32, #tpu.memory_space<vmem>>, %arg6: memref<1x128xf32, #tpu.memory_space<vmem>>, %arg7: memref<128x128xf32, #tpu.memory_space<vmem>>, %arg8: memref<1x128xf32, #tpu.memory_space<vmem>>, %arg9: memref<128x128xf32, #tpu.memory_space<vmem>>, %arg10: memref<1x128xf32, #tpu.memory_space<vmem>>, %arg11: memref<2x128xf32, #tpu.memory_space<vmem>>, %arg12: memref<1x128xf32, #tpu.memory_space<vmem>>, %arg13: memref<128x128xf32, #tpu.memory_space<vmem>>, %arg14: memref<1x128xf32, #tpu.memory_space<vmem>>, %arg15: memref<128x128xf32, #tpu.memory_space<vmem>>, %arg16: memref<1x128xf32, #tpu.memory_space<vmem>>, %arg17: memref<128x256xf32, #tpu.memory_space<vmem>>, %arg18: memref<1x256xf32, #tpu.memory_space<vmem>>, %arg19: memref<64x256xf32, #tpu.memory_space<vmem>>, %arg20: memref<64x128xf32, #tpu.memory_space<vmem>>) attributes {dimension_semantics = [#tpu.dimension_semantics<parallel>], iteration_bounds = array<i64: 1>, scalar_prefetch = 0 : i64, scratch_operands = 0 : i64, tpu.core_type = #tpu.core_type<tc>, window_params = [{transform_indices = @transform_0, window_bounds = array<i64: 64, 256>}, {transform_indices = @transform_1, window_bounds = array<i64: 64, 2>}, {pipeline_mode = #tpu.pipeline_mode<synchronous>, transform_indices = @transform_2, window_bounds = array<i64: 256, 128>}, {pipeline_mode = #tpu.pipeline_mode<synchronous>, transform_indices = @transform_3, window_bounds = array<i64: 1, 128>}, {pipeline_mode = #tpu.pipeline_mode<synchronous>, transform_indices = @transform_4, window_bounds = array<i64: 128, 128>}, {pipeline_mode = #tpu.pipeline_mode<synchronous>, transform_indices = @transform_5, window_bounds = array<i64: 1, 128>}, {pipeline_mode = #tpu.pipeline_mode<synchronous>, transform_indices = @transform_6, window_bounds = array<i64: 128, 128>}, {pipeline_mode = #tpu.pipeline_mode<synchronous>, transform_indices = @transform_7, window_bounds = array<i64: 1, 128>}, {pipeline_mode = #tpu.pipeline_mode<synchronous>, transform_indices = @transform_8, window_bounds = array<i64: 128, 128>}, {pipeline_mode = #tpu.pipeline_mode<synchronous>, transform_indices = @transform_9, window_bounds = array<i64: 1, 128>}, {pipeline_mode = #tpu.pipeline_mode<synchronous>, transform_indices = @transform_10, window_bounds = array<i64: 2, 128>}, {pipeline_mode = #tpu.pipeline_mode<synchronous>, transform_indices = @transform_11, window_bounds = array<i64: 1, 128>}, {pipeline_mode = #tpu.pipeline_mode<synchronous>, transform_indices = @transform_12, window_bounds = array<i64: 128, 128>}, {pipeline_mode = #tpu.pipeline_mode<synchronous>, transform_indices = @transform_13, window_bounds = array<i64: 1, 128>}, {pipeline_mode = #tpu.pipeline_mode<synchronous>, transform_indices = @transform_14, window_bounds = array<i64: 128, 128>}, {pipeline_mode = #tpu.pipeline_mode<synchronous>, transform_indices = @transform_15, window_bounds = array<i64: 1, 128>}, {pipeline_mode = #tpu.pipeline_mode<synchronous>, transform_indices = @transform_16, window_bounds = array<i64: 128, 256>}, {pipeline_mode = #tpu.pipeline_mode<synchronous>, transform_indices = @transform_17, window_bounds = array<i64: 1, 256>}, {transform_indices = @transform_18, window_bounds = array<i64: 64, 256>}, {transform_indices = @transform_19, window_bounds = array<i64: 64, 128>}]} {
    %c0 = arith.constant 0 : index
    %c0_0 = arith.constant 0 : index
    %0 = vector.load %arg1[%c0, %c0_0] : memref<64x256xf32, #tpu.memory_space<vmem>>, vector<64x256xf32>
    %c0_1 = arith.constant 0 : index
    %c0_2 = arith.constant 0 : index
    %1 = vector.load %arg3[%c0_1, %c0_2] : memref<256x128xf32, #tpu.memory_space<vmem>>, vector<256x128xf32>
    %cst = arith.constant dense<0.000000e+00> : vector<64x128xf32>
    %2 = tpu.matmul %0, %1, %cst {dimension_numbers = #tpu.dot_dimension_numbers<[1], [0], [0], [1], [0, 0, 1, 1], [], []>} : vector<64x256xf32>, vector<256x128xf32>, vector<64x128xf32> -> vector<64x128xf32>
    %c0_3 = arith.constant 0 : index
    %c0_4 = arith.constant 0 : index
    %3 = vector.load %arg4[%c0_3, %c0_4] : memref<1x128xf32, #tpu.memory_space<vmem>>, vector<1x128xf32>
    %4 = vector.broadcast %3 : vector<1x128xf32> to vector<64x128xf32>
    %5 = arith.addf %2, %4 : vector<64x128xf32>
    %cst_5 = arith.constant 0.000000e+00 : f32
    %6 = vector.broadcast %cst_5 : f32 to vector<64x128xf32>
    %7 = arith.maximumf %5, %6 : vector<64x128xf32>
    %c0_6 = arith.constant 0 : index
    %c0_7 = arith.constant 0 : index
    %8 = vector.load %arg5[%c0_6, %c0_7] : memref<128x128xf32, #tpu.memory_space<vmem>>, vector<128x128xf32>
    %cst_8 = arith.constant dense<0.000000e+00> : vector<64x128xf32>
    %9 = tpu.matmul %7, %8, %cst_8 {dimension_numbers = #tpu.dot_dimension_numbers<[1], [0], [0], [1], [0, 0, 1, 1], [], []>} : vector<64x128xf32>, vector<128x128xf32>, vector<64x128xf32> -> vector<64x128xf32>
    %c0_9 = arith.constant 0 : index
    %c0_10 = arith.constant 0 : index
    %10 = vector.load %arg6[%c0_9, %c0_10] : memref<1x128xf32, #tpu.memory_space<vmem>>, vector<1x128xf32>
    %11 = vector.broadcast %10 : vector<1x128xf32> to vector<64x128xf32>
    %12 = arith.addf %9, %11 : vector<64x128xf32>
    %cst_11 = arith.constant 0.000000e+00 : f32
    %13 = vector.broadcast %cst_11 : f32 to vector<64x128xf32>
    %14 = arith.maximumf %12, %13 : vector<64x128xf32>
    %c0_12 = arith.constant 0 : index
    %c0_13 = arith.constant 0 : index
    %15 = vector.load %arg7[%c0_12, %c0_13] : memref<128x128xf32, #tpu.memory_space<vmem>>, vector<128x128xf32>
    %cst_14 = arith.constant dense<0.000000e+00> : vector<64x128xf32>
    %16 = tpu.matmul %14, %15, %cst_14 {dimension_numbers = #tpu.dot_dimension_numbers<[1], [0], [0], [1], [0, 0, 1, 1], [], []>} : vector<64x128xf32>, vector<128x128xf32>, vector<64x128xf32> -> vector<64x128xf32>
    %c0_15 = arith.constant 0 : index
    %c0_16 = arith.constant 0 : index
    %17 = vector.load %arg8[%c0_15, %c0_16] : memref<1x128xf32, #tpu.memory_space<vmem>>, vector<1x128xf32>
    %18 = vector.broadcast %17 : vector<1x128xf32> to vector<64x128xf32>
    %19 = arith.addf %16, %18 : vector<64x128xf32>
    %cst_17 = arith.constant 0.000000e+00 : f32
    %20 = vector.broadcast %cst_17 : f32 to vector<64x128xf32>
    %21 = arith.maximumf %19, %20 : vector<64x128xf32>
    %c0_18 = arith.constant 0 : index
    %c0_19 = arith.constant 0 : index
    %22 = vector.load %arg9[%c0_18, %c0_19] : memref<128x128xf32, #tpu.memory_space<vmem>>, vector<128x128xf32>
    %cst_20 = arith.constant dense<0.000000e+00> : vector<64x128xf32>
    %23 = tpu.matmul %21, %22, %cst_20 {dimension_numbers = #tpu.dot_dimension_numbers<[1], [0], [0], [1], [0, 0, 1, 1], [], []>} : vector<64x128xf32>, vector<128x128xf32>, vector<64x128xf32> -> vector<64x128xf32>
    %c0_21 = arith.constant 0 : index
    %c0_22 = arith.constant 0 : index
    %24 = vector.load %arg10[%c0_21, %c0_22] : memref<1x128xf32, #tpu.memory_space<vmem>>, vector<1x128xf32>
    %25 = vector.broadcast %24 : vector<1x128xf32> to vector<64x128xf32>
    %26 = arith.addf %23, %25 : vector<64x128xf32>
    %c0_23 = arith.constant 0 : index
    %c0_24 = arith.constant 0 : index
    %27 = vector.load %arg20[%c0_23, %c0_24] : memref<64x128xf32, #tpu.memory_space<vmem>>, vector<64x128xf32>
    tpu.vector_store %arg20[%c0_23, %c0_24], %26 {strides = array<i32>} : memref<64x128xf32, #tpu.memory_space<vmem>>, vector<64x128xf32>,
    %28 = vector.extract_strided_slice %26 {offsets = [0, 0], sizes = [64, 2], strides = [1, 1]} : vector<64x128xf32> to vector<64x2xf32>
    %29 = vector.extract_strided_slice %26 {offsets = [0, 2], sizes = [64, 2], strides = [1, 1]} : vector<64x128xf32> to vector<64x2xf32>
    %c0_25 = arith.constant 0 : index
    %c0_26 = arith.constant 0 : index
    %30 = vector.load %arg2[%c0_25, %c0_26] : memref<64x2xf32, #tpu.memory_space<vmem>>, vector<64x2xf32>
    %31 = arith.mulf %29, %30 : vector<64x2xf32>
    %32 = arith.addf %28, %31 : vector<64x2xf32>
    %c0_27 = arith.constant 0 : index
    %c0_28 = arith.constant 0 : index
    %33 = vector.load %arg12[%c0_27, %c0_28] : memref<1x128xf32, #tpu.memory_space<vmem>>, vector<1x128xf32>
    %34 = vector.extract_strided_slice %32 {offsets = [0, 0], sizes = [64, 1], strides = [1, 1]} : vector<64x2xf32> to vector<64x1xf32>
    %c0_29 = arith.constant 0 : index
    %c0_30 = arith.constant 0 : index
    %35 = vector.load %arg11[%c0_29, %c0_30] : memref<2x128xf32, #tpu.memory_space<vmem>>, vector<1x128xf32>
    %36 = vector.broadcast %34 : vector<64x1xf32> to vector<64x128xf32>
    %37 = vector.broadcast %35 : vector<1x128xf32> to vector<64x128xf32>
    %38 = arith.mulf %36, %37 : vector<64x128xf32>
    %39 = vector.broadcast %33 : vector<1x128xf32> to vector<64x128xf32>
    %40 = arith.addf %39, %38 : vector<64x128xf32>
    %41 = vector.extract_strided_slice %32 {offsets = [0, 1], sizes = [64, 1], strides = [1, 1]} : vector<64x2xf32> to vector<64x1xf32>
    %c1 = arith.constant 1 : index
    %c0_31 = arith.constant 0 : index
    %42 = vector.load %arg11[%c1, %c0_31] : memref<2x128xf32, #tpu.memory_space<vmem>>, vector<1x128xf32>
    %43 = vector.broadcast %41 : vector<64x1xf32> to vector<64x128xf32>
    %44 = vector.broadcast %42 : vector<1x128xf32> to vector<64x128xf32>
    %45 = arith.mulf %43, %44 : vector<64x128xf32>
    %46 = arith.addf %40, %45 : vector<64x128xf32>
    %cst_32 = arith.constant 0.000000e+00 : f32
    %47 = vector.broadcast %cst_32 : f32 to vector<64x128xf32>
    %48 = arith.maximumf %46, %47 : vector<64x128xf32>
    %c0_33 = arith.constant 0 : index
    %c0_34 = arith.constant 0 : index
    %49 = vector.load %arg13[%c0_33, %c0_34] : memref<128x128xf32, #tpu.memory_space<vmem>>, vector<128x128xf32>
    %cst_35 = arith.constant dense<0.000000e+00> : vector<64x128xf32>
    %50 = tpu.matmul %48, %49, %cst_35 {dimension_numbers = #tpu.dot_dimension_numbers<[1], [0], [0], [1], [0, 0, 1, 1], [], []>} : vector<64x128xf32>, vector<128x128xf32>, vector<64x128xf32> -> vector<64x128xf32>
    %c0_36 = arith.constant 0 : index
    %c0_37 = arith.constant 0 : index
    %51 = vector.load %arg14[%c0_36, %c0_37] : memref<1x128xf32, #tpu.memory_space<vmem>>, vector<1x128xf32>
    %52 = vector.broadcast %51 : vector<1x128xf32> to vector<64x128xf32>
    %53 = arith.addf %50, %52 : vector<64x128xf32>
    %cst_38 = arith.constant 0.000000e+00 : f32
    %54 = vector.broadcast %cst_38 : f32 to vector<64x128xf32>
    %55 = arith.maximumf %53, %54 : vector<64x128xf32>
    %c0_39 = arith.constant 0 : index
    %c0_40 = arith.constant 0 : index
    %56 = vector.load %arg15[%c0_39, %c0_40] : memref<128x128xf32, #tpu.memory_space<vmem>>, vector<128x128xf32>
    %cst_41 = arith.constant dense<0.000000e+00> : vector<64x128xf32>
    %57 = tpu.matmul %55, %56, %cst_41 {dimension_numbers = #tpu.dot_dimension_numbers<[1], [0], [0], [1], [0, 0, 1, 1], [], []>} : vector<64x128xf32>, vector<128x128xf32>, vector<64x128xf32> -> vector<64x128xf32>
    %c0_42 = arith.constant 0 : index
    %c0_43 = arith.constant 0 : index
    %58 = vector.load %arg16[%c0_42, %c0_43] : memref<1x128xf32, #tpu.memory_space<vmem>>, vector<1x128xf32>
    %59 = vector.broadcast %58 : vector<1x128xf32> to vector<64x128xf32>
    %60 = arith.addf %57, %59 : vector<64x128xf32>
    %cst_44 = arith.constant 0.000000e+00 : f32
    %61 = vector.broadcast %cst_44 : f32 to vector<64x128xf32>
    %62 = arith.maximumf %60, %61 : vector<64x128xf32>
    %c0_45 = arith.constant 0 : index
    %c0_46 = arith.constant 0 : index
    %63 = vector.load %arg17[%c0_45, %c0_46] : memref<128x256xf32, #tpu.memory_space<vmem>>, vector<128x256xf32>
    %cst_47 = arith.constant dense<0.000000e+00> : vector<64x256xf32>
    %64 = tpu.matmul %62, %63, %cst_47 {dimension_numbers = #tpu.dot_dimension_numbers<[1], [0], [0], [1], [0, 0, 1, 1], [], []>} : vector<64x128xf32>, vector<128x256xf32>, vector<64x256xf32> -> vector<64x256xf32>
    %c0_48 = arith.constant 0 : index
    %c0_49 = arith.constant 0 : index
    %65 = vector.load %arg18[%c0_48, %c0_49] : memref<1x256xf32, #tpu.memory_space<vmem>>, vector<1x256xf32>
    %66 = vector.broadcast %65 : vector<1x256xf32> to vector<64x256xf32>
    %67 = arith.addf %64, %66 : vector<64x256xf32>
    %c0_50 = arith.constant 0 : index
    %c0_51 = arith.constant 0 : index
    %68 = vector.load %arg19[%c0_50, %c0_51] : memref<64x256xf32, #tpu.memory_space<vmem>>, vector<64x256xf32>
    tpu.vector_store %arg19[%c0_50, %c0_51], %67 {strides = array<i32>} : memref<64x256xf32, #tpu.memory_space<vmem>>, vector<64x256xf32>,
    return
  }
  func.func @transform_0(%arg0: i32) -> (i32, i32) {
    %c0_i32 = arith.constant 0 : i32
    %c0_i32_0 = arith.constant 0 : i32
    return %arg0, %c0_i32 : i32, i32
  }
  func.func @transform_1(%arg0: i32) -> (i32, i32) {
    %c0_i32 = arith.constant 0 : i32
    %c0_i32_0 = arith.constant 0 : i32
    return %arg0, %c0_i32 : i32, i32
  }
  func.func @transform_2(%arg0: i32) -> (i32, i32) {
    %c0_i32 = arith.constant 0 : i32
    %c0_i32_0 = arith.constant 0 : i32
    %c0_i32_1 = arith.constant 0 : i32
    return %c0_i32, %c0_i32_0 : i32, i32
  }
  func.func @transform_3(%arg0: i32) -> (i32, i32) {
    %c0_i32 = arith.constant 0 : i32
    %c0_i32_0 = arith.constant 0 : i32
    %c0_i32_1 = arith.constant 0 : i32
    return %c0_i32, %c0_i32_0 : i32, i32
  }
  func.func @transform_4(%arg0: i32) -> (i32, i32) {
    %c0_i32 = arith.constant 0 : i32
    %c0_i32_0 = arith.constant 0 : i32
    %c0_i32_1 = arith.constant 0 : i32
    return %c0_i32, %c0_i32_0 : i32, i32
  }
  func.func @transform_5(%arg0: i32) -> (i32, i32) {
    %c0_i32 = arith.constant 0 : i32
    %c0_i32_0 = arith.constant 0 : i32
    %c0_i32_1 = arith.constant 0 : i32
    return %c0_i32, %c0_i32_0 : i32, i32
  }
  func.func @transform_6(%arg0: i32) -> (i32, i32) {
    %c0_i32 = arith.constant 0 : i32
    %c0_i32_0 = arith.constant 0 : i32
    %c0_i32_1 = arith.constant 0 : i32
    return %c0_i32, %c0_i32_0 : i32, i32
  }
  func.func @transform_7(%arg0: i32) -> (i32, i32) {
    %c0_i32 = arith.constant 0 : i32
    %c0_i32_0 = arith.constant 0 : i32
    %c0_i32_1 = arith.constant 0 : i32
    return %c0_i32, %c0_i32_0 : i32, i32
  }
  func.func @transform_8(%arg0: i32) -> (i32, i32) {
    %c0_i32 = arith.constant 0 : i32
    %c0_i32_0 = arith.constant 0 : i32
    %c0_i32_1 = arith.constant 0 : i32
    return %c0_i32, %c0_i32_0 : i32, i32
  }
  func.func @transform_9(%arg0: i32) -> (i32, i32) {
    %c0_i32 = arith.constant 0 : i32
    %c0_i32_0 = arith.constant 0 : i32
    %c0_i32_1 = arith.constant 0 : i32
    return %c0_i32, %c0_i32_0 : i32, i32
  }
  func.func @transform_10(%arg0: i32) -> (i32, i32) {
    %c0_i32 = arith.constant 0 : i32
    %c0_i32_0 = arith.constant 0 : i32
    %c0_i32_1 = arith.constant 0 : i32
    return %c0_i32, %c0_i32_0 : i32, i32
  }
  func.func @transform_11(%arg0: i32) -> (i32, i32) {
    %c0_i32 = arith.constant 0 : i32
    %c0_i32_0 = arith.constant 0 : i32
    %c0_i32_1 = arith.constant 0 : i32
    return %c0_i32, %c0_i32_0 : i32, i32
  }
  func.func @transform_12(%arg0: i32) -> (i32, i32) {
    %c0_i32 = arith.constant 0 : i32
    %c0_i32_0 = arith.constant 0 : i32
    %c0_i32_1 = arith.constant 0 : i32
    return %c0_i32, %c0_i32_0 : i32, i32
  }
  func.func @transform_13(%arg0: i32) -> (i32, i32) {
    %c0_i32 = arith.constant 0 : i32
    %c0_i32_0 = arith.constant 0 : i32
    %c0_i32_1 = arith.constant 0 : i32
    return %c0_i32, %c0_i32_0 : i32, i32
  }
  func.func @transform_14(%arg0: i32) -> (i32, i32) {
    %c0_i32 = arith.constant 0 : i32
    %c0_i32_0 = arith.constant 0 : i32
    %c0_i32_1 = arith.constant 0 : i32
    return %c0_i32, %c0_i32_0 : i32, i32
  }
  func.func @transform_15(%arg0: i32) -> (i32, i32) {
    %c0_i32 = arith.constant 0 : i32
    %c0_i32_0 = arith.constant 0 : i32
    %c0_i32_1 = arith.constant 0 : i32
    return %c0_i32, %c0_i32_0 : i32, i32
  }
  func.func @transform_16(%arg0: i32) -> (i32, i32) {
    %c0_i32 = arith.constant 0 : i32
    %c0_i32_0 = arith.constant 0 : i32
    %c0_i32_1 = arith.constant 0 : i32
    return %c0_i32, %c0_i32_0 : i32, i32
  }
  func.func @transform_17(%arg0: i32) -> (i32, i32) {
    %c0_i32 = arith.constant 0 : i32
    %c0_i32_0 = arith.constant 0 : i32
    %c0_i32_1 = arith.constant 0 : i32
    return %c0_i32, %c0_i32_0 : i32, i32
  }
  func.func @transform_18(%arg0: i32) -> (i32, i32) {
    %c0_i32 = arith.constant 0 : i32
    %c0_i32_0 = arith.constant 0 : i32
    return %arg0, %c0_i32 : i32, i32
  }
  func.func @transform_19(%arg0: i32) -> (i32, i32) {
    %c0_i32 = arith.constant 0 : i32
    %c0_i32_0 = arith.constant 0 : i32
    return %arg0, %c0_i32 : i32, i32
  }
}

module attributes {stable_mosaic.version = 11 : i64} {
  func.func @vae_kernel(%arg0: i32, %arg1: memref<64x256xf32, #tpu.memory_space<vmem>>, %arg2: memref<64x2xf32, #tpu.memory_space<vmem>>, %arg3: memref<256x128xf32, #tpu.memory_space<vmem>>, %arg4: memref<1x128xf32, #tpu.memory_space<vmem>>, %arg5: memref<128x128xf32, #tpu.memory_space<vmem>>, %arg6: memref<1x128xf32, #tpu.memory_space<vmem>>, %arg7: memref<128x128xf32, #tpu.memory_space<vmem>>, %arg8: memref<1x128xf32, #tpu.memory_space<vmem>>, %arg9: memref<128x128xf32, #tpu.memory_space<vmem>>, %arg10: memref<1x128xf32, #tpu.memory_space<vmem>>, %arg11: memref<2x128xf32, #tpu.memory_space<vmem>>, %arg12: memref<1x128xf32, #tpu.memory_space<vmem>>, %arg13: memref<128x128xf32, #tpu.memory_space<vmem>>, %arg14: memref<1x128xf32, #tpu.memory_space<vmem>>, %arg15: memref<128x128xf32, #tpu.memory_space<vmem>>, %arg16: memref<1x128xf32, #tpu.memory_space<vmem>>, %arg17: memref<128x256xf32, #tpu.memory_space<vmem>>, %arg18: memref<1x256xf32, #tpu.memory_space<vmem>>, %arg19: memref<64x256xf32, #tpu.memory_space<vmem>>, %arg20: memref<64x128xf32, #tpu.memory_space<vmem>>) attributes {dimension_semantics = [#tpu.dimension_semantics<parallel>], iteration_bounds = array<i64: 1>, scalar_prefetch = 0 : i64, scratch_operands = 0 : i64, tpu.core_type = #tpu.core_type<tc>, window_params = [{transform_indices = @transform_0, window_bounds = array<i64: 64, 256>}, {transform_indices = @transform_1, window_bounds = array<i64: 64, 2>}, {pipeline_mode = #tpu.pipeline_mode<synchronous>, transform_indices = @transform_2, window_bounds = array<i64: 256, 128>}, {pipeline_mode = #tpu.pipeline_mode<synchronous>, transform_indices = @transform_3, window_bounds = array<i64: 1, 128>}, {pipeline_mode = #tpu.pipeline_mode<synchronous>, transform_indices = @transform_4, window_bounds = array<i64: 128, 128>}, {pipeline_mode = #tpu.pipeline_mode<synchronous>, transform_indices = @transform_5, window_bounds = array<i64: 1, 128>}, {pipeline_mode = #tpu.pipeline_mode<synchronous>, transform_indices = @transform_6, window_bounds = array<i64: 128, 128>}, {pipeline_mode = #tpu.pipeline_mode<synchronous>, transform_indices = @transform_7, window_bounds = array<i64: 1, 128>}, {pipeline_mode = #tpu.pipeline_mode<synchronous>, transform_indices = @transform_8, window_bounds = array<i64: 128, 128>}, {pipeline_mode = #tpu.pipeline_mode<synchronous>, transform_indices = @transform_9, window_bounds = array<i64: 1, 128>}, {pipeline_mode = #tpu.pipeline_mode<synchronous>, transform_indices = @transform_10, window_bounds = array<i64: 2, 128>}, {pipeline_mode = #tpu.pipeline_mode<synchronous>, transform_indices = @transform_11, window_bounds = array<i64: 1, 128>}, {pipeline_mode = #tpu.pipeline_mode<synchronous>, transform_indices = @transform_12, window_bounds = array<i64: 128, 128>}, {pipeline_mode = #tpu.pipeline_mode<synchronous>, transform_indices = @transform_13, window_bounds = array<i64: 1, 128>}, {pipeline_mode = #tpu.pipeline_mode<synchronous>, transform_indices = @transform_14, window_bounds = array<i64: 128, 128>}, {pipeline_mode = #tpu.pipeline_mode<synchronous>, transform_indices = @transform_15, window_bounds = array<i64: 1, 128>}, {pipeline_mode = #tpu.pipeline_mode<synchronous>, transform_indices = @transform_16, window_bounds = array<i64: 128, 256>}, {pipeline_mode = #tpu.pipeline_mode<synchronous>, transform_indices = @transform_17, window_bounds = array<i64: 1, 256>}, {transform_indices = @transform_18, window_bounds = array<i64: 64, 256>}, {transform_indices = @transform_19, window_bounds = array<i64: 64, 128>}]} {
    %c0 = arith.constant 0 : index
    %c0_0 = arith.constant 0 : index
    %0 = vector.load %arg1[%c0, %c0_0] : memref<64x256xf32, #tpu.memory_space<vmem>>, vector<64x256xf32>
    %c0_1 = arith.constant 0 : index
    %c0_2 = arith.constant 0 : index
    %1 = vector.load %arg3[%c0_1, %c0_2] : memref<256x128xf32, #tpu.memory_space<vmem>>, vector<256x128xf32>
    %cst = arith.constant dense<0.000000e+00> : vector<64x128xf32>
    %2 = tpu.matmul %0, %1, %cst {dimension_numbers = #tpu.dot_dimension_numbers<[1], [0], [0], [1], [0, 0, 1, 1], [], []>} : vector<64x256xf32>, vector<256x128xf32>, vector<64x128xf32> -> vector<64x128xf32>
    %c0_3 = arith.constant 0 : index
    %c0_4 = arith.constant 0 : index
    %3 = vector.load %arg4[%c0_3, %c0_4] : memref<1x128xf32, #tpu.memory_space<vmem>>, vector<1x128xf32>
    %4 = vector.broadcast %3 : vector<1x128xf32> to vector<64x128xf32>
    %5 = arith.addf %2, %4 : vector<64x128xf32>
    %cst_5 = arith.constant 0.000000e+00 : f32
    %6 = vector.broadcast %cst_5 : f32 to vector<64x128xf32>
    %7 = arith.maximumf %5, %6 : vector<64x128xf32>
    %c0_6 = arith.constant 0 : index
    %c0_7 = arith.constant 0 : index
    %8 = vector.load %arg5[%c0_6, %c0_7] : memref<128x128xf32, #tpu.memory_space<vmem>>, vector<128x128xf32>
    %cst_8 = arith.constant dense<0.000000e+00> : vector<64x128xf32>
    %9 = tpu.matmul %7, %8, %cst_8 {dimension_numbers = #tpu.dot_dimension_numbers<[1], [0], [0], [1], [0, 0, 1, 1], [], []>} : vector<64x128xf32>, vector<128x128xf32>, vector<64x128xf32> -> vector<64x128xf32>
    %c0_9 = arith.constant 0 : index
    %c0_10 = arith.constant 0 : index
    %10 = vector.load %arg6[%c0_9, %c0_10] : memref<1x128xf32, #tpu.memory_space<vmem>>, vector<1x128xf32>
    %11 = vector.broadcast %10 : vector<1x128xf32> to vector<64x128xf32>
    %12 = arith.addf %9, %11 : vector<64x128xf32>
    %cst_11 = arith.constant 0.000000e+00 : f32
    %13 = vector.broadcast %cst_11 : f32 to vector<64x128xf32>
    %14 = arith.maximumf %12, %13 : vector<64x128xf32>
    %c0_12 = arith.constant 0 : index
    %c0_13 = arith.constant 0 : index
    %15 = vector.load %arg7[%c0_12, %c0_13] : memref<128x128xf32, #tpu.memory_space<vmem>>, vector<128x128xf32>
    %cst_14 = arith.constant dense<0.000000e+00> : vector<64x128xf32>
    %16 = tpu.matmul %14, %15, %cst_14 {dimension_numbers = #tpu.dot_dimension_numbers<[1], [0], [0], [1], [0, 0, 1, 1], [], []>} : vector<64x128xf32>, vector<128x128xf32>, vector<64x128xf32> -> vector<64x128xf32>
    %c0_15 = arith.constant 0 : index
    %c0_16 = arith.constant 0 : index
    %17 = vector.load %arg8[%c0_15, %c0_16] : memref<1x128xf32, #tpu.memory_space<vmem>>, vector<1x128xf32>
    %18 = vector.broadcast %17 : vector<1x128xf32> to vector<64x128xf32>
    %19 = arith.addf %16, %18 : vector<64x128xf32>
    %cst_17 = arith.constant 0.000000e+00 : f32
    %20 = vector.broadcast %cst_17 : f32 to vector<64x128xf32>
    %21 = arith.maximumf %19, %20 : vector<64x128xf32>
    %c0_18 = arith.constant 0 : index
    %c0_19 = arith.constant 0 : index
    %22 = vector.load %arg9[%c0_18, %c0_19] : memref<128x128xf32, #tpu.memory_space<vmem>>, vector<128x128xf32>
    %cst_20 = arith.constant dense<0.000000e+00> : vector<64x128xf32>
    %23 = tpu.matmul %21, %22, %cst_20 {dimension_numbers = #tpu.dot_dimension_numbers<[1], [0], [0], [1], [0, 0, 1, 1], [], []>} : vector<64x128xf32>, vector<128x128xf32>, vector<64x128xf32> -> vector<64x128xf32>
    %c0_21 = arith.constant 0 : index
    %c0_22 = arith.constant 0 : index
    %24 = vector.load %arg10[%c0_21, %c0_22] : memref<1x128xf32, #tpu.memory_space<vmem>>, vector<1x128xf32>
    %25 = vector.broadcast %24 : vector<1x128xf32> to vector<64x128xf32>
    %26 = arith.addf %23, %25 : vector<64x128xf32>
    %c0_23 = arith.constant 0 : index
    %c0_24 = arith.constant 0 : index
    %27 = vector.load %arg20[%c0_23, %c0_24] : memref<64x128xf32, #tpu.memory_space<vmem>>, vector<64x128xf32>
    tpu.vector_store %arg20[%c0_23, %c0_24], %26 {strides = array<i32>} : memref<64x128xf32, #tpu.memory_space<vmem>>, vector<64x128xf32>,
    %28 = vector.extract_strided_slice %26 {offsets = [0, 0], sizes = [64, 2], strides = [1, 1]} : vector<64x128xf32> to vector<64x2xf32>
    %29 = vector.extract_strided_slice %26 {offsets = [0, 2], sizes = [64, 2], strides = [1, 1]} : vector<64x128xf32> to vector<64x2xf32>
    %c0_25 = arith.constant 0 : index
    %c0_26 = arith.constant 0 : index
    %30 = vector.load %arg2[%c0_25, %c0_26] : memref<64x2xf32, #tpu.memory_space<vmem>>, vector<64x2xf32>
    %31 = arith.mulf %29, %30 : vector<64x2xf32>
    %32 = arith.addf %28, %31 : vector<64x2xf32>
    %c0_27 = arith.constant 0 : index
    %c0_28 = arith.constant 0 : index
    %33 = vector.load %arg12[%c0_27, %c0_28] : memref<1x128xf32, #tpu.memory_space<vmem>>, vector<1x128xf32>
    %34 = vector.extract_strided_slice %32 {offsets = [0, 0], sizes = [64, 1], strides = [1, 1]} : vector<64x2xf32> to vector<64x1xf32>
    %c0_29 = arith.constant 0 : index
    %c0_30 = arith.constant 0 : index
    %35 = vector.load %arg11[%c0_29, %c0_30] : memref<2x128xf32, #tpu.memory_space<vmem>>, vector<1x128xf32>
    %36 = vector.broadcast %34 : vector<64x1xf32> to vector<64x128xf32>
    %37 = vector.broadcast %35 : vector<1x128xf32> to vector<64x128xf32>
    %38 = arith.mulf %36, %37 : vector<64x128xf32>
    %39 = vector.broadcast %33 : vector<1x128xf32> to vector<64x128xf32>
    %40 = arith.addf %39, %38 : vector<64x128xf32>
    %41 = vector.extract_strided_slice %32 {offsets = [0, 1], sizes = [64, 1], strides = [1, 1]} : vector<64x2xf32> to vector<64x1xf32>
    %c1 = arith.constant 1 : index
    %c0_31 = arith.constant 0 : index
    %42 = vector.load %arg11[%c1, %c0_31] : memref<2x128xf32, #tpu.memory_space<vmem>>, vector<1x128xf32>
    %43 = vector.broadcast %41 : vector<64x1xf32> to vector<64x128xf32>
    %44 = vector.broadcast %42 : vector<1x128xf32> to vector<64x128xf32>
    %45 = arith.mulf %43, %44 : vector<64x128xf32>
    %46 = arith.addf %40, %45 : vector<64x128xf32>
    %cst_32 = arith.constant 0.000000e+00 : f32
    %47 = vector.broadcast %cst_32 : f32 to vector<64x128xf32>
    %48 = arith.maximumf %46, %47 : vector<64x128xf32>
    %c0_33 = arith.constant 0 : index
    %c0_34 = arith.constant 0 : index
    %49 = vector.load %arg13[%c0_33, %c0_34] : memref<128x128xf32, #tpu.memory_space<vmem>>, vector<128x128xf32>
    %cst_35 = arith.constant dense<0.000000e+00> : vector<64x128xf32>
    %50 = tpu.matmul %48, %49, %cst_35 {dimension_numbers = #tpu.dot_dimension_numbers<[1], [0], [0], [1], [0, 0, 1, 1], [], []>} : vector<64x128xf32>, vector<128x128xf32>, vector<64x128xf32> -> vector<64x128xf32>
    %c0_36 = arith.constant 0 : index
    %c0_37 = arith.constant 0 : index
    %51 = vector.load %arg14[%c0_36, %c0_37] : memref<1x128xf32, #tpu.memory_space<vmem>>, vector<1x128xf32>
    %52 = vector.broadcast %51 : vector<1x128xf32> to vector<64x128xf32>
    %53 = arith.addf %50, %52 : vector<64x128xf32>
    %cst_38 = arith.constant 0.000000e+00 : f32
    %54 = vector.broadcast %cst_38 : f32 to vector<64x128xf32>
    %55 = arith.maximumf %53, %54 : vector<64x128xf32>
    %c0_39 = arith.constant 0 : index
    %c0_40 = arith.constant 0 : index
    %56 = vector.load %arg15[%c0_39, %c0_40] : memref<128x128xf32, #tpu.memory_space<vmem>>, vector<128x128xf32>
    %cst_41 = arith.constant dense<0.000000e+00> : vector<64x128xf32>
    %57 = tpu.matmul %55, %56, %cst_41 {dimension_numbers = #tpu.dot_dimension_numbers<[1], [0], [0], [1], [0, 0, 1, 1], [], []>} : vector<64x128xf32>, vector<128x128xf32>, vector<64x128xf32> -> vector<64x128xf32>
    %c0_42 = arith.constant 0 : index
    %c0_43 = arith.constant 0 : index
    %58 = vector.load %arg16[%c0_42, %c0_43] : memref<1x128xf32, #tpu.memory_space<vmem>>, vector<1x128xf32>
    %59 = vector.broadcast %58 : vector<1x128xf32> to vector<64x128xf32>
    %60 = arith.addf %57, %59 : vector<64x128xf32>
    %cst_44 = arith.constant 0.000000e+00 : f32
    %61 = vector.broadcast %cst_44 : f32 to vector<64x128xf32>
    %62 = arith.maximumf %60, %61 : vector<64x128xf32>
    %c0_45 = arith.constant 0 : index
    %c0_46 = arith.constant 0 : index
    %63 = vector.load %arg17[%c0_45, %c0_46] : memref<128x256xf32, #tpu.memory_space<vmem>>, vector<128x256xf32>
    %cst_47 = arith.constant dense<0.000000e+00> : vector<64x256xf32>
    %64 = tpu.matmul %62, %63, %cst_47 {dimension_numbers = #tpu.dot_dimension_numbers<[1], [0], [0], [1], [0, 0, 1, 1], [], []>} : vector<64x128xf32>, vector<128x256xf32>, vector<64x256xf32> -> vector<64x256xf32>
    %c0_48 = arith.constant 0 : index
    %c0_49 = arith.constant 0 : index
    %65 = vector.load %arg18[%c0_48, %c0_49] : memref<1x256xf32, #tpu.memory_space<vmem>>, vector<1x256xf32>
    %66 = vector.broadcast %65 : vector<1x256xf32> to vector<64x256xf32>
    %67 = arith.addf %64, %66 : vector<64x256xf32>
    %c0_50 = arith.constant 0 : index
    %c0_51 = arith.constant 0 : index
    %68 = vector.load %arg19[%c0_50, %c0_51] : memref<64x256xf32, #tpu.memory_space<vmem>>, vector<64x256xf32>
    tpu.vector_store %arg19[%c0_50, %c0_51], %67 {strides = array<i32>} : memref<64x256xf32, #tpu.memory_space<vmem>>, vector<64x256xf32>,
    return
  }
  func.func @transform_0(%arg0: i32) -> (i32, i32) {
    %c0_i32 = arith.constant 0 : i32
    %c0_i32_0 = arith.constant 0 : i32
    return %arg0, %c0_i32 : i32, i32
  }
  func.func @transform_1(%arg0: i32) -> (i32, i32) {
    %c0_i32 = arith.constant 0 : i32
    %c0_i32_0 = arith.constant 0 : i32
    return %arg0, %c0_i32 : i32, i32
  }
  func.func @transform_2(%arg0: i32) -> (i32, i32) {
    %c0_i32 = arith.constant 0 : i32
    %c0_i32_0 = arith.constant 0 : i32
    %c0_i32_1 = arith.constant 0 : i32
    return %c0_i32, %c0_i32_0 : i32, i32
  }
  func.func @transform_3(%arg0: i32) -> (i32, i32) {
    %c0_i32 = arith.constant 0 : i32
    %c0_i32_0 = arith.constant 0 : i32
    %c0_i32_1 = arith.constant 0 : i32
    return %c0_i32, %c0_i32_0 : i32, i32
  }
  func.func @transform_4(%arg0: i32) -> (i32, i32) {
    %c0_i32 = arith.constant 0 : i32
    %c0_i32_0 = arith.constant 0 : i32
    %c0_i32_1 = arith.constant 0 : i32
    return %c0_i32, %c0_i32_0 : i32, i32
  }
  func.func @transform_5(%arg0: i32) -> (i32, i32) {
    %c0_i32 = arith.constant 0 : i32
    %c0_i32_0 = arith.constant 0 : i32
    %c0_i32_1 = arith.constant 0 : i32
    return %c0_i32, %c0_i32_0 : i32, i32
  }
  func.func @transform_6(%arg0: i32) -> (i32, i32) {
    %c0_i32 = arith.constant 0 : i32
    %c0_i32_0 = arith.constant 0 : i32
    %c0_i32_1 = arith.constant 0 : i32
    return %c0_i32, %c0_i32_0 : i32, i32
  }
  func.func @transform_7(%arg0: i32) -> (i32, i32) {
    %c0_i32 = arith.constant 0 : i32
    %c0_i32_0 = arith.constant 0 : i32
    %c0_i32_1 = arith.constant 0 : i32
    return %c0_i32, %c0_i32_0 : i32, i32
  }
  func.func @transform_8(%arg0: i32) -> (i32, i32) {
    %c0_i32 = arith.constant 0 : i32
    %c0_i32_0 = arith.constant 0 : i32
    %c0_i32_1 = arith.constant 0 : i32
    return %c0_i32, %c0_i32_0 : i32, i32
  }
  func.func @transform_9(%arg0: i32) -> (i32, i32) {
    %c0_i32 = arith.constant 0 : i32
    %c0_i32_0 = arith.constant 0 : i32
    %c0_i32_1 = arith.constant 0 : i32
    return %c0_i32, %c0_i32_0 : i32, i32
  }
  func.func @transform_10(%arg0: i32) -> (i32, i32) {
    %c0_i32 = arith.constant 0 : i32
    %c0_i32_0 = arith.constant 0 : i32
    %c0_i32_1 = arith.constant 0 : i32
    return %c0_i32, %c0_i32_0 : i32, i32
  }
  func.func @transform_11(%arg0: i32) -> (i32, i32) {
    %c0_i32 = arith.constant 0 : i32
    %c0_i32_0 = arith.constant 0 : i32
    %c0_i32_1 = arith.constant 0 : i32
    return %c0_i32, %c0_i32_0 : i32, i32
  }
  func.func @transform_12(%arg0: i32) -> (i32, i32) {
    %c0_i32 = arith.constant 0 : i32
    %c0_i32_0 = arith.constant 0 : i32
    %c0_i32_1 = arith.constant 0 : i32
    return %c0_i32, %c0_i32_0 : i32, i32
  }
  func.func @transform_13(%arg0: i32) -> (i32, i32) {
    %c0_i32 = arith.constant 0 : i32
    %c0_i32_0 = arith.constant 0 : i32
    %c0_i32_1 = arith.constant 0 : i32
    return %c0_i32, %c0_i32_0 : i32, i32
  }
  func.func @transform_14(%arg0: i32) -> (i32, i32) {
    %c0_i32 = arith.constant 0 : i32
    %c0_i32_0 = arith.constant 0 : i32
    %c0_i32_1 = arith.constant 0 : i32
    return %c0_i32, %c0_i32_0 : i32, i32
  }
  func.func @transform_15(%arg0: i32) -> (i32, i32) {
    %c0_i32 = arith.constant 0 : i32
    %c0_i32_0 = arith.constant 0 : i32
    %c0_i32_1 = arith.constant 0 : i32
    return %c0_i32, %c0_i32_0 : i32, i32
  }
  func.func @transform_16(%arg0: i32) -> (i32, i32) {
    %c0_i32 = arith.constant 0 : i32
    %c0_i32_0 = arith.constant 0 : i32
    %c0_i32_1 = arith.constant 0 : i32
    return %c0_i32, %c0_i32_0 : i32, i32
  }
  func.func @transform_17(%arg0: i32) -> (i32, i32) {
    %c0_i32 = arith.constant 0 : i32
    %c0_i32_0 = arith.constant 0 : i32
    %c0_i32_1 = arith.constant 0 : i32
    return %c0_i32, %c0_i32_0 : i32, i32
  }
  func.func @transform_18(%arg0: i32) -> (i32, i32) {
    %c0_i32 = arith.constant 0 : i32
    %c0_i32_0 = arith.constant 0 : i32
    return %arg0, %c0_i32 : i32, i32
  }
  func.func @transform_19(%arg0: i32) -> (i32, i32) {
    %c0_i32 = arith.constant 0 : i32
    %c0_i32_0 = arith.constant 0 : i32
    return %arg0, %c0_i32 : i32, i32
  }
}

</mosaic_0001>

<bundles_post_ra>
// kernel: tpu_custom_call.1
= control target key start
LH: loop header
LB: loop body
LE: loop exit
PB: predicated region body
PF: predicated region fallthrough
CT: control target
= control target key end

     0   :  { %s2392_s0 = inlined_call_operand.hbm [shape: f32[64,256], index: 0, kind: input, shape index: {}]   ;;  %s2393_s1 = inlined_call_operand.vmem [shape: f32[64,2], index: 1, kind: input, shape index: {}]   ;;  %s2394_s2 = inlined_call_operand.hbm [shape: f32[256,128], index: 2, kind: input, shape index: {}]   ;;  %s2395_s3 = inlined_call_operand.vmem [shape: f32[1,128], index: 3, kind: input, shape index: {}]   ;;  %s2396_s4 = inlined_call_operand.hbm [shape: f32[128,128], index: 4, kind: input, shape index: {}]   ;;  %s2397_s5 = inlined_call_operand.vmem [shape: f32[1,128], index: 5, kind: input, shape index: {}]   ;;  %s2398_s6 = inlined_call_operand.hbm [shape: f32[128,128], index: 6, kind: input, shape index: {}]   ;;  %s2399_s7 = inlined_call_operand.vmem [shape: f32[1,128], index: 7, kind: input, shape index: {}]   ;;  %s2400_s8 = inlined_call_operand.hbm [shape: f32[128,128], index: 8, kind: input, shape index: {}]   ;;  %s2401_s9 = inlined_call_operand.vmem [shape: f32[1,128], index: 9, kind: input, shape index: {}]   ;;  %s2402_s10 = inlined_call_operand.vmem [shape: f32[2,128], index: 10, kind: input, shape index: {}]   ;;  %s2403_s11 = inlined_call_operand.vmem [shape: f32[1,128], index: 11, kind: input, shape index: {}]   ;;  %s2404_s12 = inlined_call_operand.hbm [shape: f32[128,128], index: 12, kind: input, shape index: {}]   ;;  %s2405_s13 = inlined_call_operand.vmem [shape: f32[1,128], index: 13, kind: input, shape index: {}]   ;;  %s2406_s14 = inlined_call_operand.hbm [shape: f32[128,128], index: 14, kind: input, shape index: {}]   ;;  %s2407_s15 = inlined_call_operand.vmem [shape: f32[1,128], index: 15, kind: input, shape index: {}]   ;;  %s2408_s16 = inlined_call_operand.hbm [shape: f32[128,256], index: 16, kind: input, shape index: {}]   ;;  %s2409_s17 = inlined_call_operand.vmem [shape: f32[1,256], index: 17, kind: input, shape index: {}]   ;;  %s2410_s18 = inlined_call_operand.hbm [shape: f32[64,256], index: 18, kind: output, shape index: {0}]   ;;  %s2411_s19 = inlined_call_operand.hbm [shape: f32[64,128], index: 19, kind: output, shape index: {1}]  }
   0x1   :  { %2413 = sst [smem:[#allocation26_spill]] %s2392_s0 }
   0x2   :  { %2414 = sst [smem:[#allocation27_spill]] %s2393_s1 }
   0x3   :  { %2415 = sst [smem:[#allocation28_spill]] %s2394_s2 }
   0x4   :  { %2416 = sst [smem:[#allocation29_spill]] %s2395_s3 }
   0x5   :  { %25 = vsyncpa [#allocation3], 0 }
   0x6   :  { %26 = vsyncpa [#allocation6], 0 }
   0x7   :  { %27 = vsyncpa [#allocation9], 0 }
   0x8   :  { %28 = vsyncpa [#allocation12], 0 }
   0x9   :  { %29 = vsyncpa [#allocation15], 0 }
   0xa   :  { %30 = vsyncpa [#allocation4], 0 }
   0xb   :  { %31 = vsyncpa [#allocation18], 0  ;;  %s2098_s0 = smov [#allocation5]  }
   0xc   :  { %s51_s30 = sshll.u32 %s2098_s0, 4  ;;  %s52_s30 = int_to_ptr.vmem [resolvable:$true] %s51_s30 }
   0xd   :  { %s1892_s20 = scalar_lea.vmem %s52_s30, 4096  ;;  %p1897_p1 = scmp.lt.s32.totalorder %s52_s30, %s52_s30 }
   0xe   :  { %p1893_p0 = scmp.ne.s32.totalorder %s52_s30, %s1892_s20  ;;  %p1898_p2 = scmp.lt.s32.totalorder %s1892_s20, %s1892_s20 }
  0x10   :  { %p1899_p3 = por %p1898_p2, %p1897_p1 }
  0x12   :  { %p1900_p4 = pnand %p1899_p3, %p1893_p0 }
  0x14   :  { %1903 = shalt.err (!%p1900_p4)
}
  0x15   :  { %s2099_s21 = smov 128   ;;  %s2100_s1 = smov 8  }
  0x16   :  { %s2417_s23 = sld [smem:[#allocation28_spill]]  ;;  %s2101_s24 = smov [#allocation8]  }
  0x17   :  { %s79_s25 = sshll.u32 %s2101_s24, 4  ;;  %s2102_s3 = smov [#allocation11]   ;;  %s80_s25 = int_to_ptr.vmem [resolvable:$true] %s79_s25 }
  0x18   :  { %s111_s26 = sshll.u32 %s2102_s3, 4  ;;  %s1912_s27 = scalar_lea.vmem %s80_s25, 2048  ;;  %s112_s26 = int_to_ptr.vmem [resolvable:$true] %s111_s26 }
  0x19   :  { %p1913_p5 = scmp.ne.s32.totalorder %s80_s25, %s1912_s27  ;;  %p1917_p6 = scmp.lt.s32.totalorder %s80_s25, %s80_s25 }
  0x1a   :  { %p1918_p7 = scmp.lt.s32.totalorder %s1912_s27, %s1912_s27 }
  0x1c   :  { %57 = dma.hbm_to_vmem [thread:$0]  %s2417_s23, 4096, %s52_s30, [#allocation6], %s2099_s21, %s2099_s21, %s2100_s1  }
  0x1d   :  { %p1919_p8 = por %p1918_p7, %p1917_p6 }
  0x1f   :  { %p1920_p9 = pnand %p1919_p8, %p1913_p5 }
  0x21   :  { %1923 = shalt.err (!%p1920_p9)
}
  0x22   :  { %85 = dma.hbm_to_vmem [thread:$0]  %s2398_s6, 2048, %s80_s25, [#allocation9], %s2099_s21, %s2099_s21, %s2100_s1  }
  0x23   :  { %s1932_s0 = scalar_lea.vmem %s112_s26, 2048  ;;  %p1937_p11 = scmp.lt.s32.totalorder %s112_s26, %s112_s26 }
  0x24   :  { %p1933_p10 = scmp.ne.s32.totalorder %s112_s26, %s1932_s0  ;;  %p1938_p12 = scmp.lt.s32.totalorder %s1932_s0, %s1932_s0 }
  0x26   :  { %p1939_p13 = por %p1938_p12, %p1937_p11 }
  0x28   :  { %p1940_p0 = pnand %p1939_p13, %p1933_p10 }
  0x2a   :  { %1943 = shalt.err (!%p1940_p0)
}
  0x2b   :  { %117 = dma.hbm_to_vmem [thread:$0]  %s2404_s12, 2048, %s112_s26, [#allocation12], %s2099_s21, %s2099_s21, %s2100_s1  }
  0x2c   :  { %s2103_s22 = smov [#allocation2]  }
  0x2d   :  { %s37_s2 = sshll.u32 %s2103_s22, 4  ;;  %s38_s2 = int_to_ptr.vmem [resolvable:$true] %s37_s2 }
  0x2e   :  { %s1952_s23 = scalar_lea.vmem %s38_s2, 2048  ;;  %p1957_p2 = scmp.lt.s32.totalorder %s38_s2, %s38_s2 }
  0x2f   :  { %p1953_p1 = scmp.ne.s32.totalorder %s38_s2, %s1952_s23  ;;  %p1958_p3 = scmp.lt.s32.totalorder %s1952_s23, %s1952_s23 }
  0x31   :  { %p1959_p4 = por %p1958_p3, %p1957_p2 }
  0x33   :  { %p1960_p5 = pnand %p1959_p4, %p1953_p1 }
  0x35   :  { %1963 = shalt.err (!%p1960_p5)
}
  0x36   :  { %s2104_s6 = smov 256   ;;  %s2105_s24 = smov 16  }
  0x37   :  { %s2418_s27 = sld [smem:[#allocation26_spill]]  ;;  %s2106_s12 = smov [#allocation7]  }
  0x38   :  { %s65_s26 = sshll.u32 %s2106_s12, 4  ;;  %s2107_s28 = smov [#allocation10]   ;;  %s66_s26 = int_to_ptr.vmem [resolvable:$true] %s65_s26 }
  0x39   :  { %s93_s29 = sshll.u32 %s2107_s28, 4  ;;  %s1972_s0 = scalar_lea.vmem %s66_s26, 2048  ;;  %s94_s29 = int_to_ptr.vmem [resolvable:$true] %s93_s29 }
  0x3a   :  { %p1973_p6 = scmp.ne.s32.totalorder %s66_s26, %s1972_s0  ;;  %p1977_p7 = scmp.lt.s32.totalorder %s66_s26, %s66_s26 }
  0x3b   :  { %p1978_p8 = scmp.lt.s32.totalorder %s1972_s0, %s1972_s0 }
  0x3d   :  { %43 = dma.hbm_to_vmem [thread:$0]  %s2418_s27, 2048, %s38_s2, [#allocation3], %s2104_s6, %s2104_s6, %s2105_s24  }
  0x3e   :  { %p1979_p9 = por %p1978_p8, %p1977_p7 }
  0x40   :  { %p1980_p10 = pnand %p1979_p9, %p1973_p6 }
  0x42   :  { %1983 = shalt.err (!%p1980_p10)
}
  0x43   :  { %71 = dma.hbm_to_vmem [thread:$0]  %s2396_s4, 2048, %s66_s26, [#allocation6], %s2099_s21, %s2099_s21, %s2100_s1  }
  0x44   :  { %s1992_s22 = scalar_lea.vmem %s94_s29, 2048  ;;  %p1997_p12 = scmp.lt.s32.totalorder %s94_s29, %s94_s29 }
  0x45   :  { %p1993_p11 = scmp.ne.s32.totalorder %s94_s29, %s1992_s22  ;;  %p1998_p13 = scmp.lt.s32.totalorder %s1992_s22, %s1992_s22 }
  0x47   :  { %p1999_p0 = por %p1998_p13, %p1997_p12 }
  0x49   :  { %p2000_p1 = pnand %p1999_p0, %p1993_p11 }
  0x4b   :  { %2003 = shalt.err (!%p2000_p1)
}
  0x4c   :  { %99 = dma.hbm_to_vmem [thread:$0]  %s2400_s8, 2048, %s94_s29, [#allocation9], %s2099_s21, %s2099_s21, %s2100_s1  }
  0x4d   :  { %s2108_s25 = smov [#allocation13]   ;;  %s2109_s27 = smov [#allocation14]  }
  0x4e   :  { %s125_s3 = sshll.u32 %s2108_s25, 4  ;;  %s139_s12 = sshll.u32 %s2109_s27, 4  ;;  %s126_s3 = int_to_ptr.vmem [resolvable:$true] %s125_s3  ;;  %s140_s12 = int_to_ptr.vmem [resolvable:$true] %s139_s12 }
  0x4f   :  { %s2012_s4 = scalar_lea.vmem %s126_s3, 2048  ;;  %p2017_p3 = scmp.lt.s32.totalorder %s126_s3, %s126_s3 }
  0x50   :  { %p2013_p2 = scmp.ne.s32.totalorder %s126_s3, %s2012_s4  ;;  %p2018_p4 = scmp.lt.s32.totalorder %s2012_s4, %s2012_s4 }
  0x52   :  { %p2019_p5 = por %p2018_p4, %p2017_p3 }
  0x54   :  { %p2020_p6 = pnand %p2019_p5, %p2013_p2 }
  0x56   :  { %2023 = shalt.err (!%p2020_p6)
}
  0x57   :  { %131 = dma.hbm_to_vmem [thread:$0]  %s2406_s14, 2048, %s126_s3, [#allocation12], %s2099_s21, %s2099_s21, %s2100_s1  }
  0x58   :  { %s2032_s8 = scalar_lea.vmem %s140_s12, 4096  ;;  %p2037_p8 = scmp.lt.s32.totalorder %s140_s12, %s140_s12 }
  0x59   :  { %p2033_p7 = scmp.ne.s32.totalorder %s140_s12, %s2032_s8  ;;  %p2038_p9 = scmp.lt.s32.totalorder %s2032_s8, %s2032_s8 }
  0x5b   :  { %p2039_p10 = por %p2038_p9, %p2037_p8 }
  0x5d   :  { %p2040_p11 = pnand %p2039_p10, %p2033_p7 }
  0x5f   :  { %2043 = shalt.err (!%p2040_p11)
}
  0x60   :  { %145 = dma.hbm_to_vmem [thread:$0]  %s2408_s16, 4096, %s140_s12, [#allocation15], %s2104_s6, %s2104_s6, %s2105_s24  }
  0x61   :  { %2084 = dma.done.wait [#allocation3], 2048  }
  0x62   :  { %2085 = vsyncadd [#allocation3], 4294965248 }
  0x63   :  { %2086 = dma.done.wait [#allocation6], 6144  }
  0x64   :  { %2087 = vsyncadd [#allocation6], 4294961152 }
  0x65   :  { %2088 = dma.done.wait [#allocation9], 4096  }
  0x66   :  { %2089 = vsyncadd [#allocation9], 4294963200 }
  0x67   :  { %2090 = dma.done.wait [#allocation12], 4096  }
  0x68   :  { %2091 = vsyncadd [#allocation12], 4294963200 }
  0x69   :  { %2092 = dma.done.wait [#allocation15], 4096  }
  0x6a   :  { %2093 = vsyncadd [#allocation15], 4294963200  ;;  %v219_v0 = vld [vmem:[#allocation5 + $0xf8] sm:$0xff]  ;;  %v218_v2 = vld [vmem:[#allocation5 + $0xf0] sm:$0xff]  ;;  %s2419_s30 = sld [smem:[#allocation29_spill]]  ;;  %s2110_s27 = smov 2  }
  0x6b   :  { %v203_v1 = vld [vmem:[#allocation5 + $0x78] sm:$0xff]  ;;  %1456 = vmatprep.subr.mxu1 %v219_v0  ;;  %v202_v3 = vld [vmem:[#allocation5 + $0x70] sm:$0xff]  ;;  %v217_v4 = vld [vmem:[#allocation5 + $0xe8] sm:$0xff]  ;;  %s2420_s23 = sld [smem:[#allocation27_spill]]  ;;  %s2113_s25 = smov 126  }
  0x6c   :  { %1457 = vmatpush3.msra.mxu1 %v203_v1  ;;  %v201_v5 = vld [vmem:[#allocation5 + $0x68] sm:$0xff]  ;;  %v216_v6 = vld [vmem:[#allocation5 + $0xe0] sm:$0xff]  ;;  %v215_v8 = vld [vmem:[#allocation5 + $0xd8] sm:$0xff] }
  0x6d   :  { %1458 = vmatprep.subr.mxu1 %v218_v2  ;;  %v200_v7 = vld [vmem:[#allocation5 + $0x60] sm:$0xff]  ;;  %v199_v9 = vld [vmem:[#allocation5 + $0x58] sm:$0xff]  ;;  %v214_v10 = vld [vmem:[#allocation5 + $0xd0] sm:$0xff] }
  0x6e   :  { %1459 = vmatpush3.msra.mxu1 %v202_v3  ;;  %v198_v11 = vld [vmem:[#allocation5 + $0x50] sm:$0xff]  ;;  %v213_v12 = vld [vmem:[#allocation5 + $0xc8] sm:$0xff]  ;;  %v212_v15 = vld [vmem:[#allocation5 + $0xc0] sm:$0xff] }
  0x6f   :  { %1460 = vmatprep.subr.mxu1 %v217_v4  ;;  %v173_v13 = vld [vmem:[#allocation2 + $0x8] sm:$0xff]  ;;  %v196_v16 = vld [vmem:[#allocation5 + $0x40] sm:$0xff]  ;;  %v211_v17 = vld [vmem:[#allocation5 + $0xb8] sm:$0xff] }
  0x70   :  { %1461 = vmatpush3.msra.mxu1 %v201_v5  ;;  %v197_v14 = vld [vmem:[#allocation5 + $0x48] sm:$0xff]  ;;  %291 = vmatprep.mubr.f32.mxu1 %v173_v13  ;;  %v195_v18 = vld [vmem:[#allocation5 + $0x38] sm:$0xff]  ;;  %v210_v19 = vld [vmem:[#allocation5 + $0xb0] sm:$0xff] }
  0x71   :  { %1462 = vmatprep.subr.mxu1 %v216_v6  ;;  %v194_v20 = vld [vmem:[#allocation5 + $0x30] sm:$0xff]  ;;  %v209_v21 = vld [vmem:[#allocation5 + $0xa8] sm:$0xff]  ;;  %v208_v23 = vld [vmem:[#allocation5 + $0xa0] sm:$0xff] }
  0x72   :  { %1463 = vmatpush3.msra.mxu1 %v200_v7  ;;  %v193_v22 = vld [vmem:[#allocation5 + $0x28] sm:$0xff]  ;;  %v192_v24 = vld [vmem:[#allocation5 + $0x20] sm:$0xff]  ;;  %v207_v25 = vld [vmem:[#allocation5 + $0x98] sm:$0xff] }
  0x73   :  { %1464 = vmatprep.subr.mxu1 %v215_v8  ;;  %v191_v26 = vld [vmem:[#allocation5 + $0x18] sm:$0xff]  ;;  %v206_v27 = vld [vmem:[#allocation5 + $0x90] sm:$0xff]  ;;  %v205_v29 = vld [vmem:[#allocation5 + $0x88] sm:$0xff] }
  0x74   :  { %1465 = vmatpush3.msra.mxu1 %v199_v9  ;;  %v190_v28 = vld [vmem:[#allocation5 + $0x10] sm:$0xff]  ;;  %v189_v30 = vld [vmem:[#allocation5 + $0x8] sm:$0xff]  ;;  %v204_v31 = vld [vmem:[#allocation5 + $0x80] sm:$0xff] }
  0x75   :  { %1466 = vmatprep.subr.mxu1 %v214_v10  ;;  %v188_v32 = vld [vmem:[#allocation5] sm:$0xff]  ;;  %v355_v34 = vld [vmem:[#allocation7 + $0x78] sm:$0xff]  ;;  %v354_v36 = vld [vmem:[#allocation7 + $0x70] sm:$0xff] }
  0x76   :  { %1467 = vmatpush3.msra.mxu1 %v198_v11  ;;  %v172_v33 = vld [vmem:[#allocation2] sm:$0xff]  ;;  %v175_v35 = vld [vmem:[#allocation2 + $0x18] sm:$0xff]  ;;  %v174_v37 = vld [vmem:[#allocation2 + $0x10] sm:$0xff] }
  0x77   :  { %1468 = vmatprep.subr.mxu1 %v213_v12  ;;  %v353_v38 = vld [vmem:[#allocation7 + $0x68] sm:$0xff]  ;;  %v352_v40 = vld [vmem:[#allocation7 + $0x60] sm:$0xff]  ;;  %v351_v42 = vld [vmem:[#allocation7 + $0x58] sm:$0xff] }
  0x78   :  { %1469 = vmatpush3.msra.mxu1 %v197_v14  ;;  %v177_v39 = vld [vmem:[#allocation2 + $0x28] sm:$0xff]  ;;  %v176_v41 = vld [vmem:[#allocation2 + $0x20] sm:$0xff]  ;;  %v179_v43 = vld [vmem:[#allocation2 + $0x38] sm:$0xff] }
  0x79   :  { %1470 = vmatprep.subr.mxu1 %v212_v15  ;;  %v350_v44 = vld [vmem:[#allocation7 + $0x50] sm:$0xff]  ;;  %v349_v46 = vld [vmem:[#allocation7 + $0x48] sm:$0xff]  ;;  %v348_v48 = vld [vmem:[#allocation7 + $0x40] sm:$0xff] }
  0x7a   :  { %1471 = vmatpush3.msra.mxu1 %v196_v16  ;;  %v178_v45 = vld [vmem:[#allocation2 + $0x30] sm:$0xff]  ;;  %v181_v47 = vld [vmem:[#allocation2 + $0x48] sm:$0xff]  ;;  %v180_v49 = vld [vmem:[#allocation2 + $0x40] sm:$0xff] }
  0x7b   :  { %1472 = vmatprep.subr.mxu1 %v211_v17  ;;  %v347_v50 = vld [vmem:[#allocation7 + $0x38] sm:$0xff]  ;;  %v346_v52 = vld [vmem:[#allocation7 + $0x30] sm:$0xff]  ;;  %v185_v54 = vld [vmem:[#allocation2 + $0x68] sm:$0xff] }
  0x7c   :  { %1473 = vmatpush3.msra.mxu1 %v195_v18  ;;  %v183_v51 = vld [vmem:[#allocation2 + $0x58] sm:$0xff]  ;;  %v182_v53 = vld [vmem:[#allocation2 + $0x50] sm:$0xff]  ;;  %v184_v55 = vld [vmem:[#allocation2 + $0x60] sm:$0xff] }
  0x7d   :  { %1474 = vmatprep.subr.mxu1 %v210_v19  ;;  %v187_v56 = vld [vmem:[#allocation2 + $0x78] sm:$0xff]  ;;  %v186_v57 = vld [vmem:[#allocation2 + $0x70] sm:$0xff]  ;;  %v345_v58 = vld [vmem:[#allocation7 + $0x28] sm:$0xff] }
  0x7e   :  { %1475 = vmatpush3.msra.mxu1 %v194_v20  ;;  %v344_v59 = vld [vmem:[#allocation7 + $0x20] sm:$0xff]  ;;  %v343_v60 = vld [vmem:[#allocation7 + $0x18] sm:$0xff]  ;;  %v342_v61 = vld [vmem:[#allocation7 + $0x10] sm:$0xff] }
  0x7f   :  { %1476 = vmatprep.subr.mxu1 %v209_v21  ;;  %v341_v62 = vld [vmem:[#allocation7 + $0x8] sm:$0xff]  ;;  %v340_v63 = vld [vmem:[#allocation7] sm:$0xff]  ;;  %v491_v0 = vld [vmem:[#allocation8 + $0x78] sm:$0xff] }
  0x80   :  { %1477 = vmatpush3.msra.mxu1 %v193_v22  ;;  %v490_v1 = vld [vmem:[#allocation8 + $0x70] sm:$0xff]  ;;  %1676 = vmatprep.subr.mxu0 %v491_v0  ;;  %v489_v2 = vld [vmem:[#allocation8 + $0x68] sm:$0xff]  ;;  %v488_v3 = vld [vmem:[#allocation8 + $0x60] sm:$0xff] }
  0x81   :  { %1478 = vmatprep.subr.mxu1 %v208_v23  ;;  %1677 = vmatpush3.msra.mxu0 %v491_v0  ;;  %v487_v4 = vld [vmem:[#allocation8 + $0x58] sm:$0xff]  ;;  %v486_v5 = vld [vmem:[#allocation8 + $0x50] sm:$0xff]  ;;  %v485_v6 = vld [vmem:[#allocation8 + $0x48] sm:$0xff] }
  0x82   :  { %1479 = vmatpush3.msra.mxu1 %v192_v24  ;;  %1678 = vmatprep.subr.mxu0 %v490_v1  ;;  %v484_v7 = vld [vmem:[#allocation8 + $0x40] sm:$0xff]  ;;  %v483_v8 = vld [vmem:[#allocation8 + $0x38] sm:$0xff]  ;;  %v482_v9 = vld [vmem:[#allocation8 + $0x30] sm:$0xff] }
  0x83   :  { %1480 = vmatprep.subr.mxu1 %v207_v25  ;;  %1679 = vmatpush3.msra.mxu0 %v490_v1  ;;  %v481_v10 = vld [vmem:[#allocation8 + $0x28] sm:$0xff]  ;;  %v480_v11 = vld [vmem:[#allocation8 + $0x20] sm:$0xff]  ;;  %v619_v1 = vld [vmem:[#allocation10 + $0x38] sm:$0xff] }
  0x84   :  { %1481 = vmatpush3.msra.mxu1 %v191_v26  ;;  %1680 = vmatprep.subr.mxu0 %v489_v2  ;;  %v1447_v13 = vld [vmem:[%s2419_s30] ss:$0 sm:$0xff] }
  0x85   :  { %1482 = vmatprep.subr.mxu1 %v206_v27  ;;  %1681 = vmatpush3.msra.mxu0 %v489_v2  ;;  %v620_v0 = vld [vmem:[#allocation10 + $0x40] sm:$0xff]  ;;  %v618_v2 = vld [vmem:[#allocation10 + $0x30] sm:$0xff] }
  0x86   :  { %1483 = vmatpush3.msra.mxu1 %v190_v28  ;;  %1682 = vmatprep.subr.mxu0 %v488_v3 }
  0x87   :  { %1484 = vmatprep.subr.mxu1 %v205_v29  ;;  %1683 = vmatpush3.msra.mxu0 %v488_v3  ;;  %v617_v3 = vld [vmem:[#allocation10 + $0x28] sm:$0xff] }
  0x88   :  { %1485 = vmatpush3.msra.mxu1 %v189_v30  ;;  %1684 = vmatprep.subr.mxu0 %v487_v4 }
  0x89   :  { %1486 = vmatprep.subr.mxu1 %v204_v31  ;;  %1685 = vmatpush3.msra.mxu0 %v487_v4  ;;  %v616_v4 = vld [vmem:[#allocation10 + $0x20] sm:$0xff] }
  0x8a   :  { %1487 = vmatpush3.msra.mxu1 %v188_v32  ;;  %1686 = vmatprep.subr.mxu0 %v486_v5 }
  0x8b   :  { %292 = vmatmul.mubr.f32.vlgmr.msra.gmra.mxu1 %v172_v33  ;;  %1632 = vmatprep.subr.mxu1 %v355_v34 }
  0x8c   :  { %296 = vmatprep.mubr.f32.mxu1 %v175_v35  ;;  %1633 = vmatpush3.msra.mxu1 %v355_v34 }
  0x8d   :  { %1634 = vmatprep.subr.mxu1 %v354_v36  ;;  %1687 = vmatpush3.msra.mxu0 %v486_v5  ;;  %v1448_v5 = vld [vmem:[%s2397_s5] ss:$0 sm:$0xff] }
  0x8e   :  { %1635 = vmatpush3.msra.mxu1 %v354_v36  ;;  %1688 = vmatprep.subr.mxu0 %v485_v6 }
  0x8f   :  { %297 = vmatmul.mubr.f32.gmra.mxu1 %v174_v37  ;;  %1636 = vmatprep.subr.mxu1 %v353_v38 }
  0x90   :  { %301 = vmatprep.mubr.f32.mxu1 %v177_v39  ;;  %1637 = vmatpush3.msra.mxu1 %v353_v38 }
  0x91   :  { %1638 = vmatprep.subr.mxu1 %v352_v40  ;;  %1689 = vmatpush3.msra.mxu0 %v485_v6 }
  0x92   :  { %1639 = vmatpush3.msra.mxu1 %v352_v40  ;;  %1690 = vmatprep.subr.mxu0 %v484_v7 }
  0x93   :  { %302 = vmatmul.mubr.f32.gmra.mxu1 %v176_v41  ;;  %1640 = vmatprep.subr.mxu1 %v351_v42 }
  0x94   :  { %306 = vmatprep.mubr.f32.mxu1 %v179_v43  ;;  %1641 = vmatpush3.msra.mxu1 %v351_v42 }
  0x95   :  { %1642 = vmatprep.subr.mxu1 %v350_v44  ;;  %1691 = vmatpush3.msra.mxu0 %v484_v7 }
  0x96   :  { %1643 = vmatpush3.msra.mxu1 %v350_v44  ;;  %1692 = vmatprep.subr.mxu0 %v483_v8 }
  0x97   :  { %307 = vmatmul.mubr.f32.gmra.mxu1 %v178_v45  ;;  %1644 = vmatprep.subr.mxu1 %v349_v46 }
  0x98   :  { %311 = vmatprep.mubr.f32.mxu1 %v181_v47  ;;  %1645 = vmatpush3.msra.mxu1 %v349_v46 }
  0x99   :  { %1646 = vmatprep.subr.mxu1 %v348_v48  ;;  %1693 = vmatpush3.msra.mxu0 %v483_v8 }
  0x9a   :  { %1647 = vmatpush3.msra.mxu1 %v348_v48  ;;  %1694 = vmatprep.subr.mxu0 %v482_v9 }
  0x9b   :  { %312 = vmatmul.mubr.f32.gmra.mxu1 %v180_v49  ;;  %1648 = vmatprep.subr.mxu1 %v347_v50 }
  0x9c   :  { %316 = vmatprep.mubr.f32.mxu1 %v183_v51  ;;  %1649 = vmatpush3.msra.mxu1 %v347_v50 }
  0x9d   :  { %1650 = vmatprep.subr.mxu1 %v346_v52  ;;  %1695 = vmatpush3.msra.mxu0 %v482_v9 }
  0x9e   :  { %1651 = vmatpush3.msra.mxu1 %v346_v52  ;;  %1696 = vmatprep.subr.mxu0 %v481_v10 }
  0x9f   :  { %317 = vmatmul.mubr.f32.gmra.mxu1 %v182_v53  ;;  %1652 = vmatprep.subr.mxu1 %v345_v58  ;;  %v479_v53 = vld [vmem:[#allocation8 + $0x18] sm:$0xff] }
  0xa0   :  { %321 = vmatprep.mubr.f32.mxu1 %v185_v54  ;;  %1653 = vmatpush3.msra.mxu1 %v345_v58  ;;  %v478_v54 = vld [vmem:[#allocation8 + $0x10] sm:$0xff] }
  0xa1   :  { %1654 = vmatprep.subr.mxu1 %v344_v59  ;;  %1697 = vmatpush3.msra.mxu0 %v481_v10  ;;  %v626_v58 = vld [vmem:[#allocation10 + $0x70] sm:$0xff] }
  0xa2   :  { %1655 = vmatpush3.msra.mxu1 %v344_v59  ;;  %1698 = vmatprep.subr.mxu0 %v480_v11  ;;  %v625_v59 = vld [vmem:[#allocation10 + $0x68] sm:$0xff] }
  0xa3   :  { %322 = vmatmul.mubr.f32.gmra.mxu1 %v184_v55  ;;  %1656 = vmatprep.subr.mxu1 %v343_v60  ;;  %v477_v55 = vld [vmem:[#allocation8 + $0x8] sm:$0xff] }
  0xa4   :  { %326 = vmatprep.mubr.f32.mxu1 %v187_v56  ;;  %1657 = vmatpush3.msra.mxu1 %v343_v60  ;;  %v476_v56 = vld [vmem:[#allocation8] sm:$0xff] }
  0xa5   :  { %1658 = vmatprep.subr.mxu1 %v342_v61  ;;  %1699 = vmatpush3.msra.mxu0 %v480_v11  ;;  %v624_v60 = vld [vmem:[#allocation10 + $0x60] sm:$0xff] }
  0xa6   :  { %1659 = vmatpush3.msra.mxu1 %v342_v61  ;;  %1700 = vmatprep.subr.mxu0 %v479_v53  ;;  %v623_v61 = vld [vmem:[#allocation10 + $0x58] sm:$0xff] }
  0xa7   :  { %327 = vmatmul.mubr.f32.gmra.mxu1 %v186_v57  ;;  %1660 = vmatprep.subr.mxu1 %v341_v62  ;;  %v627_v57 = vld [vmem:[#allocation10 + $0x78] sm:$0xff] }
  0xa8   :  { %1661 = vmatpush3.msra.mxu1 %v341_v62  ;;  %1701 = vmatpush3.msra.mxu0 %v479_v53  ;;  %v622_v62 = vld [vmem:[#allocation10 + $0x50] sm:$0xff] }
  0xa9   :  { %1662 = vmatprep.subr.mxu1 %v340_v63  ;;  %1702 = vmatprep.subr.mxu0 %v478_v54 }
  0xaa   :  { %1663 = vmatpush3.msra.mxu1 %v340_v63  ;;  %1703 = vmatpush3.msra.mxu0 %v478_v54  ;;  %v621_v63 = vld [vmem:[#allocation10 + $0x48] sm:$0xff] }
  0xab   :  { %1704 = vmatprep.subr.mxu0 %v477_v55  ;;  %1720 = vmatprep.subr.mxu1 %v627_v57 }
  0xac   :  { %1705 = vmatpush3.msra.mxu0 %v477_v55 }
  0xad   :  { %1706 = vmatprep.subr.mxu0 %v476_v56 }
  0xae   :  { %1707 = vmatpush3.msra.mxu0 %v476_v56 }
 0x14b   :  { %v1488_v12 = vpop.f32.mrf.mxu1 }
 0x14d   :  { %v1489_v14 = vpop.f32.mrf.mxu1 }
 0x14e   :  { %v1490_v15 = vadd.f32 %v1489_v14, %v1488_v12 }
 0x14f   :  { %v1491_v16 = vpop.f32.mrf.mxu1 }
 0x150   :  { %v294_v17 = vadd.f32 %v1490_v15, %v1447_v13 }
 0x151   :  { %v1492_v18 = vpop.f32.mrf.mxu1 }
 0x152   :  { %v332_v19 = vmax.f32 %v294_v17, 0.0  ;;  %v1493_v20 = vadd.f32 %v1492_v18, %v1491_v16 }
 0x153   :  { %v1494_v21 = vpop.f32.mrf.mxu1 }
 0x154   :  { %v299_v22 = vadd.f32 %v1493_v20, %v1447_v13  ;;  %1664 = vmatprep.mubr.f32.mxu1 %v332_v19 }
 0x155   :  { %v1495_v23 = vpop.f32.mrf.mxu1 }
 0x156   :  { %v333_v24 = vmax.f32 %v299_v22, 0.0  ;;  %v1496_v25 = vadd.f32 %v1495_v23, %v1494_v21 }
 0x157   :  { %v1497_v26 = vpop.f32.mrf.mxu1 }
 0x158   :  { %v304_v27 = vadd.f32 %v1496_v25, %v1447_v13  ;;  %1665 = vmatmul.mubr.f32.vlgmr.msra.gmra.mxu1 %v333_v24 }
 0x159   :  { %v1498_v28 = vpop.f32.mrf.mxu1  ;;  %1721 = vmatpush3.msra.mxu1 %v627_v57 }
 0x15a   :  { %v334_v29 = vmax.f32 %v304_v27, 0.0  ;;  %v1499_v30 = vadd.f32 %v1498_v28, %v1497_v26  ;;  %1722 = vmatprep.subr.mxu1 %v626_v58 }
 0x15b   :  { %v1500_v31 = vpop.f32.mrf.mxu1  ;;  %1723 = vmatpush3.msra.mxu1 %v626_v58 }
 0x15c   :  { %v309_v32 = vadd.f32 %v1499_v30, %v1447_v13  ;;  %1667 = vmatprep.mubr.f32.mxu1 %v334_v29  ;;  %1724 = vmatprep.subr.mxu1 %v625_v59  ;;  %v615_v30 = vld [vmem:[#allocation10 + $0x18] sm:$0xff] }
 0x15d   :  { %v1501_v33 = vpop.f32.mrf.mxu1  ;;  %1725 = vmatpush3.msra.mxu1 %v625_v59 }
 0x15e   :  { %v335_v34 = vmax.f32 %v309_v32, 0.0  ;;  %v1502_v35 = vadd.f32 %v1501_v33, %v1500_v31  ;;  %1726 = vmatprep.subr.mxu1 %v624_v60  ;;  %v614_v31 = vld [vmem:[#allocation10 + $0x10] sm:$0xff]  ;;  %v613_v32 = vld [vmem:[#allocation10 + $0x8] sm:$0xff]  ;;  %v612_v33 = vld [vmem:[#allocation10] sm:$0xff] }
 0x15f   :  { %v1503_v36 = vpop.f32.mrf.mxu1  ;;  %1727 = vmatpush3.msra.mxu1 %v624_v60 }
 0x160   :  { %v314_v37 = vadd.f32 %v1502_v35, %v1447_v13  ;;  %1668 = vmatmul.mubr.f32.gmra.mxu1 %v335_v34  ;;  %1728 = vmatprep.subr.mxu1 %v623_v61  ;;  %v748_v34 = vld [vmem:[%s2420_s23] sm:$0xff]  ;;  %v750_v35 = vld [vmem:[%s2420_s23 + $0x10] sm:$0xff] }
 0x161   :  { %v1504_v38 = vpop.f32.mrf.mxu1  ;;  %1729 = vmatpush3.msra.mxu1 %v623_v61  ;;  %764 = vrot.lane.b32.xlu0 %v748_v34, %s2110_s27 }
 0x162   :  { %v336_v39 = vmax.f32 %v314_v37, 0.0  ;;  %v1505_v40 = vadd.f32 %v1504_v38, %v1503_v36  ;;  %1730 = vmatprep.subr.mxu1 %v622_v62  ;;  %768 = vrot.lane.b32.xlu1 %v750_v35, %s2110_s27  ;;  %v749_v36 = vld [vmem:[%s2420_s23 + $0x8] sm:$0xff]  ;;  %v751_v37 = vld [vmem:[%s2420_s23 + $0x18] sm:$0xff] }
 0x163   :  { %v1506_v41 = vpop.f32.mrf.mxu1  ;;  %1731 = vmatpush3.msra.mxu1 %v622_v62  ;;  %v753_v38 = vld [vmem:[%s2420_s23 + $0x28] sm:$0xff] }
 0x164   :  { %v319_v42 = vadd.f32 %v1505_v40, %v1447_v13  ;;  %1670 = vmatprep.mubr.f32.mxu1 %v336_v39  ;;  %1732 = vmatprep.subr.mxu1 %v621_v63  ;;  %v752_v39 = vld [vmem:[%s2420_s23 + $0x20] sm:$0xff]  ;;  %v755_v40 = vld [vmem:[%s2420_s23 + $0x38] sm:$0xff] }
 0x165   :  { %v1507_v43 = vpop.f32.mrf.mxu1  ;;  %1733 = vmatpush3.msra.mxu1 %v621_v63  ;;  %766 = vrot.lane.b32.xlu0 %v749_v36, %s2110_s27 }
 0x166   :  { %v337_v44 = vmax.f32 %v319_v42, 0.0  ;;  %v1508_v45 = vadd.f32 %v1507_v43, %v1506_v41  ;;  %1734 = vmatprep.subr.mxu1 %v620_v0  ;;  %770 = vrot.lane.b32.xlu1 %v751_v37, %s2110_s27  ;;  %v754_v41 = vld [vmem:[%s2420_s23 + $0x30] sm:$0xff]  ;;  %v1449_v42 = vld [vmem:[%s2399_s7] ss:$0 sm:$0xff] }
 0x167   :  { %v1509_v46 = vpop.f32.mrf.mxu1  ;;  %1735 = vmatpush3.msra.mxu1 %v620_v0 }
 0x168   :  { %v324_v47 = vadd.f32 %v1508_v45, %v1447_v13  ;;  %1671 = vmatmul.mubr.f32.gmra.mxu1 %v337_v44  ;;  %1736 = vmatprep.subr.mxu1 %v619_v1 }
 0x169   :  { %v1510_v48 = vpop.f32.mrf.mxu1  ;;  %1737 = vmatpush3.msra.mxu1 %v619_v1  ;;  %772 = vrot.lane.b32.xlu0 %v752_v39, %s2110_s27  ;;  %v979_v39 = vld [vmem:[#allocation11 + $0x70] sm:$0xff] }
 0x16a   :  { %v338_v49 = vmax.f32 %v324_v47, 0.0  ;;  %v1511_v50 = vadd.f32 %v1510_v48, %v1509_v46  ;;  %1738 = vmatprep.subr.mxu1 %v618_v2  ;;  %774 = vrot.lane.b32.xlu1 %v753_v38, %s2110_s27  ;;  %v980_v38 = vld [vmem:[#allocation11 + $0x78] sm:$0xff] }
 0x16b   :  { %1739 = vmatpush3.msra.mxu1 %v618_v2  ;;  %1764 = vmatprep.subr.mxu0 %v980_v38 }
 0x16c   :  { %v329_v51 = vadd.f32 %v1511_v50, %v1447_v13  ;;  %1673 = vmatprep.mubr.f32.mxu1 %v338_v49  ;;  %1740 = vmatprep.subr.mxu1 %v617_v3 }
 0x16d   :  { %1741 = vmatpush3.msra.mxu1 %v617_v3  ;;  %776 = vrot.lane.b32.xlu0 %v754_v41, %s2110_s27  ;;  %v2111_v3 = vmov 1   ;;  %v977_v41 = vld [vmem:[#allocation11 + $0x60] sm:$0xff] }
 0x16e   :  { %v339_v52 = vmax.f32 %v329_v51, 0.0  ;;  %1742 = vmatprep.subr.mxu1 %v616_v4  ;;  %778 = vrot.lane.b32.xlu1 %v755_v40, %s2110_s27  ;;  %v978_v40 = vld [vmem:[#allocation11 + $0x68] sm:$0xff] }
 0x16f   :  { %1743 = vmatpush3.msra.mxu1 %v616_v4  ;;  %1872 = vset.pattern.permute.xlu0 %v2111_v3  ;;  %v2112_v4 = vmov 0  }
 0x170   :  { %1674 = vmatmul.mubr.f32.gmra.mxu1 %v339_v52  ;;  %1744 = vmatprep.subr.mxu1 %v615_v30 }
 0x171   :  { %1745 = vmatpush3.msra.mxu1 %v615_v30  ;;  %1871 = vset.pattern.permute.xlu1 %v2112_v4 }
 0x172   :  { %1746 = vmatprep.subr.mxu1 %v614_v31 }
 0x173   :  { %1747 = vmatpush3.msra.mxu1 %v614_v31 }
 0x174   :  { %1748 = vmatprep.subr.mxu1 %v613_v32 }
 0x175   :  { %1749 = vmatpush3.msra.mxu1 %v613_v32 }
 0x176   :  { %1750 = vmatprep.subr.mxu1 %v612_v33 }
 0x177   :  { %1751 = vmatpush3.msra.mxu1 %v612_v33 }
 0x218   :  { %v1666_v6 = vpop.f32.mrf.mxu1 }
 0x219   :  { %v435_v7 = vadd.f32 %v1666_v6, %v1448_v5  ;;  %v1450_v6 = vld [vmem:[%s2401_s9] ss:$0 sm:$0xff] }
 0x21a   :  { %v429_v8 = vpop.f32.mrf.mxu1 }
 0x21b   :  { %v430_v9 = vadd.f32 %v1448_v5, %v429_v8  ;;  %v469_v11 = vmax.f32 %v435_v7, 0.0 }
 0x21d   :  { %v468_v10 = vmax.f32 %v430_v9, 0.0 }
 0x21f   :  { %1708 = vmatprep.mubr.f32.mxu0 %v468_v10 }
 0x220   :  { %v1669_v12 = vpop.f32.mrf.mxu1  ;;  %1709 = vmatmul.mubr.f32.vlgmr.msra.gmra.mxu0 %v469_v11  ;;  %v769_v11 = vpop.permute.xlu1 %768 }
 0x221   :  { %v445_v13 = vadd.f32 %v1669_v12, %v1448_v5  ;;  %1765 = vmatpush3.msra.mxu0 %v980_v38 }
 0x222   :  { %v439_v14 = vpop.f32.mrf.mxu1  ;;  %1766 = vmatprep.subr.mxu0 %v979_v39 }
 0x223   :  { %v440_v15 = vadd.f32 %v1448_v5, %v439_v14  ;;  %v471_v17 = vmax.f32 %v445_v13, 0.0  ;;  %1767 = vmatpush3.msra.mxu0 %v979_v39 }
 0x224   :  { %1768 = vmatprep.subr.mxu0 %v978_v40 }
 0x225   :  { %v470_v16 = vmax.f32 %v440_v15, 0.0  ;;  %1769 = vmatpush3.msra.mxu0 %v978_v40 }
 0x226   :  { %1770 = vmatprep.subr.mxu0 %v977_v41 }
 0x227   :  { %1711 = vmatprep.mubr.f32.mxu0 %v470_v16  ;;  %v771_v16 = vpop.permute.xlu1 %770  ;;  %1771 = vmatpush3.msra.mxu0 %v977_v41 }
 0x228   :  { %v1672_v18 = vpop.f32.mrf.mxu1  ;;  %1712 = vmatmul.mubr.f32.gmra.mxu0 %v471_v17 }
 0x229   :  { %v455_v19 = vadd.f32 %v1672_v18, %v1448_v5 }
 0x22a   :  { %v449_v20 = vpop.f32.mrf.mxu1 }
 0x22b   :  { %v450_v21 = vadd.f32 %v1448_v5, %v449_v20  ;;  %v473_v22 = vmax.f32 %v455_v19, 0.0 }
 0x22d   :  { %v472_v23 = vmax.f32 %v450_v21, 0.0 }
 0x22f   :  { %1714 = vmatprep.mubr.f32.mxu0 %v472_v23  ;;  %v775_v23 = vpop.permute.xlu1 %774 }
 0x230   :  { %v1675_v24 = vpop.f32.mrf.mxu1  ;;  %1715 = vmatmul.mubr.f32.gmra.mxu0 %v473_v22 }
 0x231   :  { %v465_v25 = vadd.f32 %v1675_v24, %v1448_v5 }
 0x232   :  { %v459_v26 = vpop.f32.mrf.mxu1 }
 0x233   :  { %v460_v27 = vadd.f32 %v1448_v5, %v459_v26  ;;  %v475_v28 = vmax.f32 %v465_v25, 0.0  ;;  %v765_v5 = vpop.permute.xlu0 %764  ;;  %v779_v31 = vpop.permute.xlu1 %778 }
 0x235   :  { %v474_v29 = vmax.f32 %v460_v27, 0.0 }
 0x237   :  { %1717 = vmatprep.mubr.f32.mxu0 %v474_v29  ;;  %v767_v8 = vpop.permute.xlu0 %766 }
 0x238   :  { %1718 = vmatmul.mubr.f32.gmra.mxu0 %v475_v28 }
 0x23b   :  { %v773_v26 = vpop.permute.xlu0 %772 }
 0x23f   :  { %v777_v34 = vpop.permute.xlu0 %776 }
 0x2e0   :  { %v1710_v43 = vpop.f32.mrf.mxu0 }
 0x2e1   :  { %v571_v44 = vadd.f32 %v1710_v43, %v1449_v42  ;;  %v975_v43 = vld [vmem:[#allocation11 + $0x50] sm:$0xff] }
 0x2e2   :  { %v565_v45 = vpop.f32.mrf.mxu0 }
 0x2e3   :  { %v566_v46 = vadd.f32 %v1449_v42, %v565_v45  ;;  %v605_v48 = vmax.f32 %v571_v44, 0.0  ;;  %v974_v44 = vld [vmem:[#allocation11 + $0x48] sm:$0xff]  ;;  %v973_v45 = vld [vmem:[#allocation11 + $0x40] sm:$0xff] }
 0x2e5   :  { %v604_v47 = vmax.f32 %v566_v46, 0.0  ;;  %v972_v46 = vld [vmem:[#allocation11 + $0x38] sm:$0xff] }
 0x2e7   :  { %1752 = vmatprep.mubr.f32.mxu1 %v604_v47  ;;  %v971_v47 = vld [vmem:[#allocation11 + $0x30] sm:$0xff] }
 0x2e8   :  { %v1713_v49 = vpop.f32.mrf.mxu0  ;;  %1753 = vmatmul.mubr.f32.vlgmr.msra.gmra.mxu1 %v605_v48 }
 0x2e9   :  { %v581_v50 = vadd.f32 %v1713_v49, %v1449_v42  ;;  %v970_v49 = vld [vmem:[#allocation11 + $0x28] sm:$0xff] }
 0x2ea   :  { %v575_v51 = vpop.f32.mrf.mxu0 }
 0x2eb   :  { %v576_v52 = vadd.f32 %v1449_v42, %v575_v51  ;;  %v607_v54 = vmax.f32 %v581_v50, 0.0  ;;  %v969_v51 = vld [vmem:[#allocation11 + $0x20] sm:$0xff] }
 0x2ed   :  { %v606_v53 = vmax.f32 %v576_v52, 0.0 }
 0x2ef   :  { %1755 = vmatprep.mubr.f32.mxu1 %v606_v53  ;;  %v968_v53 = vld [vmem:[#allocation11 + $0x18] sm:$0xff] }
 0x2f0   :  { %v1716_v55 = vpop.f32.mrf.mxu0  ;;  %1756 = vmatmul.mubr.f32.gmra.mxu1 %v607_v54 }
 0x2f1   :  { %v591_v56 = vadd.f32 %v1716_v55, %v1449_v42  ;;  %v967_v55 = vld [vmem:[#allocation11 + $0x10] sm:$0xff] }
 0x2f2   :  { %v585_v57 = vpop.f32.mrf.mxu0 }
 0x2f3   :  { %v586_v58 = vadd.f32 %v1449_v42, %v585_v57  ;;  %v609_v59 = vmax.f32 %v591_v56, 0.0 }
 0x2f5   :  { %v608_v60 = vmax.f32 %v586_v58, 0.0 }
 0x2f7   :  { %1758 = vmatprep.mubr.f32.mxu1 %v608_v60  ;;  %v966_v60 = vld [vmem:[#allocation11 + $0x8] sm:$0xff] }
 0x2f8   :  { %v1719_v61 = vpop.f32.mrf.mxu0  ;;  %1759 = vmatmul.mubr.f32.gmra.mxu1 %v609_v59 }
 0x2f9   :  { %v601_v62 = vadd.f32 %v1719_v61, %v1449_v42  ;;  %v965_v61 = vld [vmem:[#allocation11] sm:$0xff] }
 0x2fa   :  { %v595_v63 = vpop.f32.mrf.mxu0 }
 0x2fb   :  { %v596_v0 = vadd.f32 %v1449_v42, %v595_v63  ;;  %v611_v1 = vmax.f32 %v601_v62, 0.0  ;;  %v976_v42 = vld [vmem:[#allocation11 + $0x58] sm:$0xff] }
 0x2fc   :  { %1772 = vmatprep.subr.mxu0 %v976_v42 }
 0x2fd   :  { %v610_v2 = vmax.f32 %v596_v0, 0.0  ;;  %1773 = vmatpush3.msra.mxu0 %v976_v42 }
 0x2fe   :  { %1774 = vmatprep.subr.mxu0 %v975_v43 }
 0x2ff   :  { %1761 = vmatprep.mubr.f32.mxu1 %v610_v2  ;;  %1775 = vmatpush3.msra.mxu0 %v975_v43 }
 0x300   :  { %1762 = vmatmul.mubr.f32.gmra.mxu1 %v611_v1  ;;  %1776 = vmatprep.subr.mxu0 %v974_v44 }
 0x301   :  { %1777 = vmatpush3.msra.mxu0 %v974_v44 }
 0x302   :  { %1778 = vmatprep.subr.mxu0 %v973_v45 }
 0x303   :  { %1779 = vmatpush3.msra.mxu0 %v973_v45 }
 0x304   :  { %1780 = vmatprep.subr.mxu0 %v972_v46 }
 0x305   :  { %1781 = vmatpush3.msra.mxu0 %v972_v46 }
 0x306   :  { %1782 = vmatprep.subr.mxu0 %v971_v47 }
 0x307   :  { %1783 = vmatpush3.msra.mxu0 %v971_v47 }
 0x308   :  { %1784 = vmatprep.subr.mxu0 %v970_v49 }
 0x309   :  { %1785 = vmatpush3.msra.mxu0 %v970_v49 }
 0x30a   :  { %1786 = vmatprep.subr.mxu0 %v969_v51 }
 0x30b   :  { %1787 = vmatpush3.msra.mxu0 %v969_v51 }
 0x30c   :  { %1788 = vmatprep.subr.mxu0 %v968_v53 }
 0x30d   :  { %1789 = vmatpush3.msra.mxu0 %v968_v53 }
 0x30e   :  { %1790 = vmatprep.subr.mxu0 %v967_v55 }
 0x30f   :  { %1791 = vmatpush3.msra.mxu0 %v967_v55 }
 0x310   :  { %1792 = vmatprep.subr.mxu0 %v966_v60 }
 0x311   :  { %1793 = vmatpush3.msra.mxu0 %v966_v60 }
 0x312   :  { %1794 = vmatprep.subr.mxu0 %v965_v61 }
 0x313   :  { %1795 = vmatpush3.msra.mxu0 %v965_v61 }
 0x3a8   :  { %v1754_v7 = vpop.f32.mrf.mxu1 }
 0x3a9   :  { %v2303_v9 = vadd.f32 %v1754_v7, %v1450_v6 }
 0x3aa   :  { %v701_v10 = vpop.f32.mrf.mxu1 }
 0x3ab   :  { %741 = vst [vmem:[#allocation17 + $0x8] sm:$0xff] %v2303_v9  ;;  %v789_v12 = vmul.f32 %v767_v8, %v2303_v9  ;;  %v2307_v13 = vadd.f32 %v1450_v6, %v701_v10  ;;  %v1116_v8 = vld [vmem:[#allocation13 + $0x78] sm:$0xff]  ;;  %v1114_v10 = vld [vmem:[#allocation13 + $0x68] sm:$0xff] }
 0x3ac   :  { %1808 = vmatprep.subr.mxu1 %v1116_v8 }
 0x3ad   :  { %740 = vst [vmem:[#allocation17] sm:$0xff] %v2307_v13  ;;  %806 = vrot.lane.b32.xlu1 %v789_v12, %s2113_s25  ;;  %v788_v14 = vmul.f32 %v765_v5, %v2307_v13  ;;  %1809 = vmatpush3.msra.mxu1 %v1116_v8  ;;  %v1112_v12 = vld [vmem:[#allocation13 + $0x58] sm:$0xff] }
 0x3af   :  { %804 = vrot.lane.b32.xlu0 %v788_v14, %s2113_s25  ;;  %v1108_v14 = vld [vmem:[#allocation13 + $0x38] sm:$0xff] }
 0x3b0   :  { %v1757_v15 = vpop.f32.mrf.mxu1 }
 0x3b1   :  { %v2313_v17 = vadd.f32 %v1757_v15, %v1450_v6  ;;  %v1107_v15 = vld [vmem:[#allocation13 + $0x30] sm:$0xff] }
 0x3b2   :  { %v711_v18 = vpop.f32.mrf.mxu1 }
 0x3b3   :  { %743 = vst [vmem:[#allocation17 + $0x18] sm:$0xff] %v2313_v17  ;;  %v791_v19 = vmul.f32 %v771_v16, %v2313_v17  ;;  %v2317_v20 = vadd.f32 %v1450_v6, %v711_v18  ;;  %v1106_v16 = vld [vmem:[#allocation13 + $0x28] sm:$0xff]  ;;  %v1451_v18 = vld [vmem:[%s2402_s10] ss:$0 sm:$0xff] }
 0x3b5   :  { %742 = vst [vmem:[#allocation17 + $0x10] sm:$0xff] %v2317_v20  ;;  %810 = vrot.lane.b32.xlu1 %v791_v19, %s2113_s25  ;;  %v790_v21 = vmul.f32 %v769_v11, %v2317_v20  ;;  %v1113_v11 = vld [vmem:[#allocation13 + $0x60] sm:$0xff] }
 0x3b7   :  { %808 = vrot.lane.b32.xlu0 %v790_v21, %s2113_s25 }
 0x3b8   :  { %v1760_v22 = vpop.f32.mrf.mxu1 }
 0x3b9   :  { %v2323_v24 = vadd.f32 %v1760_v22, %v1450_v6  ;;  %v1452_v22 = vld [vmem:[%s2403_s11] ss:$0 sm:$0xff] }
 0x3ba   :  { %v721_v25 = vpop.f32.mrf.mxu1 }
 0x3bb   :  { %745 = vst [vmem:[#allocation17 + $0x28] sm:$0xff] %v2323_v24  ;;  %v793_v27 = vmul.f32 %v775_v23, %v2323_v24  ;;  %v2327_v28 = vadd.f32 %v1450_v6, %v721_v25  ;;  %v1453_v23 = vld [vmem:[%s2402_s10 + $0x1] ss:$0 sm:$0xff] }
 0x3bd   :  { %744 = vst [vmem:[#allocation17 + $0x20] sm:$0xff] %v2327_v28  ;;  %v792_v29 = vmul.f32 %v773_v26, %v2327_v28  ;;  %814 = vrot.lane.b32.xlu1 %v793_v27, %s2113_s25 }
 0x3bf   :  { %812 = vrot.lane.b32.xlu0 %v792_v29, %s2113_s25 }
 0x3c0   :  { %v1763_v30 = vpop.f32.mrf.mxu1 }
 0x3c1   :  { %v2333_v32 = vadd.f32 %v1763_v30, %v1450_v6 }
 0x3c2   :  { %v731_v33 = vpop.f32.mrf.mxu1 }
 0x3c3   :  { %747 = vst [vmem:[#allocation17 + $0x38] sm:$0xff] %v2333_v32  ;;  %v795_v35 = vmul.f32 %v779_v31, %v2333_v32  ;;  %v2337_v36 = vadd.f32 %v1450_v6, %v731_v33 }
 0x3c5   :  { %746 = vst [vmem:[#allocation17 + $0x30] sm:$0xff] %v2337_v36  ;;  %v794_v37 = vmul.f32 %v777_v34, %v2337_v36  ;;  %818 = vrot.lane.b32.xlu1 %v795_v35, %s2113_s25 }
 0x3c7   :  { %816 = vrot.lane.b32.xlu0 %v794_v37, %s2113_s25 }
 0x41f   :  { %v807_v48 = vpop.permute.xlu1 %806 }
 0x420   :  { %v829_v50 = vadd.f32 %v807_v48, %v2303_v9  ;;  %v1115_v9 = vld [vmem:[#allocation13 + $0x70] sm:$0xff] }
 0x421   :  { %v805_v52 = vpop.permute.xlu0 %804  ;;  %1810 = vmatprep.subr.mxu1 %v1115_v9 }
 0x422   :  { %845 = vperm.xlu1 %1871, %v829_v50   ;;  %910 = vperm.xlu0 %1872, %v829_v50   ;;  %v828_v54 = vadd.f32 %v805_v52, %v2307_v13  ;;  %v1111_v13 = vld [vmem:[#allocation13 + $0x50] sm:$0xff] }
 0x423   :  { %1811 = vmatpush3.msra.mxu1 %v1115_v9 }
 0x424   :  { %1812 = vmatprep.subr.mxu1 %v1114_v10 }
 0x425   :  { %1813 = vmatpush3.msra.mxu1 %v1114_v10 }
 0x426   :  { %1874 = vset.pattern.permute.xlu1 %v2111_v3  ;;  %1873 = vset.pattern.permute.xlu0 %v2112_v4 }
 0x427   :  { %v811_v56 = vpop.permute.xlu1 %810  ;;  %906 = vperm.xlu1 %1874, %v828_v54   ;;  %840 = vperm.xlu0 %1873, %v828_v54  }
 0x428   :  { %v831_v58 = vadd.f32 %v811_v56, %v2313_v17  ;;  %1814 = vmatprep.subr.mxu1 %v1113_v11  ;;  %v1105_v17 = vld [vmem:[#allocation13 + $0x20] sm:$0xff] }
 0x429   :  { %v809_v57 = vpop.permute.xlu0 %808  ;;  %1815 = vmatpush3.msra.mxu1 %v1113_v11 }
 0x42a   :  { %v830_v59 = vadd.f32 %v809_v57, %v2317_v20  ;;  %1816 = vmatprep.subr.mxu1 %v1112_v12 }
 0x42b   :  { %1875 = vset.pattern.permute.xlu1 %v2112_v4  ;;  %1878 = vset.pattern.permute.xlu0 %v2111_v3 }
 0x42c   :  { %855 = vperm.xlu1 %1875, %v831_v58   ;;  %914 = vperm.xlu0 %1878, %v830_v59  }
 0x42d   :  { %1817 = vmatpush3.msra.mxu1 %v1112_v12 }
 0x42e   :  { %1818 = vmatprep.subr.mxu1 %v1111_v13 }
 0x42f   :  { %v815_v0 = vpop.permute.xlu1 %814  ;;  %1819 = vmatpush3.msra.mxu1 %v1111_v13 }
 0x430   :  { %1876 = vset.pattern.permute.xlu1 %v2111_v3  ;;  %1879 = vset.pattern.permute.xlu0 %v2112_v4  ;;  %v833_v1 = vadd.f32 %v815_v0, %v2323_v24 }
 0x431   :  { %918 = vperm.xlu1 %1876, %v831_v58   ;;  %v813_v62 = vpop.permute.xlu0 %812 }
 0x432   :  { %v832_v63 = vadd.f32 %v813_v62, %v2327_v28 }
 0x434   :  { %860 = vperm.xlu0 %1879, %v832_v63  }
 0x435   :  { %1877 = vset.pattern.permute.xlu1 %v2112_v4 }
 0x436   :  { %850 = vperm.xlu1 %1877, %v830_v59  }
 0x437   :  { %v819_v6 = vpop.permute.xlu1 %818 }
 0x438   :  { %1880 = vset.pattern.permute.xlu0 %v2111_v3  ;;  %v835_v7 = vadd.f32 %v819_v6, %v2333_v32 }
 0x439   :  { %926 = vperm.xlu0 %1880, %v833_v1   ;;  %v817_v2 = vpop.permute.xlu0 %816 }
 0x43a   :  { %v834_v5 = vadd.f32 %v817_v2, %v2337_v36  ;;  %865 = vperm.xlu1 %1877, %v833_v1  }
 0x43d   :  { %930 = vperm.xlu0 %1880, %v834_v5  }
 0x43e   :  { %1881 = vset.pattern.permute.xlu1 %v2111_v3 }
 0x43f   :  { %922 = vperm.xlu1 %1881, %v832_v63  }
 0x443   :  { %1882 = vset.pattern.permute.xlu1 %v2112_v4  ;;  %v1110_v4 = vld [vmem:[#allocation13 + $0x48] sm:$0xff] }
 0x444   :  { %875 = vperm.xlu1 %1882, %v835_v7   ;;  %1820 = vmatprep.subr.mxu1 %v1110_v4 }
 0x445   :  { %1821 = vmatpush3.msra.mxu1 %v1110_v4 }
 0x448   :  { %870 = vperm.xlu1 %1882, %v834_v5  }
 0x44c   :  { %1883 = vset.pattern.permute.xlu1 %v2111_v3  ;;  %v1109_v3 = vld [vmem:[#allocation13 + $0x40] sm:$0xff] }
 0x44d   :  { %934 = vperm.xlu1 %1883, %v835_v7   ;;  %1822 = vmatprep.subr.mxu1 %v1109_v3 }
 0x44e   :  { %1823 = vmatpush3.msra.mxu1 %v1109_v3  ;;  %v1104_v3 = vld [vmem:[#allocation13 + $0x18] sm:$0xff] }
 0x44f   :  { %1824 = vmatprep.subr.mxu1 %v1108_v14 }
 0x450   :  { %1825 = vmatpush3.msra.mxu1 %v1108_v14  ;;  %v1103_v14 = vld [vmem:[#allocation13 + $0x10] sm:$0xff] }
 0x451   :  { %1826 = vmatprep.subr.mxu1 %v1107_v15 }
 0x452   :  { %1827 = vmatpush3.msra.mxu1 %v1107_v15  ;;  %v1102_v15 = vld [vmem:[#allocation13 + $0x8] sm:$0xff] }
 0x453   :  { %1828 = vmatprep.subr.mxu1 %v1106_v16 }
 0x454   :  { %1829 = vmatpush3.msra.mxu1 %v1106_v16  ;;  %v1101_v16 = vld [vmem:[#allocation13] sm:$0xff] }
 0x455   :  { %1830 = vmatprep.subr.mxu1 %v1105_v17 }
 0x456   :  { %1831 = vmatpush3.msra.mxu1 %v1105_v17  ;;  %v1268_v17 = vld [vmem:[#allocation14 + $0xf8] sm:$0xff] }
 0x457   :  { %1832 = vmatprep.subr.mxu1 %v1104_v3  ;;  %1281 = vmatprep.subr.mxu0 %v1268_v17 }
 0x458   :  { %1833 = vmatpush3.msra.mxu1 %v1104_v3 }
 0x459   :  { %1834 = vmatprep.subr.mxu1 %v1103_v14 }
 0x45a   :  { %1835 = vmatpush3.msra.mxu1 %v1103_v14 }
 0x45b   :  { %1836 = vmatprep.subr.mxu1 %v1102_v15 }
 0x45c   :  { %1837 = vmatpush3.msra.mxu1 %v1102_v15 }
 0x45d   :  { %1838 = vmatprep.subr.mxu1 %v1101_v16 }
 0x45e   :  { %1839 = vmatpush3.msra.mxu1 %v1101_v16 }
 0x49d   :  { %v846_v19 = vpop.permute.xlu1 %845  ;;  %v911_v20 = vpop.permute.xlu0 %910 }
 0x49e   :  { %v883_v21 = vmul.f32 %v1451_v18, %v846_v19  ;;  %v942_v28 = vmul.f32 %v1453_v23, %v911_v20  ;;  %v1266_v19 = vld [vmem:[#allocation14 + $0xe8] sm:$0xff]  ;;  %v1265_v20 = vld [vmem:[#allocation14 + $0xe0] sm:$0xff] }
 0x4a0   :  { %v897_v24 = vadd.f32 %v1452_v22, %v883_v21  ;;  %v1264_v21 = vld [vmem:[#allocation14 + $0xd8] sm:$0xff] }
 0x4a2   :  { %v907_v25 = vpop.permute.xlu1 %906  ;;  %v841_v26 = vpop.permute.xlu0 %840  ;;  %v950_v31 = vadd.f32 %v942_v28, %v897_v24  ;;  %v1261_v24 = vld [vmem:[#allocation14 + $0xc0] sm:$0xff] }
 0x4a3   :  { %v882_v27 = vmul.f32 %v1451_v18, %v841_v26  ;;  %v941_v29 = vmul.f32 %v1453_v23, %v907_v25  ;;  %v1260_v25 = vld [vmem:[#allocation14 + $0xb8] sm:$0xff]  ;;  %v1259_v26 = vld [vmem:[#allocation14 + $0xb0] sm:$0xff]  ;;  %v1257_v28 = vld [vmem:[#allocation14 + $0xa0] sm:$0xff] }
 0x4a4   :  { %v958_v35 = vmax.f32 %v950_v31, 0.0  ;;  %v1254_v31 = vld [vmem:[#allocation14 + $0x88] sm:$0xff] }
 0x4a5   :  { %v896_v30 = vadd.f32 %v1452_v22, %v882_v27  ;;  %v1258_v27 = vld [vmem:[#allocation14 + $0xa8] sm:$0xff] }
 0x4a7   :  { %v856_v32 = vpop.permute.xlu1 %855  ;;  %v949_v33 = vadd.f32 %v941_v29, %v896_v30  ;;  %v915_v37 = vpop.permute.xlu0 %914  ;;  %v1256_v29 = vld [vmem:[#allocation14 + $0x98] sm:$0xff]  ;;  %v1255_v30 = vld [vmem:[#allocation14 + $0x90] sm:$0xff] }
 0x4a8   :  { %v885_v38 = vmul.f32 %v1451_v18, %v856_v32  ;;  %v943_v44 = vmul.f32 %v1453_v23, %v915_v37  ;;  %v1253_v32 = vld [vmem:[#allocation14 + $0x80] sm:$0xff]  ;;  %v1248_v37 = vld [vmem:[#allocation14 + $0x58] sm:$0xff] }
 0x4a9   :  { %v957_v34 = vmax.f32 %v949_v33, 0.0  ;;  %v1252_v33 = vld [vmem:[#allocation14 + $0x78] sm:$0xff] }
 0x4aa   :  { %v899_v43 = vadd.f32 %v1452_v22, %v885_v38  ;;  %v1247_v38 = vld [vmem:[#allocation14 + $0x50] sm:$0xff] }
 0x4ab   :  { %1796 = vmatprep.mubr.f32.mxu0 %v957_v34  ;;  %v1251_v34 = vld [vmem:[#allocation14 + $0x70] sm:$0xff] }
 0x4ac   :  { %v919_v36 = vpop.permute.xlu1 %918  ;;  %1797 = vmatmul.mubr.f32.vlgmr.msra.gmra.mxu0 %v958_v35  ;;  %v1250_v35 = vld [vmem:[#allocation14 + $0x68] sm:$0xff] }
 0x4ad   :  { %v944_v39 = vmul.f32 %v1453_v23, %v919_v36  ;;  %v1249_v36 = vld [vmem:[#allocation14 + $0x60] sm:$0xff] }
 0x4af   :  { %v861_v40 = vpop.permute.xlu0 %860  ;;  %v952_v46 = vadd.f32 %v944_v39, %v899_v43  ;;  %v1246_v39 = vld [vmem:[#allocation14 + $0x48] sm:$0xff] }
 0x4b0   :  { %v886_v50 = vmul.f32 %v1451_v18, %v861_v40  ;;  %v1245_v40 = vld [vmem:[#allocation14 + $0x40] sm:$0xff] }
 0x4b1   :  { %v851_v41 = vpop.permute.xlu1 %850  ;;  %v960_v54 = vmax.f32 %v952_v46, 0.0 }
 0x4b2   :  { %v884_v42 = vmul.f32 %v1451_v18, %v851_v41  ;;  %v900_v57 = vadd.f32 %v1452_v22, %v886_v50  ;;  %v1244_v41 = vld [vmem:[#allocation14 + $0x38] sm:$0xff] }
 0x4b4   :  { %v898_v45 = vadd.f32 %v1452_v22, %v884_v42  ;;  %v927_v51 = vpop.permute.xlu0 %926  ;;  %v1454_v42 = vld [vmem:[%s2405_s13] ss:$0 sm:$0xff] }
 0x4b5   :  { %v866_v47 = vpop.permute.xlu1 %865  ;;  %v946_v55 = vmul.f32 %v1453_v23, %v927_v51 }
 0x4b6   :  { %v887_v48 = vmul.f32 %v1451_v18, %v866_v47  ;;  %v951_v49 = vadd.f32 %v943_v44, %v898_v45 }
 0x4b8   :  { %v901_v52 = vadd.f32 %v1452_v22, %v887_v48  ;;  %v959_v53 = vmax.f32 %v951_v49, 0.0  ;;  %v931_v0 = vpop.permute.xlu0 %930 }
 0x4b9   :  { %v947_v6 = vmul.f32 %v1453_v23, %v931_v0 }
 0x4ba   :  { %v923_v56 = vpop.permute.xlu1 %922  ;;  %1799 = vmatprep.mubr.f32.mxu0 %v959_v53  ;;  %v954_v59 = vadd.f32 %v946_v55, %v901_v52 }
 0x4bb   :  { %v945_v58 = vmul.f32 %v1453_v23, %v923_v56  ;;  %1800 = vmatmul.mubr.f32.gmra.mxu0 %v960_v54 }
 0x4bc   :  { %v962_v63 = vmax.f32 %v954_v59, 0.0 }
 0x4bd   :  { %v953_v60 = vadd.f32 %v945_v58, %v900_v57 }
 0x4bf   :  { %v961_v61 = vmax.f32 %v953_v60, 0.0  ;;  %v876_v62 = vpop.permute.xlu1 %875 }
 0x4c0   :  { %v889_v5 = vmul.f32 %v1451_v18, %v876_v62 }
 0x4c1   :  { %1802 = vmatprep.mubr.f32.mxu0 %v961_v61 }
 0x4c2   :  { %1803 = vmatmul.mubr.f32.gmra.mxu0 %v962_v63  ;;  %v903_v10 = vadd.f32 %v1452_v22, %v889_v5  ;;  %v1243_v5 = vld [vmem:[#allocation14 + $0x30] sm:$0xff] }
 0x4c3   :  { %v871_v1 = vpop.permute.xlu1 %870 }
 0x4c4   :  { %v888_v2 = vmul.f32 %v1451_v18, %v871_v1  ;;  %v1267_v18 = vld [vmem:[#allocation14 + $0xf0] sm:$0xff] }
 0x4c5   :  { %1282 = vmatpush1.msra.mxu0 %v1267_v18 }
 0x4c6   :  { %v902_v7 = vadd.f32 %v1452_v22, %v888_v2  ;;  %1283 = vmatprep.subr.mxu0 %v1266_v19  ;;  %v1263_v22 = vld [vmem:[#allocation14 + $0xd0] sm:$0xff] }
 0x4c7   :  { %1284 = vmatpush1.msra.mxu0 %v1265_v20 }
 0x4c8   :  { %v935_v8 = vpop.permute.xlu1 %934  ;;  %v955_v9 = vadd.f32 %v947_v6, %v902_v7  ;;  %1285 = vmatprep.subr.mxu0 %v1264_v21  ;;  %v1242_v6 = vld [vmem:[#allocation14 + $0x28] sm:$0xff]  ;;  %v1241_v7 = vld [vmem:[#allocation14 + $0x20] sm:$0xff] }
 0x4c9   :  { %v948_v11 = vmul.f32 %v1453_v23, %v935_v8  ;;  %v1262_v23 = vld [vmem:[#allocation14 + $0xc8] sm:$0xff]  ;;  %1286 = vmatpush1.msra.mxu0 %v1263_v22  ;;  %v1240_v8 = vld [vmem:[#allocation14 + $0x18] sm:$0xff] }
 0x4ca   :  { %v963_v12 = vmax.f32 %v955_v9, 0.0  ;;  %1287 = vmatprep.subr.mxu0 %v1262_v23  ;;  %v1239_v9 = vld [vmem:[#allocation14 + $0x10] sm:$0xff] }
 0x4cb   :  { %v956_v13 = vadd.f32 %v948_v11, %v903_v10  ;;  %1288 = vmatpush1.msra.mxu0 %v1261_v24  ;;  %v1238_v10 = vld [vmem:[#allocation14 + $0x8] sm:$0xff]  ;;  %v1237_v11 = vld [vmem:[#allocation14] sm:$0xff] }
 0x4cc   :  { %1805 = vmatprep.mubr.f32.mxu0 %v963_v12  ;;  %1289 = vmatprep.subr.mxu0 %v1260_v25  ;;  %v2114_v12 = vmov 0.0  }
 0x4cd   :  { %v964_v4 = vmax.f32 %v956_v13, 0.0  ;;  %1290 = vmatpush1.msra.mxu0 %v1259_v26 }
 0x4ce   :  { %1291 = vmatprep.subr.mxu0 %v1258_v27 }
 0x4cf   :  { %1806 = vmatmul.mubr.f32.gmra.mxu0 %v964_v4  ;;  %v1455_v4 = vld [vmem:[%s2407_s15] ss:$0 sm:$0xff]  ;;  %s2115_s15 = smov [#allocation17]  }
 0x4d0   :  { %1292 = vmatpush1.msra.mxu0 %v1257_v28  ;;  %1345 = vmatprep.mubr.f32.mxu0 %v2114_v12  ;;  %s1427_s8 = sshll.u32 %s2115_s15, 4  ;;  %s1428_s8 = int_to_ptr.vmem [resolvable:$true] %s1427_s8 }
 0x4d1   :  { %1293 = vmatprep.subr.mxu0 %v1256_v29  ;;  %s2044_s29 = scalar_lea.vmem %s1428_s8, 1024  ;;  %p2049_p13 = scmp.lt.s32.totalorder %s1428_s8, %s1428_s8 }
 0x4d2   :  { %1294 = vmatpush1.msra.mxu0 %v1255_v30  ;;  %p2045_p12 = scmp.ne.s32.totalorder %s1428_s8, %s2044_s29  ;;  %p2050_p0 = scmp.lt.s32.totalorder %s2044_s29, %s2044_s29 }
 0x4d3   :  { %1295 = vmatprep.subr.mxu0 %v1254_v31 }
 0x4d4   :  { %1296 = vmatpush1.msra.mxu0 %v1253_v32  ;;  %p2051_p1 = por %p2050_p0, %p2049_p13 }
 0x4d5   :  { %1297 = vmatprep.subr.mxu0 %v1252_v33 }
 0x4d6   :  { %1298 = vmatpush1.msra.mxu0 %v1251_v34  ;;  %p2052_p2 = pnand %p2051_p1, %p2045_p12 }
 0x4d7   :  { %1299 = vmatprep.subr.mxu0 %v1250_v35 }
 0x4d8   :  { %1300 = vmatpush1.msra.mxu0 %v1249_v36 }
 0x4d9   :  { %1301 = vmatprep.subr.mxu0 %v1248_v37 }
 0x4da   :  { %1302 = vmatpush1.msra.mxu0 %v1247_v38 }
 0x4db   :  { %1303 = vmatprep.subr.mxu0 %v1246_v39 }
 0x4dc   :  { %1304 = vmatpush1.msra.mxu0 %v1245_v40 }
 0x4dd   :  { %1305 = vmatprep.subr.mxu0 %v1244_v41 }
 0x4de   :  { %1306 = vmatpush1.msra.mxu0 %v1243_v5 }
 0x4df   :  { %1307 = vmatprep.subr.mxu0 %v1242_v6 }
 0x4e0   :  { %1308 = vmatpush1.msra.mxu0 %v1241_v7 }
 0x4e1   :  { %1309 = vmatprep.subr.mxu0 %v1240_v8 }
 0x4e2   :  { %1310 = vmatpush1.msra.mxu0 %v1239_v9 }
 0x4e3   :  { %1311 = vmatprep.subr.mxu0 %v1238_v10 }
 0x4e4   :  { %1312 = vmatpush1.msra.mxu0 %v1237_v11 }
 0x56c   :  { %v1798_v43 = vpop.f32.mrf.mxu0 }
 0x56d   :  { %v1060_v44 = vadd.f32 %v1798_v43, %v1454_v42 }
 0x56e   :  { %v1054_v45 = vpop.f32.mrf.mxu0 }
 0x56f   :  { %v1055_v46 = vadd.f32 %v1454_v42, %v1054_v45  ;;  %v1094_v48 = vmax.f32 %v1060_v44, 0.0 }
 0x571   :  { %v1093_v47 = vmax.f32 %v1055_v46, 0.0 }
 0x573   :  { %1840 = vmatprep.mubr.f32.mxu1 %v1093_v47 }
 0x574   :  { %1841 = vmatmul.mubr.f32.vlgmr.msra.gmra.mxu1 %v1094_v48 }
 0x57b   :  { %v1801_v49 = vpop.f32.mrf.mxu0 }
 0x57c   :  { %v1070_v50 = vadd.f32 %v1801_v49, %v1454_v42 }
 0x57d   :  { %v1064_v51 = vpop.f32.mrf.mxu0 }
 0x57e   :  { %v1065_v52 = vadd.f32 %v1454_v42, %v1064_v51  ;;  %v1096_v54 = vmax.f32 %v1070_v50, 0.0 }
 0x580   :  { %v1095_v53 = vmax.f32 %v1065_v52, 0.0 }
 0x582   :  { %v1804_v55 = vpop.f32.mrf.mxu0  ;;  %1843 = vmatprep.mubr.f32.mxu1 %v1095_v53 }
 0x583   :  { %1844 = vmatmul.mubr.f32.gmra.mxu1 %v1096_v54  ;;  %v1080_v56 = vadd.f32 %v1804_v55, %v1454_v42 }
 0x584   :  { %v1074_v57 = vpop.f32.mrf.mxu0 }
 0x585   :  { %v1075_v58 = vadd.f32 %v1454_v42, %v1074_v57  ;;  %v1098_v60 = vmax.f32 %v1080_v56, 0.0 }
 0x587   :  { %v1097_v59 = vmax.f32 %v1075_v58, 0.0 }
 0x589   :  { %1846 = vmatprep.mubr.f32.mxu1 %v1097_v59 }
 0x58a   :  { %1847 = vmatmul.mubr.f32.gmra.mxu1 %v1098_v60 }
 0x58f   :  { %v1807_v61 = vpop.f32.mrf.mxu0 }
 0x590   :  { %v1090_v62 = vadd.f32 %v1807_v61, %v1454_v42 }
 0x591   :  { %v1084_v63 = vpop.f32.mrf.mxu0 }
 0x592   :  { %v1085_v0 = vadd.f32 %v1454_v42, %v1084_v63  ;;  %v1100_v2 = vmax.f32 %v1090_v62, 0.0 }
 0x594   :  { %v1099_v1 = vmax.f32 %v1085_v0, 0.0 }
 0x596   :  { %1849 = vmatprep.mubr.f32.mxu1 %v1099_v1 }
 0x597   :  { %1850 = vmatmul.mubr.f32.gmra.mxu1 %v1100_v2 }
 0x634   :  { %v1842_v13 = vpop.f32.mrf.mxu1 }
 0x635   :  { %v1196_v15 = vadd.f32 %v1842_v13, %v1455_v4 }
 0x636   :  { %v1190_v3 = vpop.f32.mrf.mxu1 }
 0x637   :  { %v1191_v14 = vadd.f32 %v1455_v4, %v1190_v3  ;;  %v1230_v17 = vmax.f32 %v1196_v15, 0.0 }
 0x639   :  { %v1229_v16 = vmax.f32 %v1191_v14, 0.0 }
 0x63b   :  { %1346 = vmatmul.mubr.f32.vlgmr.msra.gmra.mxu0 %v1229_v16 }
 0x63c   :  { %1351 = vmatprep.mubr.f32.mxu0 %v2114_v12 }
 0x63f   :  { %1352 = vmatmul.mubr.f32.gmra.mxu0 %v1230_v17 }
 0x640   :  { %1357 = vmatprep.mubr.f32.mxu0 %v2114_v12 }
 0x643   :  { %v1845_v18 = vpop.f32.mrf.mxu1 }
 0x644   :  { %v1206_v21 = vadd.f32 %v1845_v18, %v1455_v4 }
 0x645   :  { %v1200_v19 = vpop.f32.mrf.mxu1 }
 0x646   :  { %v1201_v20 = vadd.f32 %v1455_v4, %v1200_v19  ;;  %v1232_v24 = vmax.f32 %v1206_v21, 0.0 }
 0x648   :  { %v1231_v22 = vmax.f32 %v1201_v20, 0.0 }
 0x64a   :  { %v1848_v23 = vpop.f32.mrf.mxu1  ;;  %1358 = vmatmul.mubr.f32.gmra.mxu0 %v1231_v22 }
 0x64b   :  { %1363 = vmatprep.mubr.f32.mxu0 %v2114_v12  ;;  %v1216_v28 = vadd.f32 %v1848_v23, %v1455_v4 }
 0x64c   :  { %v1210_v25 = vpop.f32.mrf.mxu1 }
 0x64d   :  { %v1211_v26 = vadd.f32 %v1455_v4, %v1210_v25  ;;  %v1234_v29 = vmax.f32 %v1216_v28, 0.0 }
 0x64e   :  { %1364 = vmatmul.mubr.f32.gmra.mxu0 %v1232_v24 }
 0x64f   :  { %v1233_v27 = vmax.f32 %v1211_v26, 0.0  ;;  %1369 = vmatprep.mubr.f32.mxu0 %v2114_v12 }
 0x652   :  { %1370 = vmatmul.mubr.f32.gmra.mxu0 %v1233_v27 }
 0x653   :  { %1375 = vmatprep.mubr.f32.mxu0 %v2114_v12 }
 0x656   :  { %1376 = vmatmul.mubr.f32.gmra.mxu0 %v1234_v29 }
 0x657   :  { %v1851_v30 = vpop.f32.mrf.mxu1  ;;  %1381 = vmatprep.mubr.f32.mxu0 %v2114_v12 }
 0x658   :  { %v1226_v33 = vadd.f32 %v1851_v30, %v1455_v4 }
 0x659   :  { %v1220_v31 = vpop.f32.mrf.mxu1 }
 0x65a   :  { %v1221_v32 = vadd.f32 %v1455_v4, %v1220_v31  ;;  %v1236_v35 = vmax.f32 %v1226_v33, 0.0 }
 0x65c   :  { %v1235_v34 = vmax.f32 %v1221_v32, 0.0 }
 0x65e   :  { %1382 = vmatmul.mubr.f32.gmra.mxu0 %v1235_v34 }
 0x65f   :  { %1387 = vmatprep.mubr.f32.mxu0 %v2114_v12 }
 0x662   :  { %1388 = vmatmul.mubr.f32.gmra.mxu0 %v1236_v35 }
 0x663   :  { %2055 = shalt.err (!%p2052_p2)
}
 0x664   :  { %1433 = dma.vmem_to_hbm [thread:$0]  %s1428_s8, 1024, %s2411_s19, [#allocation18], %s2099_s21, %s2099_s21, %s2100_s1   ;;  %v1271_v36 = vlaneseq }
 0x665   :  { %v1269_v39 = vld [vmem:[%s2409_s17] sm:$0x3]  ;;  %s2116_s17 = smov [#allocation16]  }
 0x666   :  { %v1272_v37 = vshrl.u32 %v1271_v36, 7  ;;  %s1415_s19 = sshll.u32 %s2116_s17, 4  ;;  %s1416_s19 = int_to_ptr.vmem [resolvable:$true] %s1415_s19 }
 0x667   :  { %s2064_s21 = scalar_lea.vmem %s1416_s19, 2048  ;;  %p2069_p4 = scmp.lt.s32.totalorder %s1416_s19, %s1416_s19 }
 0x668   :  { %v1273_v38 = vsub.s32 0, %v1272_v37  ;;  %v1277_v40 = vsub.s32 1, %v1272_v37  ;;  %p2065_p3 = scmp.ne.s32.totalorder %s1416_s19, %s2064_s21  ;;  %p2070_p5 = scmp.lt.s32.totalorder %s2064_s21, %s2064_s21 }
 0x66a   :  { %v1274_v41 = vrot.slane %v1269_v39, %v1273_v38  ;;  %v1278_v42 = vrot.slane %v1269_v39, %v1277_v40  ;;  %p2071_p6 = por %p2070_p5, %p2069_p4 }
 0x66c   :  { %p2072_p7 = pnand %p2071_p6, %p2065_p3 }
 0x6fb   :  { %v1347_v43 = vpop.f32.mrf.mxu0 }
 0x6fc   :  { %v1348_v44 = vadd.f32 %v1347_v43, %v1274_v41 }
 0x6fd   :  { %v1349_v45 = vpop.f32.mrf.mxu0 }
 0x6fe   :  { %1394 = vst [vmem:[#allocation16] sm:$0xff] %v1348_v44  ;;  %v1350_v46 = vadd.f32 %v1349_v45, %v1278_v42 }
 0x6ff   :  { %v1353_v47 = vpop.f32.mrf.mxu0 }
 0x700   :  { %1395 = vst [vmem:[#allocation16 + $0x8] sm:$0xff] %v1350_v46  ;;  %v1354_v48 = vadd.f32 %v1353_v47, %v1274_v41 }
 0x701   :  { %v1355_v49 = vpop.f32.mrf.mxu0 }
 0x702   :  { %1396 = vst [vmem:[#allocation16 + $0x10] sm:$0xff] %v1354_v48  ;;  %v1356_v50 = vadd.f32 %v1355_v49, %v1278_v42 }
 0x704   :  { %1397 = vst [vmem:[#allocation16 + $0x18] sm:$0xff] %v1356_v50 }
 0x70a   :  { %v1359_v51 = vpop.f32.mrf.mxu0 }
 0x70b   :  { %v1360_v52 = vadd.f32 %v1359_v51, %v1274_v41 }
 0x70c   :  { %v1361_v53 = vpop.f32.mrf.mxu0 }
 0x70d   :  { %1398 = vst [vmem:[#allocation16 + $0x20] sm:$0xff] %v1360_v52  ;;  %v1362_v54 = vadd.f32 %v1361_v53, %v1278_v42 }
 0x70e   :  { %v1365_v55 = vpop.f32.mrf.mxu0 }
 0x70f   :  { %1399 = vst [vmem:[#allocation16 + $0x28] sm:$0xff] %v1362_v54  ;;  %v1366_v56 = vadd.f32 %v1365_v55, %v1274_v41 }
 0x710   :  { %v1367_v57 = vpop.f32.mrf.mxu0 }
 0x711   :  { %1400 = vst [vmem:[#allocation16 + $0x30] sm:$0xff] %v1366_v56  ;;  %v1368_v58 = vadd.f32 %v1367_v57, %v1278_v42 }
 0x712   :  { %v1371_v59 = vpop.f32.mrf.mxu0 }
 0x713   :  { %1401 = vst [vmem:[#allocation16 + $0x38] sm:$0xff] %v1368_v58  ;;  %v1372_v60 = vadd.f32 %v1371_v59, %v1274_v41 }
 0x714   :  { %v1373_v61 = vpop.f32.mrf.mxu0 }
 0x715   :  { %1402 = vst [vmem:[#allocation16 + $0x40] sm:$0xff] %v1372_v60  ;;  %v1374_v62 = vadd.f32 %v1373_v61, %v1278_v42 }
 0x716   :  { %v1377_v63 = vpop.f32.mrf.mxu0 }
 0x717   :  { %1403 = vst [vmem:[#allocation16 + $0x48] sm:$0xff] %v1374_v62  ;;  %v1378_v0 = vadd.f32 %v1377_v63, %v1274_v41 }
 0x718   :  { %v1379_v1 = vpop.f32.mrf.mxu0 }
 0x719   :  { %1404 = vst [vmem:[#allocation16 + $0x50] sm:$0xff] %v1378_v0  ;;  %v1380_v2 = vadd.f32 %v1379_v1, %v1278_v42 }
 0x71b   :  { %1405 = vst [vmem:[#allocation16 + $0x58] sm:$0xff] %v1380_v2 }
 0x71e   :  { %v1383_v5 = vpop.f32.mrf.mxu0 }
 0x71f   :  { %v1384_v6 = vadd.f32 %v1383_v5, %v1274_v41 }
 0x720   :  { %v1385_v7 = vpop.f32.mrf.mxu0 }
 0x721   :  { %1406 = vst [vmem:[#allocation16 + $0x60] sm:$0xff] %v1384_v6  ;;  %v1386_v8 = vadd.f32 %v1385_v7, %v1278_v42 }
 0x722   :  { %v1389_v9 = vpop.f32.mrf.mxu0 }
 0x723   :  { %1407 = vst [vmem:[#allocation16 + $0x68] sm:$0xff] %v1386_v8  ;;  %v1390_v10 = vadd.f32 %v1389_v9, %v1274_v41 }
 0x724   :  { %v1391_v11 = vpop.f32.mrf.mxu0 }
 0x725   :  { %1408 = vst [vmem:[#allocation16 + $0x70] sm:$0xff] %v1390_v10  ;;  %v1392_v12 = vadd.f32 %v1391_v11, %v1278_v42 }
 0x727   :  { %1409 = vst [vmem:[#allocation16 + $0x78] sm:$0xff] %v1392_v12 }
 0x728   :  { %2075 = shalt.err (!%p2072_p7)
}
 0x729   :  { %1421 = dma.vmem_to_hbm [thread:$0]  %s1416_s19, 2048, %s2410_s18, [#allocation4], %s2104_s6, %s2104_s6, %s2105_s24  }
 0x72a   :  { %2094 = dma.done.wait [#allocation4], 2048  }
 0x72b   :  { %2095 = vsyncadd [#allocation4], 4294965248 }
 0x72c   :  { %2096 = dma.done.wait [#allocation18], 1024  }
 0x72d   :  { %2097 = vsyncadd [#allocation18], 4294966272 }
 0x72e   :  { %1440 = vsyncpa [#allocation3], 1 }
 0x72f   :  { %1441 = vsyncpa [#allocation6], 1 }
 0x730   :  { %1442 = vsyncpa [#allocation9], 1 }
 0x731   :  { %1443 = vsyncpa [#allocation12], 1 }
 0x732   :  { %1444 = vsyncpa [#allocation15], 1 }
 0x733   :  { %1445 = vsyncpa [#allocation4], 1 }
 0x734   :  { %1446 = vsyncpa [#allocation18], 1 }

// kernel: tpu_custom_call.1
= control target key start
LH: loop header
LB: loop body
LE: loop exit
PB: predicated region body
PF: predicated region fallthrough
CT: control target
= control target key end

     0   :  { %s2392_s0 = inlined_call_operand.hbm [shape: f32[64,256], index: 0, kind: input, shape index: {}]   ;;  %s2393_s1 = inlined_call_operand.vmem [shape: f32[64,2], index: 1, kind: input, shape index: {}]   ;;  %s2394_s2 = inlined_call_operand.hbm [shape: f32[256,128], index: 2, kind: input, shape index: {}]   ;;  %s2395_s3 = inlined_call_operand.vmem [shape: f32[1,128], index: 3, kind: input, shape index: {}]   ;;  %s2396_s4 = inlined_call_operand.hbm [shape: f32[128,128], index: 4, kind: input, shape index: {}]   ;;  %s2397_s5 = inlined_call_operand.vmem [shape: f32[1,128], index: 5, kind: input, shape index: {}]   ;;  %s2398_s6 = inlined_call_operand.hbm [shape: f32[128,128], index: 6, kind: input, shape index: {}]   ;;  %s2399_s7 = inlined_call_operand.vmem [shape: f32[1,128], index: 7, kind: input, shape index: {}]   ;;  %s2400_s8 = inlined_call_operand.hbm [shape: f32[128,128], index: 8, kind: input, shape index: {}]   ;;  %s2401_s9 = inlined_call_operand.vmem [shape: f32[1,128], index: 9, kind: input, shape index: {}]   ;;  %s2402_s10 = inlined_call_operand.vmem [shape: f32[2,128], index: 10, kind: input, shape index: {}]   ;;  %s2403_s11 = inlined_call_operand.vmem [shape: f32[1,128], index: 11, kind: input, shape index: {}]   ;;  %s2404_s12 = inlined_call_operand.hbm [shape: f32[128,128], index: 12, kind: input, shape index: {}]   ;;  %s2405_s13 = inlined_call_operand.vmem [shape: f32[1,128], index: 13, kind: input, shape index: {}]   ;;  %s2406_s14 = inlined_call_operand.hbm [shape: f32[128,128], index: 14, kind: input, shape index: {}]   ;;  %s2407_s15 = inlined_call_operand.vmem [shape: f32[1,128], index: 15, kind: input, shape index: {}]   ;;  %s2408_s16 = inlined_call_operand.hbm [shape: f32[128,256], index: 16, kind: input, shape index: {}]   ;;  %s2409_s17 = inlined_call_operand.vmem [shape: f32[1,256], index: 17, kind: input, shape index: {}]   ;;  %s2410_s18 = inlined_call_operand.hbm [shape: f32[64,256], index: 18, kind: output, shape index: {0}]   ;;  %s2411_s19 = inlined_call_operand.hbm [shape: f32[64,128], index: 19, kind: output, shape index: {1}]  }
   0x1   :  { %2413 = sst [smem:[#allocation26_spill]] %s2392_s0 }
   0x2   :  { %2414 = sst [smem:[#allocation27_spill]] %s2393_s1 }
   0x3   :  { %2415 = sst [smem:[#allocation28_spill]] %s2394_s2 }
   0x4   :  { %2416 = sst [smem:[#allocation29_spill]] %s2395_s3 }
   0x5   :  { %25 = vsyncpa [#allocation3], 0 }
   0x6   :  { %26 = vsyncpa [#allocation6], 0 }
   0x7   :  { %27 = vsyncpa [#allocation9], 0 }
   0x8   :  { %28 = vsyncpa [#allocation12], 0 }
   0x9   :  { %29 = vsyncpa [#allocation15], 0 }
   0xa   :  { %30 = vsyncpa [#allocation4], 0 }
   0xb   :  { %31 = vsyncpa [#allocation18], 0  ;;  %s2098_s0 = smov [#allocation5]  }
   0xc   :  { %s51_s30 = sshll.u32 %s2098_s0, 4  ;;  %s52_s30 = int_to_ptr.vmem [resolvable:$true] %s51_s30 }
   0xd   :  { %s1892_s20 = scalar_lea.vmem %s52_s30, 4096  ;;  %p1897_p1 = scmp.lt.s32.totalorder %s52_s30, %s52_s30 }
   0xe   :  { %p1893_p0 = scmp.ne.s32.totalorder %s52_s30, %s1892_s20  ;;  %p1898_p2 = scmp.lt.s32.totalorder %s1892_s20, %s1892_s20 }
  0x10   :  { %p1899_p3 = por %p1898_p2, %p1897_p1 }
  0x12   :  { %p1900_p4 = pnand %p1899_p3, %p1893_p0 }
  0x14   :  { %1903 = shalt.err (!%p1900_p4)
}
  0x15   :  { %s2099_s21 = smov 128   ;;  %s2100_s1 = smov 8  }
  0x16   :  { %s2417_s23 = sld [smem:[#allocation28_spill]]  ;;  %s2101_s24 = smov [#allocation8]  }
  0x17   :  { %s79_s25 = sshll.u32 %s2101_s24, 4  ;;  %s2102_s3 = smov [#allocation11]   ;;  %s80_s25 = int_to_ptr.vmem [resolvable:$true] %s79_s25 }
  0x18   :  { %s111_s26 = sshll.u32 %s2102_s3, 4  ;;  %s1912_s27 = scalar_lea.vmem %s80_s25, 2048  ;;  %s112_s26 = int_to_ptr.vmem [resolvable:$true] %s111_s26 }
  0x19   :  { %p1913_p5 = scmp.ne.s32.totalorder %s80_s25, %s1912_s27  ;;  %p1917_p6 = scmp.lt.s32.totalorder %s80_s25, %s80_s25 }
  0x1a   :  { %p1918_p7 = scmp.lt.s32.totalorder %s1912_s27, %s1912_s27 }
  0x1c   :  { %57 = dma.hbm_to_vmem [thread:$0]  %s2417_s23, 4096, %s52_s30, [#allocation6], %s2099_s21, %s2099_s21, %s2100_s1  }
  0x1d   :  { %p1919_p8 = por %p1918_p7, %p1917_p6 }
  0x1f   :  { %p1920_p9 = pnand %p1919_p8, %p1913_p5 }
  0x21   :  { %1923 = shalt.err (!%p1920_p9)
}
  0x22   :  { %85 = dma.hbm_to_vmem [thread:$0]  %s2398_s6, 2048, %s80_s25, [#allocation9], %s2099_s21, %s2099_s21, %s2100_s1  }
  0x23   :  { %s1932_s0 = scalar_lea.vmem %s112_s26, 2048  ;;  %p1937_p11 = scmp.lt.s32.totalorder %s112_s26, %s112_s26 }
  0x24   :  { %p1933_p10 = scmp.ne.s32.totalorder %s112_s26, %s1932_s0  ;;  %p1938_p12 = scmp.lt.s32.totalorder %s1932_s0, %s1932_s0 }
  0x26   :  { %p1939_p13 = por %p1938_p12, %p1937_p11 }
  0x28   :  { %p1940_p0 = pnand %p1939_p13, %p1933_p10 }
  0x2a   :  { %1943 = shalt.err (!%p1940_p0)
}
  0x2b   :  { %117 = dma.hbm_to_vmem [thread:$0]  %s2404_s12, 2048, %s112_s26, [#allocation12], %s2099_s21, %s2099_s21, %s2100_s1  }
  0x2c   :  { %s2103_s22 = smov [#allocation2]  }
  0x2d   :  { %s37_s2 = sshll.u32 %s2103_s22, 4  ;;  %s38_s2 = int_to_ptr.vmem [resolvable:$true] %s37_s2 }
  0x2e   :  { %s1952_s23 = scalar_lea.vmem %s38_s2, 2048  ;;  %p1957_p2 = scmp.lt.s32.totalorder %s38_s2, %s38_s2 }
  0x2f   :  { %p1953_p1 = scmp.ne.s32.totalorder %s38_s2, %s1952_s23  ;;  %p1958_p3 = scmp.lt.s32.totalorder %s1952_s23, %s1952_s23 }
  0x31   :  { %p1959_p4 = por %p1958_p3, %p1957_p2 }
  0x33   :  { %p1960_p5 = pnand %p1959_p4, %p1953_p1 }
  0x35   :  { %1963 = shalt.err (!%p1960_p5)
}
  0x36   :  { %s2104_s6 = smov 256   ;;  %s2105_s24 = smov 16  }
  0x37   :  { %s2418_s27 = sld [smem:[#allocation26_spill]]  ;;  %s2106_s12 = smov [#allocation7]  }
  0x38   :  { %s65_s26 = sshll.u32 %s2106_s12, 4  ;;  %s2107_s28 = smov [#allocation10]   ;;  %s66_s26 = int_to_ptr.vmem [resolvable:$true] %s65_s26 }
  0x39   :  { %s93_s29 = sshll.u32 %s2107_s28, 4  ;;  %s1972_s0 = scalar_lea.vmem %s66_s26, 2048  ;;  %s94_s29 = int_to_ptr.vmem [resolvable:$true] %s93_s29 }
  0x3a   :  { %p1973_p6 = scmp.ne.s32.totalorder %s66_s26, %s1972_s0  ;;  %p1977_p7 = scmp.lt.s32.totalorder %s66_s26, %s66_s26 }
  0x3b   :  { %p1978_p8 = scmp.lt.s32.totalorder %s1972_s0, %s1972_s0 }
  0x3d   :  { %43 = dma.hbm_to_vmem [thread:$0]  %s2418_s27, 2048, %s38_s2, [#allocation3], %s2104_s6, %s2104_s6, %s2105_s24  }
  0x3e   :  { %p1979_p9 = por %p1978_p8, %p1977_p7 }
  0x40   :  { %p1980_p10 = pnand %p1979_p9, %p1973_p6 }
  0x42   :  { %1983 = shalt.err (!%p1980_p10)
}
  0x43   :  { %71 = dma.hbm_to_vmem [thread:$0]  %s2396_s4, 2048, %s66_s26, [#allocation6], %s2099_s21, %s2099_s21, %s2100_s1  }
  0x44   :  { %s1992_s22 = scalar_lea.vmem %s94_s29, 2048  ;;  %p1997_p12 = scmp.lt.s32.totalorder %s94_s29, %s94_s29 }
  0x45   :  { %p1993_p11 = scmp.ne.s32.totalorder %s94_s29, %s1992_s22  ;;  %p1998_p13 = scmp.lt.s32.totalorder %s1992_s22, %s1992_s22 }
  0x47   :  { %p1999_p0 = por %p1998_p13, %p1997_p12 }
  0x49   :  { %p2000_p1 = pnand %p1999_p0, %p1993_p11 }
  0x4b   :  { %2003 = shalt.err (!%p2000_p1)
}
  0x4c   :  { %99 = dma.hbm_to_vmem [thread:$0]  %s2400_s8, 2048, %s94_s29, [#allocation9], %s2099_s21, %s2099_s21, %s2100_s1  }
  0x4d   :  { %s2108_s25 = smov [#allocation13]   ;;  %s2109_s27 = smov [#allocation14]  }
  0x4e   :  { %s125_s3 = sshll.u32 %s2108_s25, 4  ;;  %s139_s12 = sshll.u32 %s2109_s27, 4  ;;  %s126_s3 = int_to_ptr.vmem [resolvable:$true] %s125_s3  ;;  %s140_s12 = int_to_ptr.vmem [resolvable:$true] %s139_s12 }
  0x4f   :  { %s2012_s4 = scalar_lea.vmem %s126_s3, 2048  ;;  %p2017_p3 = scmp.lt.s32.totalorder %s126_s3, %s126_s3 }
  0x50   :  { %p2013_p2 = scmp.ne.s32.totalorder %s126_s3, %s2012_s4  ;;  %p2018_p4 = scmp.lt.s32.totalorder %s2012_s4, %s2012_s4 }
  0x52   :  { %p2019_p5 = por %p2018_p4, %p2017_p3 }
  0x54   :  { %p2020_p6 = pnand %p2019_p5, %p2013_p2 }
  0x56   :  { %2023 = shalt.err (!%p2020_p6)
}
  0x57   :  { %131 = dma.hbm_to_vmem [thread:$0]  %s2406_s14, 2048, %s126_s3, [#allocation12], %s2099_s21, %s2099_s21, %s2100_s1  }
  0x58   :  { %s2032_s8 = scalar_lea.vmem %s140_s12, 4096  ;;  %p2037_p8 = scmp.lt.s32.totalorder %s140_s12, %s140_s12 }
  0x59   :  { %p2033_p7 = scmp.ne.s32.totalorder %s140_s12, %s2032_s8  ;;  %p2038_p9 = scmp.lt.s32.totalorder %s2032_s8, %s2032_s8 }
  0x5b   :  { %p2039_p10 = por %p2038_p9, %p2037_p8 }
  0x5d   :  { %p2040_p11 = pnand %p2039_p10, %p2033_p7 }
  0x5f   :  { %2043 = shalt.err (!%p2040_p11)
}
  0x60   :  { %145 = dma.hbm_to_vmem [thread:$0]  %s2408_s16, 4096, %s140_s12, [#allocation15], %s2104_s6, %s2104_s6, %s2105_s24  }
  0x61   :  { %2084 = dma.done.wait [#allocation3], 2048  }
  0x62   :  { %2085 = vsyncadd [#allocation3], 4294965248 }
  0x63   :  { %2086 = dma.done.wait [#allocation6], 6144  }
  0x64   :  { %2087 = vsyncadd [#allocation6], 4294961152 }
  0x65   :  { %2088 = dma.done.wait [#allocation9], 4096  }
  0x66   :  { %2089 = vsyncadd [#allocation9], 4294963200 }
  0x67   :  { %2090 = dma.done.wait [#allocation12], 4096  }
  0x68   :  { %2091 = vsyncadd [#allocation12], 4294963200 }
  0x69   :  { %2092 = dma.done.wait [#allocation15], 4096  }
  0x6a   :  { %2093 = vsyncadd [#allocation15], 4294963200  ;;  %v219_v0 = vld [vmem:[#allocation5 + $0xf8] sm:$0xff]  ;;  %v218_v2 = vld [vmem:[#allocation5 + $0xf0] sm:$0xff]  ;;  %s2419_s30 = sld [smem:[#allocation29_spill]]  ;;  %s2110_s27 = smov 2  }
  0x6b   :  { %v203_v1 = vld [vmem:[#allocation5 + $0x78] sm:$0xff]  ;;  %1456 = vmatprep.subr.mxu1 %v219_v0  ;;  %v202_v3 = vld [vmem:[#allocation5 + $0x70] sm:$0xff]  ;;  %v217_v4 = vld [vmem:[#allocation5 + $0xe8] sm:$0xff]  ;;  %s2420_s23 = sld [smem:[#allocation27_spill]]  ;;  %s2113_s25 = smov 126  }
  0x6c   :  { %1457 = vmatpush3.msra.mxu1 %v203_v1  ;;  %v201_v5 = vld [vmem:[#allocation5 + $0x68] sm:$0xff]  ;;  %v216_v6 = vld [vmem:[#allocation5 + $0xe0] sm:$0xff]  ;;  %v215_v8 = vld [vmem:[#allocation5 + $0xd8] sm:$0xff] }
  0x6d   :  { %1458 = vmatprep.subr.mxu1 %v218_v2  ;;  %v200_v7 = vld [vmem:[#allocation5 + $0x60] sm:$0xff]  ;;  %v199_v9 = vld [vmem:[#allocation5 + $0x58] sm:$0xff]  ;;  %v214_v10 = vld [vmem:[#allocation5 + $0xd0] sm:$0xff] }
  0x6e   :  { %1459 = vmatpush3.msra.mxu1 %v202_v3  ;;  %v198_v11 = vld [vmem:[#allocation5 + $0x50] sm:$0xff]  ;;  %v213_v12 = vld [vmem:[#allocation5 + $0xc8] sm:$0xff]  ;;  %v212_v15 = vld [vmem:[#allocation5 + $0xc0] sm:$0xff] }
  0x6f   :  { %1460 = vmatprep.subr.mxu1 %v217_v4  ;;  %v173_v13 = vld [vmem:[#allocation2 + $0x8] sm:$0xff]  ;;  %v196_v16 = vld [vmem:[#allocation5 + $0x40] sm:$0xff]  ;;  %v211_v17 = vld [vmem:[#allocation5 + $0xb8] sm:$0xff] }
  0x70   :  { %1461 = vmatpush3.msra.mxu1 %v201_v5  ;;  %v197_v14 = vld [vmem:[#allocation5 + $0x48] sm:$0xff]  ;;  %291 = vmatprep.mubr.f32.mxu1 %v173_v13  ;;  %v195_v18 = vld [vmem:[#allocation5 + $0x38] sm:$0xff]  ;;  %v210_v19 = vld [vmem:[#allocation5 + $0xb0] sm:$0xff] }
  0x71   :  { %1462 = vmatprep.subr.mxu1 %v216_v6  ;;  %v194_v20 = vld [vmem:[#allocation5 + $0x30] sm:$0xff]  ;;  %v209_v21 = vld [vmem:[#allocation5 + $0xa8] sm:$0xff]  ;;  %v208_v23 = vld [vmem:[#allocation5 + $0xa0] sm:$0xff] }
  0x72   :  { %1463 = vmatpush3.msra.mxu1 %v200_v7  ;;  %v193_v22 = vld [vmem:[#allocation5 + $0x28] sm:$0xff]  ;;  %v192_v24 = vld [vmem:[#allocation5 + $0x20] sm:$0xff]  ;;  %v207_v25 = vld [vmem:[#allocation5 + $0x98] sm:$0xff] }
  0x73   :  { %1464 = vmatprep.subr.mxu1 %v215_v8  ;;  %v191_v26 = vld [vmem:[#allocation5 + $0x18] sm:$0xff]  ;;  %v206_v27 = vld [vmem:[#allocation5 + $0x90] sm:$0xff]  ;;  %v205_v29 = vld [vmem:[#allocation5 + $0x88] sm:$0xff] }
  0x74   :  { %1465 = vmatpush3.msra.mxu1 %v199_v9  ;;  %v190_v28 = vld [vmem:[#allocation5 + $0x10] sm:$0xff]  ;;  %v189_v30 = vld [vmem:[#allocation5 + $0x8] sm:$0xff]  ;;  %v204_v31 = vld [vmem:[#allocation5 + $0x80] sm:$0xff] }
  0x75   :  { %1466 = vmatprep.subr.mxu1 %v214_v10  ;;  %v188_v32 = vld [vmem:[#allocation5] sm:$0xff]  ;;  %v355_v34 = vld [vmem:[#allocation7 + $0x78] sm:$0xff]  ;;  %v354_v36 = vld [vmem:[#allocation7 + $0x70] sm:$0xff] }
  0x76   :  { %1467 = vmatpush3.msra.mxu1 %v198_v11  ;;  %v172_v33 = vld [vmem:[#allocation2] sm:$0xff]  ;;  %v175_v35 = vld [vmem:[#allocation2 + $0x18] sm:$0xff]  ;;  %v174_v37 = vld [vmem:[#allocation2 + $0x10] sm:$0xff] }
  0x77   :  { %1468 = vmatprep.subr.mxu1 %v213_v12  ;;  %v353_v38 = vld [vmem:[#allocation7 + $0x68] sm:$0xff]  ;;  %v352_v40 = vld [vmem:[#allocation7 + $0x60] sm:$0xff]  ;;  %v351_v42 = vld [vmem:[#allocation7 + $0x58] sm:$0xff] }
  0x78   :  { %1469 = vmatpush3.msra.mxu1 %v197_v14  ;;  %v177_v39 = vld [vmem:[#allocation2 + $0x28] sm:$0xff]  ;;  %v176_v41 = vld [vmem:[#allocation2 + $0x20] sm:$0xff]  ;;  %v179_v43 = vld [vmem:[#allocation2 + $0x38] sm:$0xff] }
  0x79   :  { %1470 = vmatprep.subr.mxu1 %v212_v15  ;;  %v350_v44 = vld [vmem:[#allocation7 + $0x50] sm:$0xff]  ;;  %v349_v46 = vld [vmem:[#allocation7 + $0x48] sm:$0xff]  ;;  %v348_v48 = vld [vmem:[#allocation7 + $0x40] sm:$0xff] }
  0x7a   :  { %1471 = vmatpush3.msra.mxu1 %v196_v16  ;;  %v178_v45 = vld [vmem:[#allocation2 + $0x30] sm:$0xff]  ;;  %v181_v47 = vld [vmem:[#allocation2 + $0x48] sm:$0xff]  ;;  %v180_v49 = vld [vmem:[#allocation2 + $0x40] sm:$0xff] }
  0x7b   :  { %1472 = vmatprep.subr.mxu1 %v211_v17  ;;  %v347_v50 = vld [vmem:[#allocation7 + $0x38] sm:$0xff]  ;;  %v346_v52 = vld [vmem:[#allocation7 + $0x30] sm:$0xff]  ;;  %v185_v54 = vld [vmem:[#allocation2 + $0x68] sm:$0xff] }
  0x7c   :  { %1473 = vmatpush3.msra.mxu1 %v195_v18  ;;  %v183_v51 = vld [vmem:[#allocation2 + $0x58] sm:$0xff]  ;;  %v182_v53 = vld [vmem:[#allocation2 + $0x50] sm:$0xff]  ;;  %v184_v55 = vld [vmem:[#allocation2 + $0x60] sm:$0xff] }
  0x7d   :  { %1474 = vmatprep.subr.mxu1 %v210_v19  ;;  %v187_v56 = vld [vmem:[#allocation2 + $0x78] sm:$0xff]  ;;  %v186_v57 = vld [vmem:[#allocation2 + $0x70] sm:$0xff]  ;;  %v345_v58 = vld [vmem:[#allocation7 + $0x28] sm:$0xff] }
  0x7e   :  { %1475 = vmatpush3.msra.mxu1 %v194_v20  ;;  %v344_v59 = vld [vmem:[#allocation7 + $0x20] sm:$0xff]  ;;  %v343_v60 = vld [vmem:[#allocation7 + $0x18] sm:$0xff]  ;;  %v342_v61 = vld [vmem:[#allocation7 + $0x10] sm:$0xff] }
  0x7f   :  { %1476 = vmatprep.subr.mxu1 %v209_v21  ;;  %v341_v62 = vld [vmem:[#allocation7 + $0x8] sm:$0xff]  ;;  %v340_v63 = vld [vmem:[#allocation7] sm:$0xff]  ;;  %v491_v0 = vld [vmem:[#allocation8 + $0x78] sm:$0xff] }
  0x80   :  { %1477 = vmatpush3.msra.mxu1 %v193_v22  ;;  %v490_v1 = vld [vmem:[#allocation8 + $0x70] sm:$0xff]  ;;  %1676 = vmatprep.subr.mxu0 %v491_v0  ;;  %v489_v2 = vld [vmem:[#allocation8 + $0x68] sm:$0xff]  ;;  %v488_v3 = vld [vmem:[#allocation8 + $0x60] sm:$0xff] }
  0x81   :  { %1478 = vmatprep.subr.mxu1 %v208_v23  ;;  %1677 = vmatpush3.msra.mxu0 %v491_v0  ;;  %v487_v4 = vld [vmem:[#allocation8 + $0x58] sm:$0xff]  ;;  %v486_v5 = vld [vmem:[#allocation8 + $0x50] sm:$0xff]  ;;  %v485_v6 = vld [vmem:[#allocation8 + $0x48] sm:$0xff] }
  0x82   :  { %1479 = vmatpush3.msra.mxu1 %v192_v24  ;;  %1678 = vmatprep.subr.mxu0 %v490_v1  ;;  %v484_v7 = vld [vmem:[#allocation8 + $0x40] sm:$0xff]  ;;  %v483_v8 = vld [vmem:[#allocation8 + $0x38] sm:$0xff]  ;;  %v482_v9 = vld [vmem:[#allocation8 + $0x30] sm:$0xff] }
  0x83   :  { %1480 = vmatprep.subr.mxu1 %v207_v25  ;;  %1679 = vmatpush3.msra.mxu0 %v490_v1  ;;  %v481_v10 = vld [vmem:[#allocation8 + $0x28] sm:$0xff]  ;;  %v480_v11 = vld [vmem:[#allocation8 + $0x20] sm:$0xff]  ;;  %v619_v1 = vld [vmem:[#allocation10 + $0x38] sm:$0xff] }
  0x84   :  { %1481 = vmatpush3.msra.mxu1 %v191_v26  ;;  %1680 = vmatprep.subr.mxu0 %v489_v2  ;;  %v1447_v13 = vld [vmem:[%s2419_s30] ss:$0 sm:$0xff] }
  0x85   :  { %1482 = vmatprep.subr.mxu1 %v206_v27  ;;  %1681 = vmatpush3.msra.mxu0 %v489_v2  ;;  %v620_v0 = vld [vmem:[#allocation10 + $0x40] sm:$0xff]  ;;  %v618_v2 = vld [vmem:[#allocation10 + $0x30] sm:$0xff] }
  0x86   :  { %1483 = vmatpush3.msra.mxu1 %v190_v28  ;;  %1682 = vmatprep.subr.mxu0 %v488_v3 }
  0x87   :  { %1484 = vmatprep.subr.mxu1 %v205_v29  ;;  %1683 = vmatpush3.msra.mxu0 %v488_v3  ;;  %v617_v3 = vld [vmem:[#allocation10 + $0x28] sm:$0xff] }
  0x88   :  { %1485 = vmatpush3.msra.mxu1 %v189_v30  ;;  %1684 = vmatprep.subr.mxu0 %v487_v4 }
  0x89   :  { %1486 = vmatprep.subr.mxu1 %v204_v31  ;;  %1685 = vmatpush3.msra.mxu0 %v487_v4  ;;  %v616_v4 = vld [vmem:[#allocation10 + $0x20] sm:$0xff] }
  0x8a   :  { %1487 = vmatpush3.msra.mxu1 %v188_v32  ;;  %1686 = vmatprep.subr.mxu0 %v486_v5 }
  0x8b   :  { %292 = vmatmul.mubr.f32.vlgmr.msra.gmra.mxu1 %v172_v33  ;;  %1632 = vmatprep.subr.mxu1 %v355_v34 }
  0x8c   :  { %296 = vmatprep.mubr.f32.mxu1 %v175_v35  ;;  %1633 = vmatpush3.msra.mxu1 %v355_v34 }
  0x8d   :  { %1634 = vmatprep.subr.mxu1 %v354_v36  ;;  %1687 = vmatpush3.msra.mxu0 %v486_v5  ;;  %v1448_v5 = vld [vmem:[%s2397_s5] ss:$0 sm:$0xff] }
  0x8e   :  { %1635 = vmatpush3.msra.mxu1 %v354_v36  ;;  %1688 = vmatprep.subr.mxu0 %v485_v6 }
  0x8f   :  { %297 = vmatmul.mubr.f32.gmra.mxu1 %v174_v37  ;;  %1636 = vmatprep.subr.mxu1 %v353_v38 }
  0x90   :  { %301 = vmatprep.mubr.f32.mxu1 %v177_v39  ;;  %1637 = vmatpush3.msra.mxu1 %v353_v38 }
  0x91   :  { %1638 = vmatprep.subr.mxu1 %v352_v40  ;;  %1689 = vmatpush3.msra.mxu0 %v485_v6 }
  0x92   :  { %1639 = vmatpush3.msra.mxu1 %v352_v40  ;;  %1690 = vmatprep.subr.mxu0 %v484_v7 }
  0x93   :  { %302 = vmatmul.mubr.f32.gmra.mxu1 %v176_v41  ;;  %1640 = vmatprep.subr.mxu1 %v351_v42 }
  0x94   :  { %306 = vmatprep.mubr.f32.mxu1 %v179_v43  ;;  %1641 = vmatpush3.msra.mxu1 %v351_v42 }
  0x95   :  { %1642 = vmatprep.subr.mxu1 %v350_v44  ;;  %1691 = vmatpush3.msra.mxu0 %v484_v7 }
  0x96   :  { %1643 = vmatpush3.msra.mxu1 %v350_v44  ;;  %1692 = vmatprep.subr.mxu0 %v483_v8 }
  0x97   :  { %307 = vmatmul.mubr.f32.gmra.mxu1 %v178_v45  ;;  %1644 = vmatprep.subr.mxu1 %v349_v46 }
  0x98   :  { %311 = vmatprep.mubr.f32.mxu1 %v181_v47  ;;  %1645 = vmatpush3.msra.mxu1 %v349_v46 }
  0x99   :  { %1646 = vmatprep.subr.mxu1 %v348_v48  ;;  %1693 = vmatpush3.msra.mxu0 %v483_v8 }
  0x9a   :  { %1647 = vmatpush3.msra.mxu1 %v348_v48  ;;  %1694 = vmatprep.subr.mxu0 %v482_v9 }
  0x9b   :  { %312 = vmatmul.mubr.f32.gmra.mxu1 %v180_v49  ;;  %1648 = vmatprep.subr.mxu1 %v347_v50 }
  0x9c   :  { %316 = vmatprep.mubr.f32.mxu1 %v183_v51  ;;  %1649 = vmatpush3.msra.mxu1 %v347_v50 }
  0x9d   :  { %1650 = vmatprep.subr.mxu1 %v346_v52  ;;  %1695 = vmatpush3.msra.mxu0 %v482_v9 }
  0x9e   :  { %1651 = vmatpush3.msra.mxu1 %v346_v52  ;;  %1696 = vmatprep.subr.mxu0 %v481_v10 }
  0x9f   :  { %317 = vmatmul.mubr.f32.gmra.mxu1 %v182_v53  ;;  %1652 = vmatprep.subr.mxu1 %v345_v58  ;;  %v479_v53 = vld [vmem:[#allocation8 + $0x18] sm:$0xff] }
  0xa0   :  { %321 = vmatprep.mubr.f32.mxu1 %v185_v54  ;;  %1653 = vmatpush3.msra.mxu1 %v345_v58  ;;  %v478_v54 = vld [vmem:[#allocation8 + $0x10] sm:$0xff] }
  0xa1   :  { %1654 = vmatprep.subr.mxu1 %v344_v59  ;;  %1697 = vmatpush3.msra.mxu0 %v481_v10  ;;  %v626_v58 = vld [vmem:[#allocation10 + $0x70] sm:$0xff] }
  0xa2   :  { %1655 = vmatpush3.msra.mxu1 %v344_v59  ;;  %1698 = vmatprep.subr.mxu0 %v480_v11  ;;  %v625_v59 = vld [vmem:[#allocation10 + $0x68] sm:$0xff] }
  0xa3   :  { %322 = vmatmul.mubr.f32.gmra.mxu1 %v184_v55  ;;  %1656 = vmatprep.subr.mxu1 %v343_v60  ;;  %v477_v55 = vld [vmem:[#allocation8 + $0x8] sm:$0xff] }
  0xa4   :  { %326 = vmatprep.mubr.f32.mxu1 %v187_v56  ;;  %1657 = vmatpush3.msra.mxu1 %v343_v60  ;;  %v476_v56 = vld [vmem:[#allocation8] sm:$0xff] }
  0xa5   :  { %1658 = vmatprep.subr.mxu1 %v342_v61  ;;  %1699 = vmatpush3.msra.mxu0 %v480_v11  ;;  %v624_v60 = vld [vmem:[#allocation10 + $0x60] sm:$0xff] }
  0xa6   :  { %1659 = vmatpush3.msra.mxu1 %v342_v61  ;;  %1700 = vmatprep.subr.mxu0 %v479_v53  ;;  %v623_v61 = vld [vmem:[#allocation10 + $0x58] sm:$0xff] }
  0xa7   :  { %327 = vmatmul.mubr.f32.gmra.mxu1 %v186_v57  ;;  %1660 = vmatprep.subr.mxu1 %v341_v62  ;;  %v627_v57 = vld [vmem:[#allocation10 + $0x78] sm:$0xff] }
  0xa8   :  { %1661 = vmatpush3.msra.mxu1 %v341_v62  ;;  %1701 = vmatpush3.msra.mxu0 %v479_v53  ;;  %v622_v62 = vld [vmem:[#allocation10 + $0x50] sm:$0xff] }
  0xa9   :  { %1662 = vmatprep.subr.mxu1 %v340_v63  ;;  %1702 = vmatprep.subr.mxu0 %v478_v54 }
  0xaa   :  { %1663 = vmatpush3.msra.mxu1 %v340_v63  ;;  %1703 = vmatpush3.msra.mxu0 %v478_v54  ;;  %v621_v63 = vld [vmem:[#allocation10 + $0x48] sm:$0xff] }
  0xab   :  { %1704 = vmatprep.subr.mxu0 %v477_v55  ;;  %1720 = vmatprep.subr.mxu1 %v627_v57 }
  0xac   :  { %1705 = vmatpush3.msra.mxu0 %v477_v55 }
  0xad   :  { %1706 = vmatprep.subr.mxu0 %v476_v56 }
  0xae   :  { %1707 = vmatpush3.msra.mxu0 %v476_v56 }
 0x14b   :  { %v1488_v12 = vpop.f32.mrf.mxu1 }
 0x14d   :  { %v1489_v14 = vpop.f32.mrf.mxu1 }
 0x14e   :  { %v1490_v15 = vadd.f32 %v1489_v14, %v1488_v12 }
 0x14f   :  { %v1491_v16 = vpop.f32.mrf.mxu1 }
 0x150   :  { %v294_v17 = vadd.f32 %v1490_v15, %v1447_v13 }
 0x151   :  { %v1492_v18 = vpop.f32.mrf.mxu1 }
 0x152   :  { %v332_v19 = vmax.f32 %v294_v17, 0.0  ;;  %v1493_v20 = vadd.f32 %v1492_v18, %v1491_v16 }
 0x153   :  { %v1494_v21 = vpop.f32.mrf.mxu1 }
 0x154   :  { %v299_v22 = vadd.f32 %v1493_v20, %v1447_v13  ;;  %1664 = vmatprep.mubr.f32.mxu1 %v332_v19 }
 0x155   :  { %v1495_v23 = vpop.f32.mrf.mxu1 }
 0x156   :  { %v333_v24 = vmax.f32 %v299_v22, 0.0  ;;  %v1496_v25 = vadd.f32 %v1495_v23, %v1494_v21 }
 0x157   :  { %v1497_v26 = vpop.f32.mrf.mxu1 }
 0x158   :  { %v304_v27 = vadd.f32 %v1496_v25, %v1447_v13  ;;  %1665 = vmatmul.mubr.f32.vlgmr.msra.gmra.mxu1 %v333_v24 }
 0x159   :  { %v1498_v28 = vpop.f32.mrf.mxu1  ;;  %1721 = vmatpush3.msra.mxu1 %v627_v57 }
 0x15a   :  { %v334_v29 = vmax.f32 %v304_v27, 0.0  ;;  %v1499_v30 = vadd.f32 %v1498_v28, %v1497_v26  ;;  %1722 = vmatprep.subr.mxu1 %v626_v58 }
 0x15b   :  { %v1500_v31 = vpop.f32.mrf.mxu1  ;;  %1723 = vmatpush3.msra.mxu1 %v626_v58 }
 0x15c   :  { %v309_v32 = vadd.f32 %v1499_v30, %v1447_v13  ;;  %1667 = vmatprep.mubr.f32.mxu1 %v334_v29  ;;  %1724 = vmatprep.subr.mxu1 %v625_v59  ;;  %v615_v30 = vld [vmem:[#allocation10 + $0x18] sm:$0xff] }
 0x15d   :  { %v1501_v33 = vpop.f32.mrf.mxu1  ;;  %1725 = vmatpush3.msra.mxu1 %v625_v59 }
 0x15e   :  { %v335_v34 = vmax.f32 %v309_v32, 0.0  ;;  %v1502_v35 = vadd.f32 %v1501_v33, %v1500_v31  ;;  %1726 = vmatprep.subr.mxu1 %v624_v60  ;;  %v614_v31 = vld [vmem:[#allocation10 + $0x10] sm:$0xff]  ;;  %v613_v32 = vld [vmem:[#allocation10 + $0x8] sm:$0xff]  ;;  %v612_v33 = vld [vmem:[#allocation10] sm:$0xff] }
 0x15f   :  { %v1503_v36 = vpop.f32.mrf.mxu1  ;;  %1727 = vmatpush3.msra.mxu1 %v624_v60 }
 0x160   :  { %v314_v37 = vadd.f32 %v1502_v35, %v1447_v13  ;;  %1668 = vmatmul.mubr.f32.gmra.mxu1 %v335_v34  ;;  %1728 = vmatprep.subr.mxu1 %v623_v61  ;;  %v748_v34 = vld [vmem:[%s2420_s23] sm:$0xff]  ;;  %v750_v35 = vld [vmem:[%s2420_s23 + $0x10] sm:$0xff] }
 0x161   :  { %v1504_v38 = vpop.f32.mrf.mxu1  ;;  %1729 = vmatpush3.msra.mxu1 %v623_v61  ;;  %764 = vrot.lane.b32.xlu0 %v748_v34, %s2110_s27 }
 0x162   :  { %v336_v39 = vmax.f32 %v314_v37, 0.0  ;;  %v1505_v40 = vadd.f32 %v1504_v38, %v1503_v36  ;;  %1730 = vmatprep.subr.mxu1 %v622_v62  ;;  %768 = vrot.lane.b32.xlu1 %v750_v35, %s2110_s27  ;;  %v749_v36 = vld [vmem:[%s2420_s23 + $0x8] sm:$0xff]  ;;  %v751_v37 = vld [vmem:[%s2420_s23 + $0x18] sm:$0xff] }
 0x163   :  { %v1506_v41 = vpop.f32.mrf.mxu1  ;;  %1731 = vmatpush3.msra.mxu1 %v622_v62  ;;  %v753_v38 = vld [vmem:[%s2420_s23 + $0x28] sm:$0xff] }
 0x164   :  { %v319_v42 = vadd.f32 %v1505_v40, %v1447_v13  ;;  %1670 = vmatprep.mubr.f32.mxu1 %v336_v39  ;;  %1732 = vmatprep.subr.mxu1 %v621_v63  ;;  %v752_v39 = vld [vmem:[%s2420_s23 + $0x20] sm:$0xff]  ;;  %v755_v40 = vld [vmem:[%s2420_s23 + $0x38] sm:$0xff] }
 0x165   :  { %v1507_v43 = vpop.f32.mrf.mxu1  ;;  %1733 = vmatpush3.msra.mxu1 %v621_v63  ;;  %766 = vrot.lane.b32.xlu0 %v749_v36, %s2110_s27 }
 0x166   :  { %v337_v44 = vmax.f32 %v319_v42, 0.0  ;;  %v1508_v45 = vadd.f32 %v1507_v43, %v1506_v41  ;;  %1734 = vmatprep.subr.mxu1 %v620_v0  ;;  %770 = vrot.lane.b32.xlu1 %v751_v37, %s2110_s27  ;;  %v754_v41 = vld [vmem:[%s2420_s23 + $0x30] sm:$0xff]  ;;  %v1449_v42 = vld [vmem:[%s2399_s7] ss:$0 sm:$0xff] }
 0x167   :  { %v1509_v46 = vpop.f32.mrf.mxu1  ;;  %1735 = vmatpush3.msra.mxu1 %v620_v0 }
 0x168   :  { %v324_v47 = vadd.f32 %v1508_v45, %v1447_v13  ;;  %1671 = vmatmul.mubr.f32.gmra.mxu1 %v337_v44  ;;  %1736 = vmatprep.subr.mxu1 %v619_v1 }
 0x169   :  { %v1510_v48 = vpop.f32.mrf.mxu1  ;;  %1737 = vmatpush3.msra.mxu1 %v619_v1  ;;  %772 = vrot.lane.b32.xlu0 %v752_v39, %s2110_s27  ;;  %v979_v39 = vld [vmem:[#allocation11 + $0x70] sm:$0xff] }
 0x16a   :  { %v338_v49 = vmax.f32 %v324_v47, 0.0  ;;  %v1511_v50 = vadd.f32 %v1510_v48, %v1509_v46  ;;  %1738 = vmatprep.subr.mxu1 %v618_v2  ;;  %774 = vrot.lane.b32.xlu1 %v753_v38, %s2110_s27  ;;  %v980_v38 = vld [vmem:[#allocation11 + $0x78] sm:$0xff] }
 0x16b   :  { %1739 = vmatpush3.msra.mxu1 %v618_v2  ;;  %1764 = vmatprep.subr.mxu0 %v980_v38 }
 0x16c   :  { %v329_v51 = vadd.f32 %v1511_v50, %v1447_v13  ;;  %1673 = vmatprep.mubr.f32.mxu1 %v338_v49  ;;  %1740 = vmatprep.subr.mxu1 %v617_v3 }
 0x16d   :  { %1741 = vmatpush3.msra.mxu1 %v617_v3  ;;  %776 = vrot.lane.b32.xlu0 %v754_v41, %s2110_s27  ;;  %v2111_v3 = vmov 1   ;;  %v977_v41 = vld [vmem:[#allocation11 + $0x60] sm:$0xff] }
 0x16e   :  { %v339_v52 = vmax.f32 %v329_v51, 0.0  ;;  %1742 = vmatprep.subr.mxu1 %v616_v4  ;;  %778 = vrot.lane.b32.xlu1 %v755_v40, %s2110_s27  ;;  %v978_v40 = vld [vmem:[#allocation11 + $0x68] sm:$0xff] }
 0x16f   :  { %1743 = vmatpush3.msra.mxu1 %v616_v4  ;;  %1872 = vset.pattern.permute.xlu0 %v2111_v3  ;;  %v2112_v4 = vmov 0  }
 0x170   :  { %1674 = vmatmul.mubr.f32.gmra.mxu1 %v339_v52  ;;  %1744 = vmatprep.subr.mxu1 %v615_v30 }
 0x171   :  { %1745 = vmatpush3.msra.mxu1 %v615_v30  ;;  %1871 = vset.pattern.permute.xlu1 %v2112_v4 }
 0x172   :  { %1746 = vmatprep.subr.mxu1 %v614_v31 }
 0x173   :  { %1747 = vmatpush3.msra.mxu1 %v614_v31 }
 0x174   :  { %1748 = vmatprep.subr.mxu1 %v613_v32 }
 0x175   :  { %1749 = vmatpush3.msra.mxu1 %v613_v32 }
 0x176   :  { %1750 = vmatprep.subr.mxu1 %v612_v33 }
 0x177   :  { %1751 = vmatpush3.msra.mxu1 %v612_v33 }
 0x218   :  { %v1666_v6 = vpop.f32.mrf.mxu1 }
 0x219   :  { %v435_v7 = vadd.f32 %v1666_v6, %v1448_v5  ;;  %v1450_v6 = vld [vmem:[%s2401_s9] ss:$0 sm:$0xff] }
 0x21a   :  { %v429_v8 = vpop.f32.mrf.mxu1 }
 0x21b   :  { %v430_v9 = vadd.f32 %v1448_v5, %v429_v8  ;;  %v469_v11 = vmax.f32 %v435_v7, 0.0 }
 0x21d   :  { %v468_v10 = vmax.f32 %v430_v9, 0.0 }
 0x21f   :  { %1708 = vmatprep.mubr.f32.mxu0 %v468_v10 }
 0x220   :  { %v1669_v12 = vpop.f32.mrf.mxu1  ;;  %1709 = vmatmul.mubr.f32.vlgmr.msra.gmra.mxu0 %v469_v11  ;;  %v769_v11 = vpop.permute.xlu1 %768 }
 0x221   :  { %v445_v13 = vadd.f32 %v1669_v12, %v1448_v5  ;;  %1765 = vmatpush3.msra.mxu0 %v980_v38 }
 0x222   :  { %v439_v14 = vpop.f32.mrf.mxu1  ;;  %1766 = vmatprep.subr.mxu0 %v979_v39 }
 0x223   :  { %v440_v15 = vadd.f32 %v1448_v5, %v439_v14  ;;  %v471_v17 = vmax.f32 %v445_v13, 0.0  ;;  %1767 = vmatpush3.msra.mxu0 %v979_v39 }
 0x224   :  { %1768 = vmatprep.subr.mxu0 %v978_v40 }
 0x225   :  { %v470_v16 = vmax.f32 %v440_v15, 0.0  ;;  %1769 = vmatpush3.msra.mxu0 %v978_v40 }
 0x226   :  { %1770 = vmatprep.subr.mxu0 %v977_v41 }
 0x227   :  { %1711 = vmatprep.mubr.f32.mxu0 %v470_v16  ;;  %v771_v16 = vpop.permute.xlu1 %770  ;;  %1771 = vmatpush3.msra.mxu0 %v977_v41 }
 0x228   :  { %v1672_v18 = vpop.f32.mrf.mxu1  ;;  %1712 = vmatmul.mubr.f32.gmra.mxu0 %v471_v17 }
 0x229   :  { %v455_v19 = vadd.f32 %v1672_v18, %v1448_v5 }
 0x22a   :  { %v449_v20 = vpop.f32.mrf.mxu1 }
 0x22b   :  { %v450_v21 = vadd.f32 %v1448_v5, %v449_v20  ;;  %v473_v22 = vmax.f32 %v455_v19, 0.0 }
 0x22d   :  { %v472_v23 = vmax.f32 %v450_v21, 0.0 }
 0x22f   :  { %1714 = vmatprep.mubr.f32.mxu0 %v472_v23  ;;  %v775_v23 = vpop.permute.xlu1 %774 }
 0x230   :  { %v1675_v24 = vpop.f32.mrf.mxu1  ;;  %1715 = vmatmul.mubr.f32.gmra.mxu0 %v473_v22 }
 0x231   :  { %v465_v25 = vadd.f32 %v1675_v24, %v1448_v5 }
 0x232   :  { %v459_v26 = vpop.f32.mrf.mxu1 }
 0x233   :  { %v460_v27 = vadd.f32 %v1448_v5, %v459_v26  ;;  %v475_v28 = vmax.f32 %v465_v25, 0.0  ;;  %v765_v5 = vpop.permute.xlu0 %764  ;;  %v779_v31 = vpop.permute.xlu1 %778 }
 0x235   :  { %v474_v29 = vmax.f32 %v460_v27, 0.0 }
 0x237   :  { %1717 = vmatprep.mubr.f32.mxu0 %v474_v29  ;;  %v767_v8 = vpop.permute.xlu0 %766 }
 0x238   :  { %1718 = vmatmul.mubr.f32.gmra.mxu0 %v475_v28 }
 0x23b   :  { %v773_v26 = vpop.permute.xlu0 %772 }
 0x23f   :  { %v777_v34 = vpop.permute.xlu0 %776 }
 0x2e0   :  { %v1710_v43 = vpop.f32.mrf.mxu0 }
 0x2e1   :  { %v571_v44 = vadd.f32 %v1710_v43, %v1449_v42  ;;  %v975_v43 = vld [vmem:[#allocation11 + $0x50] sm:$0xff] }
 0x2e2   :  { %v565_v45 = vpop.f32.mrf.mxu0 }
 0x2e3   :  { %v566_v46 = vadd.f32 %v1449_v42, %v565_v45  ;;  %v605_v48 = vmax.f32 %v571_v44, 0.0  ;;  %v974_v44 = vld [vmem:[#allocation11 + $0x48] sm:$0xff]  ;;  %v973_v45 = vld [vmem:[#allocation11 + $0x40] sm:$0xff] }
 0x2e5   :  { %v604_v47 = vmax.f32 %v566_v46, 0.0  ;;  %v972_v46 = vld [vmem:[#allocation11 + $0x38] sm:$0xff] }
 0x2e7   :  { %1752 = vmatprep.mubr.f32.mxu1 %v604_v47  ;;  %v971_v47 = vld [vmem:[#allocation11 + $0x30] sm:$0xff] }
 0x2e8   :  { %v1713_v49 = vpop.f32.mrf.mxu0  ;;  %1753 = vmatmul.mubr.f32.vlgmr.msra.gmra.mxu1 %v605_v48 }
 0x2e9   :  { %v581_v50 = vadd.f32 %v1713_v49, %v1449_v42  ;;  %v970_v49 = vld [vmem:[#allocation11 + $0x28] sm:$0xff] }
 0x2ea   :  { %v575_v51 = vpop.f32.mrf.mxu0 }
 0x2eb   :  { %v576_v52 = vadd.f32 %v1449_v42, %v575_v51  ;;  %v607_v54 = vmax.f32 %v581_v50, 0.0  ;;  %v969_v51 = vld [vmem:[#allocation11 + $0x20] sm:$0xff] }
 0x2ed   :  { %v606_v53 = vmax.f32 %v576_v52, 0.0 }
 0x2ef   :  { %1755 = vmatprep.mubr.f32.mxu1 %v606_v53  ;;  %v968_v53 = vld [vmem:[#allocation11 + $0x18] sm:$0xff] }
 0x2f0   :  { %v1716_v55 = vpop.f32.mrf.mxu0  ;;  %1756 = vmatmul.mubr.f32.gmra.mxu1 %v607_v54 }
 0x2f1   :  { %v591_v56 = vadd.f32 %v1716_v55, %v1449_v42  ;;  %v967_v55 = vld [vmem:[#allocation11 + $0x10] sm:$0xff] }
 0x2f2   :  { %v585_v57 = vpop.f32.mrf.mxu0 }
 0x2f3   :  { %v586_v58 = vadd.f32 %v1449_v42, %v585_v57  ;;  %v609_v59 = vmax.f32 %v591_v56, 0.0 }
 0x2f5   :  { %v608_v60 = vmax.f32 %v586_v58, 0.0 }
 0x2f7   :  { %1758 = vmatprep.mubr.f32.mxu1 %v608_v60  ;;  %v966_v60 = vld [vmem:[#allocation11 + $0x8] sm:$0xff] }
 0x2f8   :  { %v1719_v61 = vpop.f32.mrf.mxu0  ;;  %1759 = vmatmul.mubr.f32.gmra.mxu1 %v609_v59 }
 0x2f9   :  { %v601_v62 = vadd.f32 %v1719_v61, %v1449_v42  ;;  %v965_v61 = vld [vmem:[#allocation11] sm:$0xff] }
 0x2fa   :  { %v595_v63 = vpop.f32.mrf.mxu0 }
 0x2fb   :  { %v596_v0 = vadd.f32 %v1449_v42, %v595_v63  ;;  %v611_v1 = vmax.f32 %v601_v62, 0.0  ;;  %v976_v42 = vld [vmem:[#allocation11 + $0x58] sm:$0xff] }
 0x2fc   :  { %1772 = vmatprep.subr.mxu0 %v976_v42 }
 0x2fd   :  { %v610_v2 = vmax.f32 %v596_v0, 0.0  ;;  %1773 = vmatpush3.msra.mxu0 %v976_v42 }
 0x2fe   :  { %1774 = vmatprep.subr.mxu0 %v975_v43 }
 0x2ff   :  { %1761 = vmatprep.mubr.f32.mxu1 %v610_v2  ;;  %1775 = vmatpush3.msra.mxu0 %v975_v43 }
 0x300   :  { %1762 = vmatmul.mubr.f32.gmra.mxu1 %v611_v1  ;;  %1776 = vmatprep.subr.mxu0 %v974_v44 }
 0x301   :  { %1777 = vmatpush3.msra.mxu0 %v974_v44 }
 0x302   :  { %1778 = vmatprep.subr.mxu0 %v973_v45 }
 0x303   :  { %1779 = vmatpush3.msra.mxu0 %v973_v45 }
 0x304   :  { %1780 = vmatprep.subr.mxu0 %v972_v46 }
 0x305   :  { %1781 = vmatpush3.msra.mxu0 %v972_v46 }
 0x306   :  { %1782 = vmatprep.subr.mxu0 %v971_v47 }
 0x307   :  { %1783 = vmatpush3.msra.mxu0 %v971_v47 }
 0x308   :  { %1784 = vmatprep.subr.mxu0 %v970_v49 }
 0x309   :  { %1785 = vmatpush3.msra.mxu0 %v970_v49 }
 0x30a   :  { %1786 = vmatprep.subr.mxu0 %v969_v51 }
 0x30b   :  { %1787 = vmatpush3.msra.mxu0 %v969_v51 }
 0x30c   :  { %1788 = vmatprep.subr.mxu0 %v968_v53 }
 0x30d   :  { %1789 = vmatpush3.msra.mxu0 %v968_v53 }
 0x30e   :  { %1790 = vmatprep.subr.mxu0 %v967_v55 }
 0x30f   :  { %1791 = vmatpush3.msra.mxu0 %v967_v55 }
 0x310   :  { %1792 = vmatprep.subr.mxu0 %v966_v60 }
 0x311   :  { %1793 = vmatpush3.msra.mxu0 %v966_v60 }
 0x312   :  { %1794 = vmatprep.subr.mxu0 %v965_v61 }
 0x313   :  { %1795 = vmatpush3.msra.mxu0 %v965_v61 }
 0x3a8   :  { %v1754_v7 = vpop.f32.mrf.mxu1 }
 0x3a9   :  { %v2303_v9 = vadd.f32 %v1754_v7, %v1450_v6 }
 0x3aa   :  { %v701_v10 = vpop.f32.mrf.mxu1 }
 0x3ab   :  { %741 = vst [vmem:[#allocation17 + $0x8] sm:$0xff] %v2303_v9  ;;  %v789_v12 = vmul.f32 %v767_v8, %v2303_v9  ;;  %v2307_v13 = vadd.f32 %v1450_v6, %v701_v10  ;;  %v1116_v8 = vld [vmem:[#allocation13 + $0x78] sm:$0xff]  ;;  %v1114_v10 = vld [vmem:[#allocation13 + $0x68] sm:$0xff] }
 0x3ac   :  { %1808 = vmatprep.subr.mxu1 %v1116_v8 }
 0x3ad   :  { %740 = vst [vmem:[#allocation17] sm:$0xff] %v2307_v13  ;;  %806 = vrot.lane.b32.xlu1 %v789_v12, %s2113_s25  ;;  %v788_v14 = vmul.f32 %v765_v5, %v2307_v13  ;;  %1809 = vmatpush3.msra.mxu1 %v1116_v8  ;;  %v1112_v12 = vld [vmem:[#allocation13 + $0x58] sm:$0xff] }
 0x3af   :  { %804 = vrot.lane.b32.xlu0 %v788_v14, %s2113_s25  ;;  %v1108_v14 = vld [vmem:[#allocation13 + $0x38] sm:$0xff] }
 0x3b0   :  { %v1757_v15 = vpop.f32.mrf.mxu1 }
 0x3b1   :  { %v2313_v17 = vadd.f32 %v1757_v15, %v1450_v6  ;;  %v1107_v15 = vld [vmem:[#allocation13 + $0x30] sm:$0xff] }
 0x3b2   :  { %v711_v18 = vpop.f32.mrf.mxu1 }
 0x3b3   :  { %743 = vst [vmem:[#allocation17 + $0x18] sm:$0xff] %v2313_v17  ;;  %v791_v19 = vmul.f32 %v771_v16, %v2313_v17  ;;  %v2317_v20 = vadd.f32 %v1450_v6, %v711_v18  ;;  %v1106_v16 = vld [vmem:[#allocation13 + $0x28] sm:$0xff]  ;;  %v1451_v18 = vld [vmem:[%s2402_s10] ss:$0 sm:$0xff] }
 0x3b5   :  { %742 = vst [vmem:[#allocation17 + $0x10] sm:$0xff] %v2317_v20  ;;  %810 = vrot.lane.b32.xlu1 %v791_v19, %s2113_s25  ;;  %v790_v21 = vmul.f32 %v769_v11, %v2317_v20  ;;  %v1113_v11 = vld [vmem:[#allocation13 + $0x60] sm:$0xff] }
 0x3b7   :  { %808 = vrot.lane.b32.xlu0 %v790_v21, %s2113_s25 }
 0x3b8   :  { %v1760_v22 = vpop.f32.mrf.mxu1 }
 0x3b9   :  { %v2323_v24 = vadd.f32 %v1760_v22, %v1450_v6  ;;  %v1452_v22 = vld [vmem:[%s2403_s11] ss:$0 sm:$0xff] }
 0x3ba   :  { %v721_v25 = vpop.f32.mrf.mxu1 }
 0x3bb   :  { %745 = vst [vmem:[#allocation17 + $0x28] sm:$0xff] %v2323_v24  ;;  %v793_v27 = vmul.f32 %v775_v23, %v2323_v24  ;;  %v2327_v28 = vadd.f32 %v1450_v6, %v721_v25  ;;  %v1453_v23 = vld [vmem:[%s2402_s10 + $0x1] ss:$0 sm:$0xff] }
 0x3bd   :  { %744 = vst [vmem:[#allocation17 + $0x20] sm:$0xff] %v2327_v28  ;;  %v792_v29 = vmul.f32 %v773_v26, %v2327_v28  ;;  %814 = vrot.lane.b32.xlu1 %v793_v27, %s2113_s25 }
 0x3bf   :  { %812 = vrot.lane.b32.xlu0 %v792_v29, %s2113_s25 }
 0x3c0   :  { %v1763_v30 = vpop.f32.mrf.mxu1 }
 0x3c1   :  { %v2333_v32 = vadd.f32 %v1763_v30, %v1450_v6 }
 0x3c2   :  { %v731_v33 = vpop.f32.mrf.mxu1 }
 0x3c3   :  { %747 = vst [vmem:[#allocation17 + $0x38] sm:$0xff] %v2333_v32  ;;  %v795_v35 = vmul.f32 %v779_v31, %v2333_v32  ;;  %v2337_v36 = vadd.f32 %v1450_v6, %v731_v33 }
 0x3c5   :  { %746 = vst [vmem:[#allocation17 + $0x30] sm:$0xff] %v2337_v36  ;;  %v794_v37 = vmul.f32 %v777_v34, %v2337_v36  ;;  %818 = vrot.lane.b32.xlu1 %v795_v35, %s2113_s25 }
 0x3c7   :  { %816 = vrot.lane.b32.xlu0 %v794_v37, %s2113_s25 }
 0x41f   :  { %v807_v48 = vpop.permute.xlu1 %806 }
 0x420   :  { %v829_v50 = vadd.f32 %v807_v48, %v2303_v9  ;;  %v1115_v9 = vld [vmem:[#allocation13 + $0x70] sm:$0xff] }
 0x421   :  { %v805_v52 = vpop.permute.xlu0 %804  ;;  %1810 = vmatprep.subr.mxu1 %v1115_v9 }
 0x422   :  { %845 = vperm.xlu1 %1871, %v829_v50   ;;  %910 = vperm.xlu0 %1872, %v829_v50   ;;  %v828_v54 = vadd.f32 %v805_v52, %v2307_v13  ;;  %v1111_v13 = vld [vmem:[#allocation13 + $0x50] sm:$0xff] }
 0x423   :  { %1811 = vmatpush3.msra.mxu1 %v1115_v9 }
 0x424   :  { %1812 = vmatprep.subr.mxu1 %v1114_v10 }
 0x425   :  { %1813 = vmatpush3.msra.mxu1 %v1114_v10 }
 0x426   :  { %1874 = vset.pattern.permute.xlu1 %v2111_v3  ;;  %1873 = vset.pattern.permute.xlu0 %v2112_v4 }
 0x427   :  { %v811_v56 = vpop.permute.xlu1 %810  ;;  %906 = vperm.xlu1 %1874, %v828_v54   ;;  %840 = vperm.xlu0 %1873, %v828_v54  }
 0x428   :  { %v831_v58 = vadd.f32 %v811_v56, %v2313_v17  ;;  %1814 = vmatprep.subr.mxu1 %v1113_v11  ;;  %v1105_v17 = vld [vmem:[#allocation13 + $0x20] sm:$0xff] }
 0x429   :  { %v809_v57 = vpop.permute.xlu0 %808  ;;  %1815 = vmatpush3.msra.mxu1 %v1113_v11 }
 0x42a   :  { %v830_v59 = vadd.f32 %v809_v57, %v2317_v20  ;;  %1816 = vmatprep.subr.mxu1 %v1112_v12 }
 0x42b   :  { %1875 = vset.pattern.permute.xlu1 %v2112_v4  ;;  %1878 = vset.pattern.permute.xlu0 %v2111_v3 }
 0x42c   :  { %855 = vperm.xlu1 %1875, %v831_v58   ;;  %914 = vperm.xlu0 %1878, %v830_v59  }
 0x42d   :  { %1817 = vmatpush3.msra.mxu1 %v1112_v12 }
 0x42e   :  { %1818 = vmatprep.subr.mxu1 %v1111_v13 }
 0x42f   :  { %v815_v0 = vpop.permute.xlu1 %814  ;;  %1819 = vmatpush3.msra.mxu1 %v1111_v13 }
 0x430   :  { %1876 = vset.pattern.permute.xlu1 %v2111_v3  ;;  %1879 = vset.pattern.permute.xlu0 %v2112_v4  ;;  %v833_v1 = vadd.f32 %v815_v0, %v2323_v24 }
 0x431   :  { %918 = vperm.xlu1 %1876, %v831_v58   ;;  %v813_v62 = vpop.permute.xlu0 %812 }
 0x432   :  { %v832_v63 = vadd.f32 %v813_v62, %v2327_v28 }
 0x434   :  { %860 = vperm.xlu0 %1879, %v832_v63  }
 0x435   :  { %1877 = vset.pattern.permute.xlu1 %v2112_v4 }
 0x436   :  { %850 = vperm.xlu1 %1877, %v830_v59  }
 0x437   :  { %v819_v6 = vpop.permute.xlu1 %818 }
 0x438   :  { %1880 = vset.pattern.permute.xlu0 %v2111_v3  ;;  %v835_v7 = vadd.f32 %v819_v6, %v2333_v32 }
 0x439   :  { %926 = vperm.xlu0 %1880, %v833_v1   ;;  %v817_v2 = vpop.permute.xlu0 %816 }
 0x43a   :  { %v834_v5 = vadd.f32 %v817_v2, %v2337_v36  ;;  %865 = vperm.xlu1 %1877, %v833_v1  }
 0x43d   :  { %930 = vperm.xlu0 %1880, %v834_v5  }
 0x43e   :  { %1881 = vset.pattern.permute.xlu1 %v2111_v3 }
 0x43f   :  { %922 = vperm.xlu1 %1881, %v832_v63  }
 0x443   :  { %1882 = vset.pattern.permute.xlu1 %v2112_v4  ;;  %v1110_v4 = vld [vmem:[#allocation13 + $0x48] sm:$0xff] }
 0x444   :  { %875 = vperm.xlu1 %1882, %v835_v7   ;;  %1820 = vmatprep.subr.mxu1 %v1110_v4 }
 0x445   :  { %1821 = vmatpush3.msra.mxu1 %v1110_v4 }
 0x448   :  { %870 = vperm.xlu1 %1882, %v834_v5  }
 0x44c   :  { %1883 = vset.pattern.permute.xlu1 %v2111_v3  ;;  %v1109_v3 = vld [vmem:[#allocation13 + $0x40] sm:$0xff] }
 0x44d   :  { %934 = vperm.xlu1 %1883, %v835_v7   ;;  %1822 = vmatprep.subr.mxu1 %v1109_v3 }
 0x44e   :  { %1823 = vmatpush3.msra.mxu1 %v1109_v3  ;;  %v1104_v3 = vld [vmem:[#allocation13 + $0x18] sm:$0xff] }
 0x44f   :  { %1824 = vmatprep.subr.mxu1 %v1108_v14 }
 0x450   :  { %1825 = vmatpush3.msra.mxu1 %v1108_v14  ;;  %v1103_v14 = vld [vmem:[#allocation13 + $0x10] sm:$0xff] }
 0x451   :  { %1826 = vmatprep.subr.mxu1 %v1107_v15 }
 0x452   :  { %1827 = vmatpush3.msra.mxu1 %v1107_v15  ;;  %v1102_v15 = vld [vmem:[#allocation13 + $0x8] sm:$0xff] }
 0x453   :  { %1828 = vmatprep.subr.mxu1 %v1106_v16 }
 0x454   :  { %1829 = vmatpush3.msra.mxu1 %v1106_v16  ;;  %v1101_v16 = vld [vmem:[#allocation13] sm:$0xff] }
 0x455   :  { %1830 = vmatprep.subr.mxu1 %v1105_v17 }
 0x456   :  { %1831 = vmatpush3.msra.mxu1 %v1105_v17  ;;  %v1268_v17 = vld [vmem:[#allocation14 + $0xf8] sm:$0xff] }
 0x457   :  { %1832 = vmatprep.subr.mxu1 %v1104_v3  ;;  %1281 = vmatprep.subr.mxu0 %v1268_v17 }
 0x458   :  { %1833 = vmatpush3.msra.mxu1 %v1104_v3 }
 0x459   :  { %1834 = vmatprep.subr.mxu1 %v1103_v14 }
 0x45a   :  { %1835 = vmatpush3.msra.mxu1 %v1103_v14 }
 0x45b   :  { %1836 = vmatprep.subr.mxu1 %v1102_v15 }
 0x45c   :  { %1837 = vmatpush3.msra.mxu1 %v1102_v15 }
 0x45d   :  { %1838 = vmatprep.subr.mxu1 %v1101_v16 }
 0x45e   :  { %1839 = vmatpush3.msra.mxu1 %v1101_v16 }
 0x49d   :  { %v846_v19 = vpop.permute.xlu1 %845  ;;  %v911_v20 = vpop.permute.xlu0 %910 }
 0x49e   :  { %v883_v21 = vmul.f32 %v1451_v18, %v846_v19  ;;  %v942_v28 = vmul.f32 %v1453_v23, %v911_v20  ;;  %v1266_v19 = vld [vmem:[#allocation14 + $0xe8] sm:$0xff]  ;;  %v1265_v20 = vld [vmem:[#allocation14 + $0xe0] sm:$0xff] }
 0x4a0   :  { %v897_v24 = vadd.f32 %v1452_v22, %v883_v21  ;;  %v1264_v21 = vld [vmem:[#allocation14 + $0xd8] sm:$0xff] }
 0x4a2   :  { %v907_v25 = vpop.permute.xlu1 %906  ;;  %v841_v26 = vpop.permute.xlu0 %840  ;;  %v950_v31 = vadd.f32 %v942_v28, %v897_v24  ;;  %v1261_v24 = vld [vmem:[#allocation14 + $0xc0] sm:$0xff] }
 0x4a3   :  { %v882_v27 = vmul.f32 %v1451_v18, %v841_v26  ;;  %v941_v29 = vmul.f32 %v1453_v23, %v907_v25  ;;  %v1260_v25 = vld [vmem:[#allocation14 + $0xb8] sm:$0xff]  ;;  %v1259_v26 = vld [vmem:[#allocation14 + $0xb0] sm:$0xff]  ;;  %v1257_v28 = vld [vmem:[#allocation14 + $0xa0] sm:$0xff] }
 0x4a4   :  { %v958_v35 = vmax.f32 %v950_v31, 0.0  ;;  %v1254_v31 = vld [vmem:[#allocation14 + $0x88] sm:$0xff] }
 0x4a5   :  { %v896_v30 = vadd.f32 %v1452_v22, %v882_v27  ;;  %v1258_v27 = vld [vmem:[#allocation14 + $0xa8] sm:$0xff] }
 0x4a7   :  { %v856_v32 = vpop.permute.xlu1 %855  ;;  %v949_v33 = vadd.f32 %v941_v29, %v896_v30  ;;  %v915_v37 = vpop.permute.xlu0 %914  ;;  %v1256_v29 = vld [vmem:[#allocation14 + $0x98] sm:$0xff]  ;;  %v1255_v30 = vld [vmem:[#allocation14 + $0x90] sm:$0xff] }
 0x4a8   :  { %v885_v38 = vmul.f32 %v1451_v18, %v856_v32  ;;  %v943_v44 = vmul.f32 %v1453_v23, %v915_v37  ;;  %v1253_v32 = vld [vmem:[#allocation14 + $0x80] sm:$0xff]  ;;  %v1248_v37 = vld [vmem:[#allocation14 + $0x58] sm:$0xff] }
 0x4a9   :  { %v957_v34 = vmax.f32 %v949_v33, 0.0  ;;  %v1252_v33 = vld [vmem:[#allocation14 + $0x78] sm:$0xff] }
 0x4aa   :  { %v899_v43 = vadd.f32 %v1452_v22, %v885_v38  ;;  %v1247_v38 = vld [vmem:[#allocation14 + $0x50] sm:$0xff] }
 0x4ab   :  { %1796 = vmatprep.mubr.f32.mxu0 %v957_v34  ;;  %v1251_v34 = vld [vmem:[#allocation14 + $0x70] sm:$0xff] }
 0x4ac   :  { %v919_v36 = vpop.permute.xlu1 %918  ;;  %1797 = vmatmul.mubr.f32.vlgmr.msra.gmra.mxu0 %v958_v35  ;;  %v1250_v35 = vld [vmem:[#allocation14 + $0x68] sm:$0xff] }
 0x4ad   :  { %v944_v39 = vmul.f32 %v1453_v23, %v919_v36  ;;  %v1249_v36 = vld [vmem:[#allocation14 + $0x60] sm:$0xff] }
 0x4af   :  { %v861_v40 = vpop.permute.xlu0 %860  ;;  %v952_v46 = vadd.f32 %v944_v39, %v899_v43  ;;  %v1246_v39 = vld [vmem:[#allocation14 + $0x48] sm:$0xff] }
 0x4b0   :  { %v886_v50 = vmul.f32 %v1451_v18, %v861_v40  ;;  %v1245_v40 = vld [vmem:[#allocation14 + $0x40] sm:$0xff] }
 0x4b1   :  { %v851_v41 = vpop.permute.xlu1 %850  ;;  %v960_v54 = vmax.f32 %v952_v46, 0.0 }
 0x4b2   :  { %v884_v42 = vmul.f32 %v1451_v18, %v851_v41  ;;  %v900_v57 = vadd.f32 %v1452_v22, %v886_v50  ;;  %v1244_v41 = vld [vmem:[#allocation14 + $0x38] sm:$0xff] }
 0x4b4   :  { %v898_v45 = vadd.f32 %v1452_v22, %v884_v42  ;;  %v927_v51 = vpop.permute.xlu0 %926  ;;  %v1454_v42 = vld [vmem:[%s2405_s13] ss:$0 sm:$0xff] }
 0x4b5   :  { %v866_v47 = vpop.permute.xlu1 %865  ;;  %v946_v55 = vmul.f32 %v1453_v23, %v927_v51 }
 0x4b6   :  { %v887_v48 = vmul.f32 %v1451_v18, %v866_v47  ;;  %v951_v49 = vadd.f32 %v943_v44, %v898_v45 }
 0x4b8   :  { %v901_v52 = vadd.f32 %v1452_v22, %v887_v48  ;;  %v959_v53 = vmax.f32 %v951_v49, 0.0  ;;  %v931_v0 = vpop.permute.xlu0 %930 }
 0x4b9   :  { %v947_v6 = vmul.f32 %v1453_v23, %v931_v0 }
 0x4ba   :  { %v923_v56 = vpop.permute.xlu1 %922  ;;  %1799 = vmatprep.mubr.f32.mxu0 %v959_v53  ;;  %v954_v59 = vadd.f32 %v946_v55, %v901_v52 }
 0x4bb   :  { %v945_v58 = vmul.f32 %v1453_v23, %v923_v56  ;;  %1800 = vmatmul.mubr.f32.gmra.mxu0 %v960_v54 }
 0x4bc   :  { %v962_v63 = vmax.f32 %v954_v59, 0.0 }
 0x4bd   :  { %v953_v60 = vadd.f32 %v945_v58, %v900_v57 }
 0x4bf   :  { %v961_v61 = vmax.f32 %v953_v60, 0.0  ;;  %v876_v62 = vpop.permute.xlu1 %875 }
 0x4c0   :  { %v889_v5 = vmul.f32 %v1451_v18, %v876_v62 }
 0x4c1   :  { %1802 = vmatprep.mubr.f32.mxu0 %v961_v61 }
 0x4c2   :  { %1803 = vmatmul.mubr.f32.gmra.mxu0 %v962_v63  ;;  %v903_v10 = vadd.f32 %v1452_v22, %v889_v5  ;;  %v1243_v5 = vld [vmem:[#allocation14 + $0x30] sm:$0xff] }
 0x4c3   :  { %v871_v1 = vpop.permute.xlu1 %870 }
 0x4c4   :  { %v888_v2 = vmul.f32 %v1451_v18, %v871_v1  ;;  %v1267_v18 = vld [vmem:[#allocation14 + $0xf0] sm:$0xff] }
 0x4c5   :  { %1282 = vmatpush1.msra.mxu0 %v1267_v18 }
 0x4c6   :  { %v902_v7 = vadd.f32 %v1452_v22, %v888_v2  ;;  %1283 = vmatprep.subr.mxu0 %v1266_v19  ;;  %v1263_v22 = vld [vmem:[#allocation14 + $0xd0] sm:$0xff] }
 0x4c7   :  { %1284 = vmatpush1.msra.mxu0 %v1265_v20 }
 0x4c8   :  { %v935_v8 = vpop.permute.xlu1 %934  ;;  %v955_v9 = vadd.f32 %v947_v6, %v902_v7  ;;  %1285 = vmatprep.subr.mxu0 %v1264_v21  ;;  %v1242_v6 = vld [vmem:[#allocation14 + $0x28] sm:$0xff]  ;;  %v1241_v7 = vld [vmem:[#allocation14 + $0x20] sm:$0xff] }
 0x4c9   :  { %v948_v11 = vmul.f32 %v1453_v23, %v935_v8  ;;  %v1262_v23 = vld [vmem:[#allocation14 + $0xc8] sm:$0xff]  ;;  %1286 = vmatpush1.msra.mxu0 %v1263_v22  ;;  %v1240_v8 = vld [vmem:[#allocation14 + $0x18] sm:$0xff] }
 0x4ca   :  { %v963_v12 = vmax.f32 %v955_v9, 0.0  ;;  %1287 = vmatprep.subr.mxu0 %v1262_v23  ;;  %v1239_v9 = vld [vmem:[#allocation14 + $0x10] sm:$0xff] }
 0x4cb   :  { %v956_v13 = vadd.f32 %v948_v11, %v903_v10  ;;  %1288 = vmatpush1.msra.mxu0 %v1261_v24  ;;  %v1238_v10 = vld [vmem:[#allocation14 + $0x8] sm:$0xff]  ;;  %v1237_v11 = vld [vmem:[#allocation14] sm:$0xff] }
 0x4cc   :  { %1805 = vmatprep.mubr.f32.mxu0 %v963_v12  ;;  %1289 = vmatprep.subr.mxu0 %v1260_v25  ;;  %v2114_v12 = vmov 0.0  }
 0x4cd   :  { %v964_v4 = vmax.f32 %v956_v13, 0.0  ;;  %1290 = vmatpush1.msra.mxu0 %v1259_v26 }
 0x4ce   :  { %1291 = vmatprep.subr.mxu0 %v1258_v27 }
 0x4cf   :  { %1806 = vmatmul.mubr.f32.gmra.mxu0 %v964_v4  ;;  %v1455_v4 = vld [vmem:[%s2407_s15] ss:$0 sm:$0xff]  ;;  %s2115_s15 = smov [#allocation17]  }
 0x4d0   :  { %1292 = vmatpush1.msra.mxu0 %v1257_v28  ;;  %1345 = vmatprep.mubr.f32.mxu0 %v2114_v12  ;;  %s1427_s8 = sshll.u32 %s2115_s15, 4  ;;  %s1428_s8 = int_to_ptr.vmem [resolvable:$true] %s1427_s8 }
 0x4d1   :  { %1293 = vmatprep.subr.mxu0 %v1256_v29  ;;  %s2044_s29 = scalar_lea.vmem %s1428_s8, 1024  ;;  %p2049_p13 = scmp.lt.s32.totalorder %s1428_s8, %s1428_s8 }
 0x4d2   :  { %1294 = vmatpush1.msra.mxu0 %v1255_v30  ;;  %p2045_p12 = scmp.ne.s32.totalorder %s1428_s8, %s2044_s29  ;;  %p2050_p0 = scmp.lt.s32.totalorder %s2044_s29, %s2044_s29 }
 0x4d3   :  { %1295 = vmatprep.subr.mxu0 %v1254_v31 }
 0x4d4   :  { %1296 = vmatpush1.msra.mxu0 %v1253_v32  ;;  %p2051_p1 = por %p2050_p0, %p2049_p13 }
 0x4d5   :  { %1297 = vmatprep.subr.mxu0 %v1252_v33 }
 0x4d6   :  { %1298 = vmatpush1.msra.mxu0 %v1251_v34  ;;  %p2052_p2 = pnand %p2051_p1, %p2045_p12 }
 0x4d7   :  { %1299 = vmatprep.subr.mxu0 %v1250_v35 }
 0x4d8   :  { %1300 = vmatpush1.msra.mxu0 %v1249_v36 }
 0x4d9   :  { %1301 = vmatprep.subr.mxu0 %v1248_v37 }
 0x4da   :  { %1302 = vmatpush1.msra.mxu0 %v1247_v38 }
 0x4db   :  { %1303 = vmatprep.subr.mxu0 %v1246_v39 }
 0x4dc   :  { %1304 = vmatpush1.msra.mxu0 %v1245_v40 }
 0x4dd   :  { %1305 = vmatprep.subr.mxu0 %v1244_v41 }
 0x4de   :  { %1306 = vmatpush1.msra.mxu0 %v1243_v5 }
 0x4df   :  { %1307 = vmatprep.subr.mxu0 %v1242_v6 }
 0x4e0   :  { %1308 = vmatpush1.msra.mxu0 %v1241_v7 }
 0x4e1   :  { %1309 = vmatprep.subr.mxu0 %v1240_v8 }
 0x4e2   :  { %1310 = vmatpush1.msra.mxu0 %v1239_v9 }
 0x4e3   :  { %1311 = vmatprep.subr.mxu0 %v1238_v10 }
 0x4e4   :  { %1312 = vmatpush1.msra.mxu0 %v1237_v11 }
 0x56c   :  { %v1798_v43 = vpop.f32.mrf.mxu0 }
 0x56d   :  { %v1060_v44 = vadd.f32 %v1798_v43, %v1454_v42 }
 0x56e   :  { %v1054_v45 = vpop.f32.mrf.mxu0 }
 0x56f   :  { %v1055_v46 = vadd.f32 %v1454_v42, %v1054_v45  ;;  %v1094_v48 = vmax.f32 %v1060_v44, 0.0 }
 0x571   :  { %v1093_v47 = vmax.f32 %v1055_v46, 0.0 }
 0x573   :  { %1840 = vmatprep.mubr.f32.mxu1 %v1093_v47 }
 0x574   :  { %1841 = vmatmul.mubr.f32.vlgmr.msra.gmra.mxu1 %v1094_v48 }
 0x57b   :  { %v1801_v49 = vpop.f32.mrf.mxu0 }
 0x57c   :  { %v1070_v50 = vadd.f32 %v1801_v49, %v1454_v42 }
 0x57d   :  { %v1064_v51 = vpop.f32.mrf.mxu0 }
 0x57e   :  { %v1065_v52 = vadd.f32 %v1454_v42, %v1064_v51  ;;  %v1096_v54 = vmax.f32 %v1070_v50, 0.0 }
 0x580   :  { %v1095_v53 = vmax.f32 %v1065_v52, 0.0 }
 0x582   :  { %v1804_v55 = vpop.f32.mrf.mxu0  ;;  %1843 = vmatprep.mubr.f32.mxu1 %v1095_v53 }
 0x583   :  { %1844 = vmatmul.mubr.f32.gmra.mxu1 %v1096_v54  ;;  %v1080_v56 = vadd.f32 %v1804_v55, %v1454_v42 }
 0x584   :  { %v1074_v57 = vpop.f32.mrf.mxu0 }
 0x585   :  { %v1075_v58 = vadd.f32 %v1454_v42, %v1074_v57  ;;  %v1098_v60 = vmax.f32 %v1080_v56, 0.0 }
 0x587   :  { %v1097_v59 = vmax.f32 %v1075_v58, 0.0 }
 0x589   :  { %1846 = vmatprep.mubr.f32.mxu1 %v1097_v59 }
 0x58a   :  { %1847 = vmatmul.mubr.f32.gmra.mxu1 %v1098_v60 }
 0x58f   :  { %v1807_v61 = vpop.f32.mrf.mxu0 }
 0x590   :  { %v1090_v62 = vadd.f32 %v1807_v61, %v1454_v42 }
 0x591   :  { %v1084_v63 = vpop.f32.mrf.mxu0 }
 0x592   :  { %v1085_v0 = vadd.f32 %v1454_v42, %v1084_v63  ;;  %v1100_v2 = vmax.f32 %v1090_v62, 0.0 }
 0x594   :  { %v1099_v1 = vmax.f32 %v1085_v0, 0.0 }
 0x596   :  { %1849 = vmatprep.mubr.f32.mxu1 %v1099_v1 }
 0x597   :  { %1850 = vmatmul.mubr.f32.gmra.mxu1 %v1100_v2 }
 0x634   :  { %v1842_v13 = vpop.f32.mrf.mxu1 }
 0x635   :  { %v1196_v15 = vadd.f32 %v1842_v13, %v1455_v4 }
 0x636   :  { %v1190_v3 = vpop.f32.mrf.mxu1 }
 0x637   :  { %v1191_v14 = vadd.f32 %v1455_v4, %v1190_v3  ;;  %v1230_v17 = vmax.f32 %v1196_v15, 0.0 }
 0x639   :  { %v1229_v16 = vmax.f32 %v1191_v14, 0.0 }
 0x63b   :  { %1346 = vmatmul.mubr.f32.vlgmr.msra.gmra.mxu0 %v1229_v16 }
 0x63c   :  { %1351 = vmatprep.mubr.f32.mxu0 %v2114_v12 }
 0x63f   :  { %1352 = vmatmul.mubr.f32.gmra.mxu0 %v1230_v17 }
 0x640   :  { %1357 = vmatprep.mubr.f32.mxu0 %v2114_v12 }
 0x643   :  { %v1845_v18 = vpop.f32.mrf.mxu1 }
 0x644   :  { %v1206_v21 = vadd.f32 %v1845_v18, %v1455_v4 }
 0x645   :  { %v1200_v19 = vpop.f32.mrf.mxu1 }
 0x646   :  { %v1201_v20 = vadd.f32 %v1455_v4, %v1200_v19  ;;  %v1232_v24 = vmax.f32 %v1206_v21, 0.0 }
 0x648   :  { %v1231_v22 = vmax.f32 %v1201_v20, 0.0 }
 0x64a   :  { %v1848_v23 = vpop.f32.mrf.mxu1  ;;  %1358 = vmatmul.mubr.f32.gmra.mxu0 %v1231_v22 }
 0x64b   :  { %1363 = vmatprep.mubr.f32.mxu0 %v2114_v12  ;;  %v1216_v28 = vadd.f32 %v1848_v23, %v1455_v4 }
 0x64c   :  { %v1210_v25 = vpop.f32.mrf.mxu1 }
 0x64d   :  { %v1211_v26 = vadd.f32 %v1455_v4, %v1210_v25  ;;  %v1234_v29 = vmax.f32 %v1216_v28, 0.0 }
 0x64e   :  { %1364 = vmatmul.mubr.f32.gmra.mxu0 %v1232_v24 }
 0x64f   :  { %v1233_v27 = vmax.f32 %v1211_v26, 0.0  ;;  %1369 = vmatprep.mubr.f32.mxu0 %v2114_v12 }
 0x652   :  { %1370 = vmatmul.mubr.f32.gmra.mxu0 %v1233_v27 }
 0x653   :  { %1375 = vmatprep.mubr.f32.mxu0 %v2114_v12 }
 0x656   :  { %1376 = vmatmul.mubr.f32.gmra.mxu0 %v1234_v29 }
 0x657   :  { %v1851_v30 = vpop.f32.mrf.mxu1  ;;  %1381 = vmatprep.mubr.f32.mxu0 %v2114_v12 }
 0x658   :  { %v1226_v33 = vadd.f32 %v1851_v30, %v1455_v4 }
 0x659   :  { %v1220_v31 = vpop.f32.mrf.mxu1 }
 0x65a   :  { %v1221_v32 = vadd.f32 %v1455_v4, %v1220_v31  ;;  %v1236_v35 = vmax.f32 %v1226_v33, 0.0 }
 0x65c   :  { %v1235_v34 = vmax.f32 %v1221_v32, 0.0 }
 0x65e   :  { %1382 = vmatmul.mubr.f32.gmra.mxu0 %v1235_v34 }
 0x65f   :  { %1387 = vmatprep.mubr.f32.mxu0 %v2114_v12 }
 0x662   :  { %1388 = vmatmul.mubr.f32.gmra.mxu0 %v1236_v35 }
 0x663   :  { %2055 = shalt.err (!%p2052_p2)
}
 0x664   :  { %1433 = dma.vmem_to_hbm [thread:$0]  %s1428_s8, 1024, %s2411_s19, [#allocation18], %s2099_s21, %s2099_s21, %s2100_s1   ;;  %v1271_v36 = vlaneseq }
 0x665   :  { %v1269_v39 = vld [vmem:[%s2409_s17] sm:$0x3]  ;;  %s2116_s17 = smov [#allocation16]  }
 0x666   :  { %v1272_v37 = vshrl.u32 %v1271_v36, 7  ;;  %s1415_s19 = sshll.u32 %s2116_s17, 4  ;;  %s1416_s19 = int_to_ptr.vmem [resolvable:$true] %s1415_s19 }
 0x667   :  { %s2064_s21 = scalar_lea.vmem %s1416_s19, 2048  ;;  %p2069_p4 = scmp.lt.s32.totalorder %s1416_s19, %s1416_s19 }
 0x668   :  { %v1273_v38 = vsub.s32 0, %v1272_v37  ;;  %v1277_v40 = vsub.s32 1, %v1272_v37  ;;  %p2065_p3 = scmp.ne.s32.totalorder %s1416_s19, %s2064_s21  ;;  %p2070_p5 = scmp.lt.s32.totalorder %s2064_s21, %s2064_s21 }
 0x66a   :  { %v1274_v41 = vrot.slane %v1269_v39, %v1273_v38  ;;  %v1278_v42 = vrot.slane %v1269_v39, %v1277_v40  ;;  %p2071_p6 = por %p2070_p5, %p2069_p4 }
 0x66c   :  { %p2072_p7 = pnand %p2071_p6, %p2065_p3 }
 0x6fb   :  { %v1347_v43 = vpop.f32.mrf.mxu0 }
 0x6fc   :  { %v1348_v44 = vadd.f32 %v1347_v43, %v1274_v41 }
 0x6fd   :  { %v1349_v45 = vpop.f32.mrf.mxu0 }
 0x6fe   :  { %1394 = vst [vmem:[#allocation16] sm:$0xff] %v1348_v44  ;;  %v1350_v46 = vadd.f32 %v1349_v45, %v1278_v42 }
 0x6ff   :  { %v1353_v47 = vpop.f32.mrf.mxu0 }
 0x700   :  { %1395 = vst [vmem:[#allocation16 + $0x8] sm:$0xff] %v1350_v46  ;;  %v1354_v48 = vadd.f32 %v1353_v47, %v1274_v41 }
 0x701   :  { %v1355_v49 = vpop.f32.mrf.mxu0 }
 0x702   :  { %1396 = vst [vmem:[#allocation16 + $0x10] sm:$0xff] %v1354_v48  ;;  %v1356_v50 = vadd.f32 %v1355_v49, %v1278_v42 }
 0x704   :  { %1397 = vst [vmem:[#allocation16 + $0x18] sm:$0xff] %v1356_v50 }
 0x70a   :  { %v1359_v51 = vpop.f32.mrf.mxu0 }
 0x70b   :  { %v1360_v52 = vadd.f32 %v1359_v51, %v1274_v41 }
 0x70c   :  { %v1361_v53 = vpop.f32.mrf.mxu0 }
 0x70d   :  { %1398 = vst [vmem:[#allocation16 + $0x20] sm:$0xff] %v1360_v52  ;;  %v1362_v54 = vadd.f32 %v1361_v53, %v1278_v42 }
 0x70e   :  { %v1365_v55 = vpop.f32.mrf.mxu0 }
 0x70f   :  { %1399 = vst [vmem:[#allocation16 + $0x28] sm:$0xff] %v1362_v54  ;;  %v1366_v56 = vadd.f32 %v1365_v55, %v1274_v41 }
 0x710   :  { %v1367_v57 = vpop.f32.mrf.mxu0 }
 0x711   :  { %1400 = vst [vmem:[#allocation16 + $0x30] sm:$0xff] %v1366_v56  ;;  %v1368_v58 = vadd.f32 %v1367_v57, %v1278_v42 }
 0x712   :  { %v1371_v59 = vpop.f32.mrf.mxu0 }
 0x713   :  { %1401 = vst [vmem:[#allocation16 + $0x38] sm:$0xff] %v1368_v58  ;;  %v1372_v60 = vadd.f32 %v1371_v59, %v1274_v41 }
 0x714   :  { %v1373_v61 = vpop.f32.mrf.mxu0 }
 0x715   :  { %1402 = vst [vmem:[#allocation16 + $0x40] sm:$0xff] %v1372_v60  ;;  %v1374_v62 = vadd.f32 %v1373_v61, %v1278_v42 }
 0x716   :  { %v1377_v63 = vpop.f32.mrf.mxu0 }
 0x717   :  { %1403 = vst [vmem:[#allocation16 + $0x48] sm:$0xff] %v1374_v62  ;;  %v1378_v0 = vadd.f32 %v1377_v63, %v1274_v41 }
 0x718   :  { %v1379_v1 = vpop.f32.mrf.mxu0 }
 0x719   :  { %1404 = vst [vmem:[#allocation16 + $0x50] sm:$0xff] %v1378_v0  ;;  %v1380_v2 = vadd.f32 %v1379_v1, %v1278_v42 }
 0x71b   :  { %1405 = vst [vmem:[#allocation16 + $0x58] sm:$0xff] %v1380_v2 }
 0x71e   :  { %v1383_v5 = vpop.f32.mrf.mxu0 }
 0x71f   :  { %v1384_v6 = vadd.f32 %v1383_v5, %v1274_v41 }
 0x720   :  { %v1385_v7 = vpop.f32.mrf.mxu0 }
 0x721   :  { %1406 = vst [vmem:[#allocation16 + $0x60] sm:$0xff] %v1384_v6  ;;  %v1386_v8 = vadd.f32 %v1385_v7, %v1278_v42 }
 0x722   :  { %v1389_v9 = vpop.f32.mrf.mxu0 }
 0x723   :  { %1407 = vst [vmem:[#allocation16 + $0x68] sm:$0xff] %v1386_v8  ;;  %v1390_v10 = vadd.f32 %v1389_v9, %v1274_v41 }
 0x724   :  { %v1391_v11 = vpop.f32.mrf.mxu0 }
 0x725   :  { %1408 = vst [vmem:[#allocation16 + $0x70] sm:$0xff] %v1390_v10  ;;  %v1392_v12 = vadd.f32 %v1391_v11, %v1278_v42 }
 0x727   :  { %1409 = vst [vmem:[#allocation16 + $0x78] sm:$0xff] %v1392_v12 }
 0x728   :  { %2075 = shalt.err (!%p2072_p7)
}
 0x729   :  { %1421 = dma.vmem_to_hbm [thread:$0]  %s1416_s19, 2048, %s2410_s18, [#allocation4], %s2104_s6, %s2104_s6, %s2105_s24  }
 0x72a   :  { %2094 = dma.done.wait [#allocation4], 2048  }
 0x72b   :  { %2095 = vsyncadd [#allocation4], 4294965248 }
 0x72c   :  { %2096 = dma.done.wait [#allocation18], 1024  }
 0x72d   :  { %2097 = vsyncadd [#allocation18], 4294966272 }
 0x72e   :  { %1440 = vsyncpa [#allocation3], 1 }
 0x72f   :  { %1441 = vsyncpa [#allocation6], 1 }
 0x730   :  { %1442 = vsyncpa [#allocation9], 1 }
 0x731   :  { %1443 = vsyncpa [#allocation12], 1 }
 0x732   :  { %1444 = vsyncpa [#allocation15], 1 }
 0x733   :  { %1445 = vsyncpa [#allocation4], 1 }
 0x734   :  { %1446 = vsyncpa [#allocation18], 1 }

</bundles_post_ra>
